<compile_context>
chip_gen: v7x
topology: tpu7x:2x2x1
jax: 0.10.0
libtpu: 0.0.40
codegen_flags: <defaults>
</compile_context>

<pallas_src>
import functools

import jax
import jax.numpy as jnp
from jax.experimental import pallas as pl
from jax.experimental.pallas import tpu as pltpu


LANE = 128
_VMEM_LIMIT = 32 * 1024 * 1024   # safe on v5e/v6e (128 MiB) and v7x (64 MiB)


def _round_up(x, m):
    return (x + m - 1) // m * m


def _row_tile(m, target=256):
    # Full array (any size) is always legal; otherwise use a multiple-of-8 tile.
    return m if m <= target else target


# ----------------------------- Pallas kernels ------------------------------

def _matmul_bias_act_kernel(x_ref, w_ref, b_ref, o_ref, *, relu):
    # (tm, K) @ (K, N) -> f32 acc, + bias, optional ReLU, cast to out dtype.
    acc = jnp.dot(x_ref[...], w_ref[...], preferred_element_type=jnp.float32)
    acc = acc + b_ref[...]
    if relu:
        acc = jnp.maximum(acc, 0.0)
    o_ref[...] = acc.astype(o_ref.dtype)


def matmul_bias_act(x, w, b, *, relu, out_dtype=jnp.bfloat16, tile_rows=256):
    """out = x @ w + b (optional ReLU).  x:(M,K) bf16, w:(K,N) bf16, b:(N,) f32.

    M is tiled (pipelined, megacore-parallel); w / b stay resident in VMEM.
    """
    M, K = x.shape
    N = w.shape[1]
    tm = _row_tile(M, tile_rows)
    grid = (pl.cdiv(M, tm),)
    bytes_accessed = int(M * K * x.dtype.itemsize + K * N * w.dtype.itemsize
                         + N * 4 + M * N * jnp.dtype(out_dtype).itemsize)
    return pl.pallas_call(
        functools.partial(_matmul_bias_act_kernel, relu=relu),
        out_shape=jax.ShapeDtypeStruct((M, N), out_dtype),
        grid=grid,
        in_specs=[
            pl.BlockSpec((tm, K), lambda i: (i, 0)),
            pl.BlockSpec((K, N), lambda i: (0, 0)),
            pl.BlockSpec((1, N), lambda i: (0, 0)),
        ],
        out_specs=pl.BlockSpec((tm, N), lambda i: (i, 0)),
        compiler_params=pltpu.CompilerParams(
            dimension_semantics=("parallel",),
            vmem_limit_bytes=_VMEM_LIMIT),
        cost_estimate=pl.CostEstimate(flops=2 * M * K * N, transcendentals=0,
                                      bytes_accessed=bytes_accessed),
    )(x, w, b.reshape(1, N).astype(jnp.float32))


def _fc_fused_kernel(x_ref, w1_ref, b1_ref, w2_ref, b2_ref, o_ref):
    h = jnp.dot(x_ref[...], w1_ref[...], preferred_element_type=jnp.float32)
    h = h + b1_ref[...]
    # TODO(synk): nn.Dropout(p=0.5) is identity in eval mode; training-mode
    # stochastic dropout is not implemented.
    h = h.astype(jnp.bfloat16)
    out = jnp.dot(h, w2_ref[...], preferred_element_type=jnp.float32)
    o_ref[...] = out + b2_ref[...]


def fc_head(feat, w1, b1, w2, b2, tile_rows=256):
    """Fused fc1 -> (dropout=id) -> fc2.  feat:(M,K) bf16 -> (M,1) f32."""
    M, K = feat.shape
    H = w1.shape[1]
    N = w2.shape[1]
    tm = _row_tile(M, tile_rows)
    grid = (pl.cdiv(M, tm),)
    bytes_accessed = int(M * K * 2 + K * H * 2 + H * N * 2 + (H + N) * 4 + M * N * 4)
    return pl.pallas_call(
        _fc_fused_kernel,
        out_shape=jax.ShapeDtypeStruct((M, N), jnp.float32),
        grid=grid,
        in_specs=[
            pl.BlockSpec((tm, K), lambda i: (i, 0)),
            pl.BlockSpec((K, H), lambda i: (0, 0)),
            pl.BlockSpec((1, H), lambda i: (0, 0)),
            pl.BlockSpec((H, N), lambda i: (0, 0)),
            pl.BlockSpec((1, N), lambda i: (0, 0)),
        ],
        out_specs=pl.BlockSpec((tm, N), lambda i: (i, 0)),
        compiler_params=pltpu.CompilerParams(
            dimension_semantics=("parallel",),
            vmem_limit_bytes=_VMEM_LIMIT),
        cost_estimate=pl.CostEstimate(flops=2 * M * (K * H + H * N),
                                      transcendentals=0,
                                      bytes_accessed=bytes_accessed),
    )(feat, w1, b1.reshape(1, H).astype(jnp.float32),
      w2, b2.reshape(1, N).astype(jnp.float32))


def _max4_kernel(a_ref, b_ref, c_ref, d_ref, o_ref):
    o_ref[...] = jnp.maximum(jnp.maximum(a_ref[...], b_ref[...]),
                             jnp.maximum(c_ref[...], d_ref[...]))


def max4(a, b, c, d, tile_rows=256):
    """Elementwise max of four lane-dense 2D arrays (the 2x2 pool windows)."""
    R, C = a.shape
    tr = _row_tile(R, tile_rows)
    grid = (pl.cdiv(R, tr),)
    spec = pl.BlockSpec((tr, C), lambda i: (i, 0))
    return pl.pallas_call(
        _max4_kernel,
        out_shape=jax.ShapeDtypeStruct((R, C), a.dtype),
        grid=grid,
        in_specs=[spec, spec, spec, spec],
        out_specs=spec,
        compiler_params=pltpu.CompilerParams(
            dimension_semantics=("parallel",),
            vmem_limit_bytes=_VMEM_LIMIT),
    )(a, b, c, d)


# ------------------------------- layer glue --------------------------------

def _im2col(xp, k):
    # xp: (B, Hp, Wp, Cin), already zero padded.
    B, Hp, Wp, Cin = xp.shape
    Ho, Wo = Hp - k + 1, Wp - k + 1
    patches = [xp[:, kh:kh + Ho, kw:kw + Wo, :]
               for kh in range(k) for kw in range(k)]
    cols = jnp.stack(patches, axis=3)               # (B, Ho, Wo, k*k, Cin)
    return cols.reshape(B * Ho * Wo, k * k * Cin), (B, Ho, Wo)


def conv2d_relu(x, w, b, *, padding=1):
    # x: (B, H, W, C>=Cin) bf16 (possibly lane-padded channels)
    # w: (k, k, Cin, Cout) f32 ; b: (Cout,) f32
    k = w.shape[0]
    cin, cout = w.shape[2], w.shape[3]
    npad = _round_up(cout, LANE)
    wp = jnp.pad(w.reshape(k * k * cin, cout),
                 ((0, 0), (0, npad - cout))).astype(jnp.bfloat16)
    bp = jnp.pad(b, (0, npad - cout)).astype(jnp.float32)
    x = x[..., :cin]                                 # strip lane padding
    xp = jnp.pad(x, ((0, 0), (padding, padding), (padding, padding), (0, 0)))
    cols, (B, Ho, Wo) = _im2col(xp, k)
    out = matmul_bias_act(cols, wp, bp, relu=True)   # (B*Ho*Wo, npad) bf16
    return out.reshape(B, Ho, Wo, npad)


def maxpool_2x2(x):
    # MaxPool2d(kernel_size=2, stride=2), floor mode (crop odd trailing row/col).
    B, H, W, C = x.shape
    Ho, Wo = H // 2, W // 2
    xc = x[:, :2 * Ho, :2 * Wo, :]
    # lane-dense operands: (B*Ho, Wo*C) with C already padded to 128
    a = xc[:, 0::2, 0::2, :].reshape(B * Ho, Wo * C)
    b = xc[:, 0::2, 1::2, :].reshape(B * Ho, Wo * C)
    c = xc[:, 1::2, 0::2, :].reshape(B * Ho, Wo * C)
    d = xc[:, 1::2, 1::2, :].reshape(B * Ho, Wo * C)
    return max4(a, b, c, d).reshape(B, Ho, Wo, C)


# ------------------------------ model forward ------------------------------

def conv_branch_2d_regression_forward(params, x_nchw):
    """Equivalent of ConvBranch2dRegression.forward (eval mode)."""
    x = jnp.transpose(x_nchw, (0, 2, 3, 1)).astype(jnp.bfloat16)  # NCHW -> NHWC
    x = maxpool_2x2(conv2d_relu(x, params["w1"], params["b1"]))   # conv1 + pool
    x = maxpool_2x2(conv2d_relu(x, params["w2"], params["b2"]))   # conv2 + pool
    x = conv2d_relu(x, params["w3"], params["b3"])                # conv3
    x = conv2d_relu(x, params["w4"], params["b4"])                # conv4
    B = x.shape[0]
    c_real = params["w4"].shape[3]
    # torch flattens NCHW: x.view(B, -1) -> (C, H, W) ordering; strip lane pad.
    feat = jnp.transpose(x[..., :c_real], (0, 3, 1, 2)).reshape(B, -1)
    out = fc_head(feat,
                  params["wf1"].astype(jnp.bfloat16), params["bf1"],
                  params["wf2"].astype(jnp.bfloat16), params["bf2"])
    return out.reshape(-1)


# -------------------------- deterministic params ---------------------------

def _feature_hw(input_shape):
    # ConvCalculator with kernel_size=5, stride=1, padding=1 over 4 convs / 2 pools.
    def conv(s):
        return s + 2 * 1 - 5 + 1
    h, w = input_shape
    h, w = conv(h) // 2, conv(w) // 2      # conv1 + pool
    h, w = conv(h) // 2, conv(w) // 2      # conv2 + pool
    h, w = conv(h), conv(w)                # conv3
    h, w = conv(h), conv(w)                # conv4
    return h, w


def init_params(key, input_shape):
    h, w = _feature_hw(input_shape)
    feature_dim = 64 * h * w

    def conv_w(k_, cin, cout):
        std = (2.0 / (5 * 5 * cin)) ** 0.5
        return jax.random.normal(k_, (5, 5, cin, cout), jnp.float32) * std

    def lin_w(k_, fin, fout):
        std = (2.0 / fin) ** 0.5
        return jax.random.normal(k_, (fin, fout), jnp.float32) * std

    def bias(n):
        return 0.01 * jnp.arange(n, dtype=jnp.float32)

    ks = jax.random.split(key, 6)
    return {
        "w1": conv_w(ks[0], 1, 32),   "b1": bias(32),
        "w2": conv_w(ks[1], 32, 64),  "b2": bias(64),
        "w3": conv_w(ks[2], 64, 64),  "b3": bias(64),
        "w4": conv_w(ks[3], 64, 64),  "b4": bias(64),
        "wf1": lin_w(ks[4], feature_dim, 512), "bf1": bias(512),
        "wf2": lin_w(ks[5], 512, 1),           "bf2": bias(1),
    }


# --------------------------- pure-JAX reference ----------------------------

def reference_forward(params, x_nchw):
    x = jnp.transpose(x_nchw, (0, 2, 3, 1)).astype(jnp.float32)

    def conv(x_, w, b):
        dn = jax.lax.conv_dimension_numbers(x_.shape, w.shape, ("NHWC", "HWIO", "NHWC"))
        y = jax.lax.conv_general_dilated(x_, w, (1, 1), ((1, 1), (1, 1)),
                                         dimension_numbers=dn)
        return jnp.maximum(y + b, 0.0)

    def pool(x_):
        return jax.lax.reduce_window(x_, -jnp.inf, jax.lax.max,
                                     (1, 2, 2, 1), (1, 2, 2, 1), "VALID")

    x = pool(conv(x, params["w1"], params["b1"]))
    x = pool(conv(x, params["w2"], params["b2"]))
    x = conv(x, params["w3"], params["b3"])
    x = conv(x, params["w4"], params["b4"])
    B = x.shape[0]
    feat = jnp.transpose(x, (0, 3, 1, 2)).reshape(B, -1)
    h = feat @ params["wf1"] + params["bf1"]
    out = h @ params["wf2"] + params["bf2"]
    return out.reshape(-1)


# ----------------------------------- main -----------------------------------

if __name__ == "__main__":
    key = jax.random.PRNGKey(0)
    k_x, k_p = jax.random.split(key)

    # Smallest spatial size that keeps all four 5x5 "padding=1" convs valid is ~32.
    B, H, W = 2, 32, 32
    x = jax.random.normal(k_x, (B, 1, H, W), jnp.float32)   # PyTorch NCHW input
    params = init_params(k_p, (H, W))                       # feature_dim = 64*2*2 = 256

    fwd = jax.jit(conv_branch_2d_regression_forward)
    ref_fn = jax.jit(reference_forward)

    out = jax.block_until_ready(fwd(params, x))
    ref = jax.block_until_ready(ref_fn(params, x))

    assert out.shape == (B,), out.shape
    assert bool(jnp.allclose(out, ref, rtol=5e-2, atol=5e-2)), (out, ref)
    print("KERNEL_OK")
</pallas_src>

<mosaic_0001>
module attributes {stable_mosaic.version = 11 : i64} {
  func.func @_matmul_bias_act_kernel(%arg0: i32, %arg1: memref<256x25xbf16, #tpu.memory_space<vmem>>, %arg2: memref<25x128xbf16, #tpu.memory_space<vmem>>, %arg3: memref<1x128xf32, #tpu.memory_space<vmem>>, %arg4: memref<256x128xbf16, #tpu.memory_space<vmem>>) attributes {dimension_semantics = [#tpu.dimension_semantics<parallel>], iteration_bounds = array<i64: 8>, scalar_prefetch = 0 : i64, scratch_operands = 0 : i64, tpu.core_type = #tpu.core_type<tc>, window_params = [{transform_indices = @transform_0, window_bounds = array<i64: 256, 25>}, {pipeline_mode = #tpu.pipeline_mode<synchronous>, transform_indices = @transform_1, window_bounds = array<i64: 25, 128>}, {pipeline_mode = #tpu.pipeline_mode<synchronous>, transform_indices = @transform_2, window_bounds = array<i64: 1, 128>}, {transform_indices = @transform_3, window_bounds = array<i64: 256, 128>}]} {
    %c0 = arith.constant 0 : index
    %c0_0 = arith.constant 0 : index
    %0 = vector.load %arg1[%c0, %c0_0] : memref<256x25xbf16, #tpu.memory_space<vmem>>, vector<256x25xbf16>
    %c0_1 = arith.constant 0 : index
    %c0_2 = arith.constant 0 : index
    %1 = vector.load %arg2[%c0_1, %c0_2] : memref<25x128xbf16, #tpu.memory_space<vmem>>, vector<25x128xbf16>
    %cst = arith.constant dense<0.000000e+00> : vector<256x128xf32>
    %2 = tpu.matmul %0, %1, %cst {dimension_numbers = #tpu.dot_dimension_numbers<[1], [0], [0], [1], [0, 0, 1, 1], [], []>} : vector<256x25xbf16>, vector<25x128xbf16>, vector<256x128xf32> -> vector<256x128xf32>
    %c0_3 = arith.constant 0 : index
    %c0_4 = arith.constant 0 : index
    %3 = vector.load %arg3[%c0_3, %c0_4] : memref<1x128xf32, #tpu.memory_space<vmem>>, vector<1x128xf32>
    %4 = vector.broadcast %3 : vector<1x128xf32> to vector<256x128xf32>
    %5 = arith.addf %2, %4 : vector<256x128xf32>
    %cst_5 = arith.constant 0.000000e+00 : f32
    %6 = vector.broadcast %cst_5 : f32 to vector<256x128xf32>
    %7 = arith.maximumf %5, %6 : vector<256x128xf32>
    %8 = arith.truncf %7 : vector<256x128xf32> to vector<256x128xbf16>
    %c0_6 = arith.constant 0 : index
    %c0_7 = arith.constant 0 : index
    %9 = vector.load %arg4[%c0_6, %c0_7] : memref<256x128xbf16, #tpu.memory_space<vmem>>, vector<256x128xbf16>
    tpu.vector_store %arg4[%c0_6, %c0_7], %8 {strides = array<i32>} : memref<256x128xbf16, #tpu.memory_space<vmem>>, vector<256x128xbf16>,
    return
  }
  func.func @transform_0(%arg0: i32) -> (i32, i32) {
    %c0_i32 = arith.constant 0 : i32
    %c0_i32_0 = arith.constant 0 : i32
    return %arg0, %c0_i32 : i32, i32
  }
  func.func @transform_1(%arg0: i32) -> (i32, i32) {
    %c0_i32 = arith.constant 0 : i32
    %c0_i32_0 = arith.constant 0 : i32
    %c0_i32_1 = arith.constant 0 : i32
    return %c0_i32, %c0_i32_0 : i32, i32
  }
  func.func @transform_2(%arg0: i32) -> (i32, i32) {
    %c0_i32 = arith.constant 0 : i32
    %c0_i32_0 = arith.constant 0 : i32
    %c0_i32_1 = arith.constant 0 : i32
    return %c0_i32, %c0_i32_0 : i32, i32
  }
  func.func @transform_3(%arg0: i32) -> (i32, i32) {
    %c0_i32 = arith.constant 0 : i32
    %c0_i32_0 = arith.constant 0 : i32
    return %arg0, %c0_i32 : i32, i32
  }
}

module attributes {stable_mosaic.version = 11 : i64} {
  func.func @_max4_kernel(%arg0: i32, %arg1: memref<30x1920xbf16, #tpu.memory_space<vmem>>, %arg2: memref<30x1920xbf16, #tpu.memory_space<vmem>>, %arg3: memref<30x1920xbf16, #tpu.memory_space<vmem>>, %arg4: memref<30x1920xbf16, #tpu.memory_space<vmem>>, %arg5: memref<30x1920xbf16, #tpu.memory_space<vmem>>) attributes {dimension_semantics = [#tpu.dimension_semantics<parallel>], iteration_bounds = array<i64: 1>, scalar_prefetch = 0 : i64, scratch_operands = 0 : i64, tpu.core_type = #tpu.core_type<tc>, window_params = [{transform_indices = @transform_0, window_bounds = array<i64: 30, 1920>}, {transform_indices = @transform_1, window_bounds = array<i64: 30, 1920>}, {transform_indices = @transform_2, window_bounds = array<i64: 30, 1920>}, {transform_indices = @transform_3, window_bounds = array<i64: 30, 1920>}, {transform_indices = @transform_4, window_bounds = array<i64: 30, 1920>}]} {
    %c0 = arith.constant 0 : index
    %c0_0 = arith.constant 0 : index
    %0 = vector.load %arg1[%c0, %c0_0] : memref<30x1920xbf16, #tpu.memory_space<vmem>>, vector<30x1920xbf16>
    %c0_1 = arith.constant 0 : index
    %c0_2 = arith.constant 0 : index
    %1 = vector.load %arg2[%c0_1, %c0_2] : memref<30x1920xbf16, #tpu.memory_space<vmem>>, vector<30x1920xbf16>
    %2 = arith.maximumf %0, %1 : vector<30x1920xbf16>
    %c0_3 = arith.constant 0 : index
    %c0_4 = arith.constant 0 : index
    %3 = vector.load %arg3[%c0_3, %c0_4] : memref<30x1920xbf16, #tpu.memory_space<vmem>>, vector<30x1920xbf16>
    %c0_5 = arith.constant 0 : index
    %c0_6 = arith.constant 0 : index
    %4 = vector.load %arg4[%c0_5, %c0_6] : memref<30x1920xbf16, #tpu.memory_space<vmem>>, vector<30x1920xbf16>
    %5 = arith.maximumf %3, %4 : vector<30x1920xbf16>
    %6 = arith.maximumf %2, %5 : vector<30x1920xbf16>
    %c0_7 = arith.constant 0 : index
    %c0_8 = arith.constant 0 : index
    %7 = vector.load %arg5[%c0_7, %c0_8] : memref<30x1920xbf16, #tpu.memory_space<vmem>>, vector<30x1920xbf16>
    tpu.vector_store %arg5[%c0_7, %c0_8], %6 {strides = array<i32>} : memref<30x1920xbf16, #tpu.memory_space<vmem>>, vector<30x1920xbf16>,
    return
  }
  func.func @transform_0(%arg0: i32) -> (i32, i32) {
    %c0_i32 = arith.constant 0 : i32
    %c0_i32_0 = arith.constant 0 : i32
    return %arg0, %c0_i32 : i32, i32
  }
  func.func @transform_1(%arg0: i32) -> (i32, i32) {
    %c0_i32 = arith.constant 0 : i32
    %c0_i32_0 = arith.constant 0 : i32
    return %arg0, %c0_i32 : i32, i32
  }
  func.func @transform_2(%arg0: i32) -> (i32, i32) {
    %c0_i32 = arith.constant 0 : i32
    %c0_i32_0 = arith.constant 0 : i32
    return %arg0, %c0_i32 : i32, i32
  }
  func.func @transform_3(%arg0: i32) -> (i32, i32) {
    %c0_i32 = arith.constant 0 : i32
    %c0_i32_0 = arith.constant 0 : i32
    return %arg0, %c0_i32 : i32, i32
  }
  func.func @transform_4(%arg0: i32) -> (i32, i32) {
    %c0_i32 = arith.constant 0 : i32
    %c0_i32_0 = arith.constant 0 : i32
    return %arg0, %c0_i32 : i32, i32
  }
}

module attributes {stable_mosaic.version = 11 : i64} {
  func.func @_matmul_bias_act_kernel(%arg0: i32, %arg1: memref<256x800xbf16, #tpu.memory_space<vmem>>, %arg2: memref<800x128xbf16, #tpu.memory_space<vmem>>, %arg3: memref<1x128xf32, #tpu.memory_space<vmem>>, %arg4: memref<256x128xbf16, #tpu.memory_space<vmem>>) attributes {dimension_semantics = [#tpu.dimension_semantics<parallel>], iteration_bounds = array<i64: 2>, scalar_prefetch = 0 : i64, scratch_operands = 0 : i64, tpu.core_type = #tpu.core_type<tc>, window_params = [{transform_indices = @transform_0, window_bounds = array<i64: 256, 800>}, {pipeline_mode = #tpu.pipeline_mode<synchronous>, transform_indices = @transform_1, window_bounds = array<i64: 800, 128>}, {pipeline_mode = #tpu.pipeline_mode<synchronous>, transform_indices = @transform_2, window_bounds = array<i64: 1, 128>}, {transform_indices = @transform_3, window_bounds = array<i64: 256, 128>}]} {
    %c0 = arith.constant 0 : index
    %c0_0 = arith.constant 0 : index
    %0 = vector.load %arg1[%c0, %c0_0] : memref<256x800xbf16, #tpu.memory_space<vmem>>, vector<256x800xbf16>
    %c0_1 = arith.constant 0 : index
    %c0_2 = arith.constant 0 : index
    %1 = vector.load %arg2[%c0_1, %c0_2] : memref<800x128xbf16, #tpu.memory_space<vmem>>, vector<800x128xbf16>
    %cst = arith.constant dense<0.000000e+00> : vector<256x128xf32>
    %2 = tpu.matmul %0, %1, %cst {dimension_numbers = #tpu.dot_dimension_numbers<[1], [0], [0], [1], [0, 0, 1, 1], [], []>} : vector<256x800xbf16>, vector<800x128xbf16>, vector<256x128xf32> -> vector<256x128xf32>
    %c0_3 = arith.constant 0 : index
    %c0_4 = arith.constant 0 : index
    %3 = vector.load %arg3[%c0_3, %c0_4] : memref<1x128xf32, #tpu.memory_space<vmem>>, vector<1x128xf32>
    %4 = vector.broadcast %3 : vector<1x128xf32> to vector<256x128xf32>
    %5 = arith.addf %2, %4 : vector<256x128xf32>
    %cst_5 = arith.constant 0.000000e+00 : f32
    %6 = vector.broadcast %cst_5 : f32 to vector<256x128xf32>
    %7 = arith.maximumf %5, %6 : vector<256x128xf32>
    %8 = arith.truncf %7 : vector<256x128xf32> to vector<256x128xbf16>
    %c0_6 = arith.constant 0 : index
    %c0_7 = arith.constant 0 : index
    %9 = vector.load %arg4[%c0_6, %c0_7] : memref<256x128xbf16, #tpu.memory_space<vmem>>, vector<256x128xbf16>
    tpu.vector_store %arg4[%c0_6, %c0_7], %8 {strides = array<i32>} : memref<256x128xbf16, #tpu.memory_space<vmem>>, vector<256x128xbf16>,
    return
  }
  func.func @transform_0(%arg0: i32) -> (i32, i32) {
    %c0_i32 = arith.constant 0 : i32
    %c0_i32_0 = arith.constant 0 : i32
    return %arg0, %c0_i32 : i32, i32
  }
  func.func @transform_1(%arg0: i32) -> (i32, i32) {
    %c0_i32 = arith.constant 0 : i32
    %c0_i32_0 = arith.constant 0 : i32
    %c0_i32_1 = arith.constant 0 : i32
    return %c0_i32, %c0_i32_0 : i32, i32
  }
  func.func @transform_2(%arg0: i32) -> (i32, i32) {
    %c0_i32 = arith.constant 0 : i32
    %c0_i32_0 = arith.constant 0 : i32
    %c0_i32_1 = arith.constant 0 : i32
    return %c0_i32, %c0_i32_0 : i32, i32
  }
  func.func @transform_3(%arg0: i32) -> (i32, i32) {
    %c0_i32 = arith.constant 0 : i32
    %c0_i32_0 = arith.constant 0 : i32
    return %arg0, %c0_i32 : i32, i32
  }
}

module attributes {stable_mosaic.version = 11 : i64} {
  func.func @_max4_kernel(%arg0: i32, %arg1: memref<12x768xbf16, #tpu.memory_space<vmem>>, %arg2: memref<12x768xbf16, #tpu.memory_space<vmem>>, %arg3: memref<12x768xbf16, #tpu.memory_space<vmem>>, %arg4: memref<12x768xbf16, #tpu.memory_space<vmem>>, %arg5: memref<12x768xbf16, #tpu.memory_space<vmem>>) attributes {dimension_semantics = [#tpu.dimension_semantics<parallel>], iteration_bounds = array<i64: 1>, scalar_prefetch = 0 : i64, scratch_operands = 0 : i64, tpu.core_type = #tpu.core_type<tc>, window_params = [{transform_indices = @transform_0, window_bounds = array<i64: 12, 768>}, {transform_indices = @transform_1, window_bounds = array<i64: 12, 768>}, {transform_indices = @transform_2, window_bounds = array<i64: 12, 768>}, {transform_indices = @transform_3, window_bounds = array<i64: 12, 768>}, {transform_indices = @transform_4, window_bounds = array<i64: 12, 768>}]} {
    %c0 = arith.constant 0 : index
    %c0_0 = arith.constant 0 : index
    %0 = vector.load %arg1[%c0, %c0_0] : memref<12x768xbf16, #tpu.memory_space<vmem>>, vector<12x768xbf16>
    %c0_1 = arith.constant 0 : index
    %c0_2 = arith.constant 0 : index
    %1 = vector.load %arg2[%c0_1, %c0_2] : memref<12x768xbf16, #tpu.memory_space<vmem>>, vector<12x768xbf16>
    %2 = arith.maximumf %0, %1 : vector<12x768xbf16>
    %c0_3 = arith.constant 0 : index
    %c0_4 = arith.constant 0 : index
    %3 = vector.load %arg3[%c0_3, %c0_4] : memref<12x768xbf16, #tpu.memory_space<vmem>>, vector<12x768xbf16>
    %c0_5 = arith.constant 0 : index
    %c0_6 = arith.constant 0 : index
    %4 = vector.load %arg4[%c0_5, %c0_6] : memref<12x768xbf16, #tpu.memory_space<vmem>>, vector<12x768xbf16>
    %5 = arith.maximumf %3, %4 : vector<12x768xbf16>
    %6 = arith.maximumf %2, %5 : vector<12x768xbf16>
    %c0_7 = arith.constant 0 : index
    %c0_8 = arith.constant 0 : index
    %7 = vector.load %arg5[%c0_7, %c0_8] : memref<12x768xbf16, #tpu.memory_space<vmem>>, vector<12x768xbf16>
    tpu.vector_store %arg5[%c0_7, %c0_8], %6 {strides = array<i32>} : memref<12x768xbf16, #tpu.memory_space<vmem>>, vector<12x768xbf16>,
    return
  }
  func.func @transform_0(%arg0: i32) -> (i32, i32) {
    %c0_i32 = arith.constant 0 : i32
    %c0_i32_0 = arith.constant 0 : i32
    return %arg0, %c0_i32 : i32, i32
  }
  func.func @transform_1(%arg0: i32) -> (i32, i32) {
    %c0_i32 = arith.constant 0 : i32
    %c0_i32_0 = arith.constant 0 : i32
    return %arg0, %c0_i32 : i32, i32
  }
  func.func @transform_2(%arg0: i32) -> (i32, i32) {
    %c0_i32 = arith.constant 0 : i32
    %c0_i32_0 = arith.constant 0 : i32
    return %arg0, %c0_i32 : i32, i32
  }
  func.func @transform_3(%arg0: i32) -> (i32, i32) {
    %c0_i32 = arith.constant 0 : i32
    %c0_i32_0 = arith.constant 0 : i32
    return %arg0, %c0_i32 : i32, i32
  }
  func.func @transform_4(%arg0: i32) -> (i32, i32) {
    %c0_i32 = arith.constant 0 : i32
    %c0_i32_0 = arith.constant 0 : i32
    return %arg0, %c0_i32 : i32, i32
  }
}

module attributes {stable_mosaic.version = 11 : i64} {
  func.func @_matmul_bias_act_kernel(%arg0: i32, %arg1: memref<32x1600xbf16, #tpu.memory_space<vmem>>, %arg2: memref<1600x128xbf16, #tpu.memory_space<vmem>>, %arg3: memref<1x128xf32, #tpu.memory_space<vmem>>, %arg4: memref<32x128xbf16, #tpu.memory_space<vmem>>) attributes {dimension_semantics = [#tpu.dimension_semantics<parallel>], iteration_bounds = array<i64: 1>, scalar_prefetch = 0 : i64, scratch_operands = 0 : i64, tpu.core_type = #tpu.core_type<tc>, window_params = [{transform_indices = @transform_0, window_bounds = array<i64: 32, 1600>}, {pipeline_mode = #tpu.pipeline_mode<synchronous>, transform_indices = @transform_1, window_bounds = array<i64: 1600, 128>}, {pipeline_mode = #tpu.pipeline_mode<synchronous>, transform_indices = @transform_2, window_bounds = array<i64: 1, 128>}, {transform_indices = @transform_3, window_bounds = array<i64: 32, 128>}]} {
    %c0 = arith.constant 0 : index
    %c0_0 = arith.constant 0 : index
    %0 = vector.load %arg1[%c0, %c0_0] : memref<32x1600xbf16, #tpu.memory_space<vmem>>, vector<32x1600xbf16>
    %c0_1 = arith.constant 0 : index
    %c0_2 = arith.constant 0 : index
    %1 = vector.load %arg2[%c0_1, %c0_2] : memref<1600x128xbf16, #tpu.memory_space<vmem>>, vector<1600x128xbf16>
    %cst = arith.constant dense<0.000000e+00> : vector<32x128xf32>
    %2 = tpu.matmul %0, %1, %cst {dimension_numbers = #tpu.dot_dimension_numbers<[1], [0], [0], [1], [0, 0, 1, 1], [], []>} : vector<32x1600xbf16>, vector<1600x128xbf16>, vector<32x128xf32> -> vector<32x128xf32>
    %c0_3 = arith.constant 0 : index
    %c0_4 = arith.constant 0 : index
    %3 = vector.load %arg3[%c0_3, %c0_4] : memref<1x128xf32, #tpu.memory_space<vmem>>, vector<1x128xf32>
    %4 = vector.broadcast %3 : vector<1x128xf32> to vector<32x128xf32>
    %5 = arith.addf %2, %4 : vector<32x128xf32>
    %cst_5 = arith.constant 0.000000e+00 : f32
    %6 = vector.broadcast %cst_5 : f32 to vector<32x128xf32>
    %7 = arith.maximumf %5, %6 : vector<32x128xf32>
    %8 = arith.truncf %7 : vector<32x128xf32> to vector<32x128xbf16>
    %c0_6 = arith.constant 0 : index
    %c0_7 = arith.constant 0 : index
    %9 = vector.load %arg4[%c0_6, %c0_7] : memref<32x128xbf16, #tpu.memory_space<vmem>>, vector<32x128xbf16>
    tpu.vector_store %arg4[%c0_6, %c0_7], %8 {strides = array<i32>} : memref<32x128xbf16, #tpu.memory_space<vmem>>, vector<32x128xbf16>,
    return
  }
  func.func @transform_0(%arg0: i32) -> (i32, i32) {
    %c0_i32 = arith.constant 0 : i32
    %c0_i32_0 = arith.constant 0 : i32
    return %arg0, %c0_i32 : i32, i32
  }
  func.func @transform_1(%arg0: i32) -> (i32, i32) {
    %c0_i32 = arith.constant 0 : i32
    %c0_i32_0 = arith.constant 0 : i32
    %c0_i32_1 = arith.constant 0 : i32
    return %c0_i32, %c0_i32_0 : i32, i32
  }
  func.func @transform_2(%arg0: i32) -> (i32, i32) {
    %c0_i32 = arith.constant 0 : i32
    %c0_i32_0 = arith.constant 0 : i32
    %c0_i32_1 = arith.constant 0 : i32
    return %c0_i32, %c0_i32_0 : i32, i32
  }
  func.func @transform_3(%arg0: i32) -> (i32, i32) {
    %c0_i32 = arith.constant 0 : i32
    %c0_i32_0 = arith.constant 0 : i32
    return %arg0, %c0_i32 : i32, i32
  }
}

module attributes {stable_mosaic.version = 11 : i64} {
  func.func @_matmul_bias_act_kernel(%arg0: i32, %arg1: memref<8x1600xbf16, #tpu.memory_space<vmem>>, %arg2: memref<1600x128xbf16, #tpu.memory_space<vmem>>, %arg3: memref<1x128xf32, #tpu.memory_space<vmem>>, %arg4: memref<8x128xbf16, #tpu.memory_space<vmem>>) attributes {dimension_semantics = [#tpu.dimension_semantics<parallel>], iteration_bounds = array<i64: 1>, scalar_prefetch = 0 : i64, scratch_operands = 0 : i64, tpu.core_type = #tpu.core_type<tc>, window_params = [{transform_indices = @transform_0, window_bounds = array<i64: 8, 1600>}, {pipeline_mode = #tpu.pipeline_mode<synchronous>, transform_indices = @transform_1, window_bounds = array<i64: 1600, 128>}, {pipeline_mode = #tpu.pipeline_mode<synchronous>, transform_indices = @transform_2, window_bounds = array<i64: 1, 128>}, {transform_indices = @transform_3, window_bounds = array<i64: 8, 128>}]} {
    %c0 = arith.constant 0 : index
    %c0_0 = arith.constant 0 : index
    %0 = vector.load %arg1[%c0, %c0_0] : memref<8x1600xbf16, #tpu.memory_space<vmem>>, vector<8x1600xbf16>
    %c0_1 = arith.constant 0 : index
    %c0_2 = arith.constant 0 : index
    %1 = vector.load %arg2[%c0_1, %c0_2] : memref<1600x128xbf16, #tpu.memory_space<vmem>>, vector<1600x128xbf16>
    %cst = arith.constant dense<0.000000e+00> : vector<8x128xf32>
    %2 = tpu.matmul %0, %1, %cst {dimension_numbers = #tpu.dot_dimension_numbers<[1], [0], [0], [1], [0, 0, 1, 1], [], []>} : vector<8x1600xbf16>, vector<1600x128xbf16>, vector<8x128xf32> -> vector<8x128xf32>
    %c0_3 = arith.constant 0 : index
    %c0_4 = arith.constant 0 : index
    %3 = vector.load %arg3[%c0_3, %c0_4] : memref<1x128xf32, #tpu.memory_space<vmem>>, vector<1x128xf32>
    %4 = vector.broadcast %3 : vector<1x128xf32> to vector<8x128xf32>
    %5 = arith.addf %2, %4 : vector<8x128xf32>
    %cst_5 = arith.constant 0.000000e+00 : f32
    %6 = vector.broadcast %cst_5 : f32 to vector<8x128xf32>
    %7 = arith.maximumf %5, %6 : vector<8x128xf32>
    %8 = arith.truncf %7 : vector<8x128xf32> to vector<8x128xbf16>
    %c0_6 = arith.constant 0 : index
    %c0_7 = arith.constant 0 : index
    %9 = vector.load %arg4[%c0_6, %c0_7] : memref<8x128xbf16, #tpu.memory_space<vmem>>, vector<8x128xbf16>
    tpu.vector_store %arg4[%c0_6, %c0_7], %8 {strides = array<i32>} : memref<8x128xbf16, #tpu.memory_space<vmem>>, vector<8x128xbf16>,
    return
  }
  func.func @transform_0(%arg0: i32) -> (i32, i32) {
    %c0_i32 = arith.constant 0 : i32
    %c0_i32_0 = arith.constant 0 : i32
    return %arg0, %c0_i32 : i32, i32
  }
  func.func @transform_1(%arg0: i32) -> (i32, i32) {
    %c0_i32 = arith.constant 0 : i32
    %c0_i32_0 = arith.constant 0 : i32
    %c0_i32_1 = arith.constant 0 : i32
    return %c0_i32, %c0_i32_0 : i32, i32
  }
  func.func @transform_2(%arg0: i32) -> (i32, i32) {
    %c0_i32 = arith.constant 0 : i32
    %c0_i32_0 = arith.constant 0 : i32
    %c0_i32_1 = arith.constant 0 : i32
    return %c0_i32, %c0_i32_0 : i32, i32
  }
  func.func @transform_3(%arg0: i32) -> (i32, i32) {
    %c0_i32 = arith.constant 0 : i32
    %c0_i32_0 = arith.constant 0 : i32
    return %arg0, %c0_i32 : i32, i32
  }
}

module attributes {stable_mosaic.version = 11 : i64} {
  func.func @_fc_fused_kernel(%arg0: i32, %arg1: memref<2x256xbf16, #tpu.memory_space<vmem>>, %arg2: memref<256x512xbf16, #tpu.memory_space<vmem>>, %arg3: memref<1x512xf32, #tpu.memory_space<vmem>>, %arg4: memref<512x1xbf16, #tpu.memory_space<vmem>>, %arg5: memref<1x1xf32, #tpu.memory_space<vmem>>, %arg6: memref<2x1xf32, #tpu.memory_space<vmem>>) attributes {dimension_semantics = [#tpu.dimension_semantics<parallel>], iteration_bounds = array<i64: 1>, scalar_prefetch = 0 : i64, scratch_operands = 0 : i64, tpu.core_type = #tpu.core_type<tc>, window_params = [{transform_indices = @transform_0, window_bounds = array<i64: 2, 256>}, {pipeline_mode = #tpu.pipeline_mode<synchronous>, transform_indices = @transform_1, window_bounds = array<i64: 256, 512>}, {pipeline_mode = #tpu.pipeline_mode<synchronous>, transform_indices = @transform_2, window_bounds = array<i64: 1, 512>}, {pipeline_mode = #tpu.pipeline_mode<synchronous>, transform_indices = @transform_3, window_bounds = array<i64: 512, 1>}, {pipeline_mode = #tpu.pipeline_mode<synchronous>, transform_indices = @transform_4, window_bounds = array<i64: 1, 1>}, {transform_indices = @transform_5, window_bounds = array<i64: 2, 1>}]} {
    %c0 = arith.constant 0 : index
    %c0_0 = arith.constant 0 : index
    %0 = vector.load %arg1[%c0, %c0_0] : memref<2x256xbf16, #tpu.memory_space<vmem>>, vector<2x256xbf16>
    %c0_1 = arith.constant 0 : index
    %c0_2 = arith.constant 0 : index
    %1 = vector.load %arg2[%c0_1, %c0_2] : memref<256x512xbf16, #tpu.memory_space<vmem>>, vector<256x512xbf16>
    %cst = arith.constant dense<0.000000e+00> : vector<2x512xf32>
    %2 = tpu.matmul %0, %1, %cst {dimension_numbers = #tpu.dot_dimension_numbers<[1], [0], [0], [1], [0, 0, 1, 1], [], []>} : vector<2x256xbf16>, vector<256x512xbf16>, vector<2x512xf32> -> vector<2x512xf32>
    %c0_3 = arith.constant 0 : index
    %c0_4 = arith.constant 0 : index
    %3 = vector.load %arg3[%c0_3, %c0_4] : memref<1x512xf32, #tpu.memory_space<vmem>>, vector<1x512xf32>
    %4 = vector.broadcast %3 : vector<1x512xf32> to vector<2x512xf32>
    %5 = arith.addf %2, %4 : vector<2x512xf32>
    %6 = arith.truncf %5 : vector<2x512xf32> to vector<2x512xbf16>
    %c0_5 = arith.constant 0 : index
    %c0_6 = arith.constant 0 : index
    %7 = vector.load %arg4[%c0_5, %c0_6] : memref<512x1xbf16, #tpu.memory_space<vmem>>, vector<512x1xbf16>
    %cst_7 = arith.constant dense<0.000000e+00> : vector<2x1xf32>
    %8 = tpu.matmul %6, %7, %cst_7 {dimension_numbers = #tpu.dot_dimension_numbers<[1], [0], [0], [1], [0, 0, 1, 1], [], []>} : vector<2x512xbf16>, vector<512x1xbf16>, vector<2x1xf32> -> vector<2x1xf32>
    %c0_8 = arith.constant 0 : index
    %c0_9 = arith.constant 0 : index
    %9 = vector.load %arg5[%c0_8, %c0_9] : memref<1x1xf32, #tpu.memory_space<vmem>>, vector<1x1xf32>
    %10 = vector.broadcast %9 : vector<1x1xf32> to vector<2x1xf32>
    %11 = arith.addf %8, %10 : vector<2x1xf32>
    %c0_10 = arith.constant 0 : index
    %c0_11 = arith.constant 0 : index
    %12 = vector.load %arg6[%c0_10, %c0_11] : memref<2x1xf32, #tpu.memory_space<vmem>>, vector<2x1xf32>
    tpu.vector_store %arg6[%c0_10, %c0_11], %11 {strides = array<i32>} : memref<2x1xf32, #tpu.memory_space<vmem>>, vector<2x1xf32>,
    return
  }
  func.func @transform_0(%arg0: i32) -> (i32, i32) {
    %c0_i32 = arith.constant 0 : i32
    %c0_i32_0 = arith.constant 0 : i32
    return %arg0, %c0_i32 : i32, i32
  }
  func.func @transform_1(%arg0: i32) -> (i32, i32) {
    %c0_i32 = arith.constant 0 : i32
    %c0_i32_0 = arith.constant 0 : i32
    %c0_i32_1 = arith.constant 0 : i32
    return %c0_i32, %c0_i32_0 : i32, i32
  }
  func.func @transform_2(%arg0: i32) -> (i32, i32) {
    %c0_i32 = arith.constant 0 : i32
    %c0_i32_0 = arith.constant 0 : i32
    %c0_i32_1 = arith.constant 0 : i32
    return %c0_i32, %c0_i32_0 : i32, i32
  }
  func.func @transform_3(%arg0: i32) -> (i32, i32) {
    %c0_i32 = arith.constant 0 : i32
    %c0_i32_0 = arith.constant 0 : i32
    %c0_i32_1 = arith.constant 0 : i32
    return %c0_i32, %c0_i32_0 : i32, i32
  }
  func.func @transform_4(%arg0: i32) -> (i32, i32) {
    %c0_i32 = arith.constant 0 : i32
    %c0_i32_0 = arith.constant 0 : i32
    %c0_i32_1 = arith.constant 0 : i32
    return %c0_i32, %c0_i32_0 : i32, i32
  }
  func.func @transform_5(%arg0: i32) -> (i32, i32) {
    %c0_i32 = arith.constant 0 : i32
    %c0_i32_0 = arith.constant 0 : i32
    return %arg0, %c0_i32 : i32, i32
  }
}

</mosaic_0001>

<bundles_post_ra>
// kernel: conv_branch_2d_regression_forward.7
= control target key start
LH: loop header
LB: loop body
LE: loop exit
PB: predicated region body
PF: predicated region fallthrough
CT: control target
= control target key end

     0   :  { %s1569_s12 = smov 0   ;;  %s1571_s13 = smov 0   ;;  %s1837_s0 = inlined_call_operand.vmem [shape: bf16[1800,25], index: 0, kind: input, shape index: {}]   ;;  %s1838_s1 = inlined_call_operand.vmem [shape: bf16[25,128], index: 1, kind: input, shape index: {}]   ;;  %s1839_s2 = inlined_call_operand.vmem [shape: f32[1,128], index: 2, kind: input, shape index: {}]   ;;  %s1840_s3 = inlined_call_operand.vmem [shape: bf16[1800,128], index: 3, kind: output, shape index: {}]  }
   0x1   :  { %s1573_s14 = smov 0  }
   0x2 LB: > { %s1582_s15 = sadd.s32 4294967295, %s1514_s14   ;;  %s1584_s16 = sadd.s32 1, %s1514_s14   ;;  %s1514_s14 = sphi %s1573_s14, %s1847_s14   ;;  %s1510_s13 = sphi %s1571_s13, %s1846_s13   ;;  %s1506_s12 = sphi %s1569_s12, %s1845_s12  }
   0x3   : > { %s85_s17 = ssub.s32 %s1514_s14, %s1584_s16  ;;  %s88_s18 = sadd.s32 1, %s1510_s13 }
   0x4   : > { %p86_p0 = scmp.eq.s32.totalorder %s85_s17, 0  ;;  %p98_p1 = scmp.ne.s32.totalorder %s1510_s13, %s1506_s12 }
   0x5   : > { %p99_p2 = scmp.eq.s32.totalorder %s1582_s15, 7  ;;  %p1077_p3 = scmp.ge.s32.totalorder %s1514_s14, 1 }
   0x6   : > { %s1592_s19 = scalar_select %p86_p0, %s1510_s13, %s88_s18  }
   0x7   : > { %p1594_p4 = por %p99_p2, %p98_p1  ;;  %p146_p5 = scmp.lt.s32.totalorder %s1514_s14, 9 }
   0x9   : > { %p147_p6 = pnand %p1077_p3, %p146_p5 }
   0xa   : > { %v1442_v0 = vld [vmem:[%s1838_s1] sm:$0xff] (!%p147_p6)   ;;  %vm376_vm0 = vcmask (!%p147_p6), 1043456   ;;  %v1443_v1 = vld [vmem:[%s1838_s1 + $0x8] sm:$0x1f] (!%p147_p6)   ;;  %vm377_vm1 = vcmask (!%p147_p6), 1044480   ;;  %s1605_s25 = sshll.u32 (!%p147_p6), %s1582_s15, 5 }
   0xb   : > { %150 = sbr.rel (%p147_p6) target bundleno = 341 (0x155), region = 32  ;;  %1313 = vmatprep.subr.bf16.mxu0 (!%p147_p6), %v1442_v0  ;;  %1349 = vmatprep.subr.bf16.mxu1 (!%p147_p6), %v1442_v0  ;;  %v1548_v2 = vmov (!%p147_p6), 65535   ;;  %p178_p7 = scmp.lt.s32.totalorder (!%p147_p6), %s1605_s25, 224  ;;  %vm327_vm2 = vcmask (!%p147_p6), 203776   ;;  %v1649_v22 = vld [vmem:[%s1839_s2] ss:$0 sm:$0xff] (!%p147_p6) }
   0xc   : > { %1314 = vmatpush3.bf16.msra.mxu0 (!%p147_p6), %v1442_v0  ;;  %1351 = vmatpush3.bf16.msra.mxu1 (!%p147_p6), %v1442_v0  ;;  %v378_v3 = vsel (!%p147_p6), %vm376_vm0, 4294967295, %v1548_v2  ;;  %s170_s6 = sand.u32 (!%p147_p6), 1, %s1506_s12  }
   0xd   : > { %v379_v4 = vsel (!%p147_p6), %vm377_vm1, %v378_v3, 0  ;;  %s1078_s7 = sshll.u32 (!%p147_p6), %s170_s6, 7 }
   0xe   : > { %v381_v5 = vand.u32 (!%p147_p6), %v1443_v1, %v379_v4  ;;  %s1660_s8 = scalar_lea.vmem (!%p147_p6), [#allocation2], %s1078_s7  }
  0x10   : > { %1315 = vmatprep.subr.bf16.mxu0 (!%p147_p6), %v381_v5  ;;  %1350 = vmatprep.subr.bf16.mxu1 (!%p147_p6), %v381_v5 }
  0x11   : > { %1316 = vmatpush3.bf16.msra.mxu0 (!%p147_p6), %v381_v5  ;;  %1352 = vmatpush3.bf16.msra.mxu1 (!%p147_p6), %v381_v5 }
  0x12   : > { %s179_s26 = scalar_select %p178_p7, %s1605_s25, 224 }
  0x13   : > { %s744_s9 = ssub.s32 (%p1594_p4), 225, %s1605_s25  ;;  %s1197_s10 = sshll.u32 (%p1594_p4), %s1582_s15, 7 }
  0x14   : > { %s1080_s27 = sshll.u32 %s179_s26, 2  ;;  %p745_p8 = scmp.lt.s32.totalorder (%p1594_p4), %s744_s9, 32 }
  0x15   : > { %s1612_s30 = scalar_lea.vmem %s1837_s0, %s1080_s27  ;;  %s1709_s14 = scalar_lea.vmem (%p1594_p4), %s1840_s3, %s1197_s10  }
  0x16   : > { %v1444_v6 = vld [vmem:[%s1612_s30] sm:$0xff]   ;;  %v1446_v8 = vld [vmem:[%s1612_s30 + $0x8] sm:$0xff]   ;;  %v1448_v10 = vld [vmem:[%s1612_s30 + $0x10] sm:$0xff]  }
  0x17   : > { %v1445_v7 = vld [vmem:[%s1612_s30 + $0x40] sm:$0xff]   ;;  %1317 = vmatprep.mubr.msk.bf16.mxu0 %vm327_vm2, %v1444_v6  ;;  %v1447_v9 = vld [vmem:[%s1612_s30 + $0x48] sm:$0xff]   ;;  %v1449_v11 = vld [vmem:[%s1612_s30 + $0x50] sm:$0xff]  }
  0x18   : > { %1333 = vmatprep.mubr.msk.bf16.mxu1 %vm327_vm2, %v1445_v7  ;;  %1318 = vmatmul.mubr.msk.bf16.vlgmr.msra.gmra.mrb[0].mxu0 %vm327_vm2, %v1446_v8  ;;  %v1450_v12 = vld [vmem:[%s1612_s30 + $0x18] sm:$0xff]   ;;  %v1452_v14 = vld [vmem:[%s1612_s30 + $0x20] sm:$0xff]   ;;  %v1454_v16 = vld [vmem:[%s1612_s30 + $0x28] sm:$0xff]  }
  0x19   : > { %1334 = vmatmul.mubr.msk.bf16.vlgmr.msra.gmra.mrb[0].mxu1 %vm327_vm2, %v1447_v9  ;;  %1321 = vmatprep.mubr.msk.bf16.mxu0 %vm327_vm2, %v1448_v10  ;;  %v1451_v13 = vld [vmem:[%s1612_s30 + $0x58] sm:$0xff]   ;;  %v1453_v15 = vld [vmem:[%s1612_s30 + $0x60] sm:$0xff]   ;;  %v1455_v17 = vld [vmem:[%s1612_s30 + $0x68] sm:$0xff]  }
  0x1a   : > { %1337 = vmatprep.mubr.msk.bf16.mxu1 %vm327_vm2, %v1449_v11  ;;  %v1456_v18 = vld [vmem:[%s1612_s30 + $0x30] sm:$0xff]   ;;  %v1458_v20 = vld [vmem:[%s1612_s30 + $0x38] sm:$0xff]  }
  0x1b   : > { %v1457_v19 = vld [vmem:[%s1612_s30 + $0x70] sm:$0xff]   ;;  %v1459_v21 = vld [vmem:[%s1612_s30 + $0x78] sm:$0xff]  }
  0x20   : > { %1322 = vmatmul.mubr.msk.bf16.gmra.mrb[4].mxu0 %vm327_vm2, %v1450_v12 }
  0x21   : > { %1338 = vmatmul.mubr.msk.bf16.gmra.mrb[4].mxu1 %vm327_vm2, %v1451_v13  ;;  %1325 = vmatprep.mubr.msk.bf16.mxu0 %vm327_vm2, %v1452_v14 }
  0x22   : > { %1341 = vmatprep.mubr.msk.bf16.mxu1 %vm327_vm2, %v1453_v15 }
  0x28   : > { %1326 = vmatmul.mubr.msk.bf16.gmra.mrb[8].mxu0 %vm327_vm2, %v1454_v16 }
  0x29   : > { %1342 = vmatmul.mubr.msk.bf16.gmra.mrb[8].mxu1 %vm327_vm2, %v1455_v17  ;;  %1329 = vmatprep.mubr.msk.bf16.mxu0 %vm327_vm2, %v1456_v18 }
  0x2a   : > { %1345 = vmatprep.mubr.msk.bf16.mxu1 %vm327_vm2, %v1457_v19 }
  0x30   : > { %1330 = vmatmul.mubr.msk.bf16.gmra.mrb[12].mxu0 %vm327_vm2, %v1458_v20 }
  0x31   : > { %1346 = vmatmul.mubr.msk.bf16.gmra.mrb[12].mxu1 %vm327_vm2, %v1459_v21 }
  0xeb   : > { %v1319_v23 = vpop.f32.mrb[0].mxu0 }
  0xec   : > { %v426_v24 = vadd.f32 %v1319_v23, %v1649_v22  ;;  %v1335_v25 = vpop.f32.mrb[0].mxu1  ;;  %v417_v26 = vpop.f32.mrb[1].mxu0 }
  0xed   : > { %v490_v27 = vadd.f32 %v1335_v25, %v1649_v22  ;;  %v418_v28 = vadd.f32 %v1649_v22, %v417_v26  ;;  %v481_v29 = vpop.f32.mrb[1].mxu1  ;;  %v1320_v30 = vpop.f32.mrb[2].mxu0 }
  0xee   : > { %v482_v31 = vadd.f32 %v1649_v22, %v481_v29  ;;  %v429_v32 = vadd.f32 %v1320_v30, %v1649_v22  ;;  %v1336_v33 = vpop.f32.mrb[2].mxu1  ;;  %v420_v34 = vpop.f32.mrb[3].mxu0  ;;  %v546_v38 = vmax.f32 %v426_v24, 0.0 }
  0xef   : > { %v493_v35 = vadd.f32 %v1336_v33, %v1649_v22  ;;  %v421_v36 = vadd.f32 %v1649_v22, %v420_v34  ;;  %v484_v37 = vpop.f32.mrb[3].mxu1  ;;  %v562_v41 = vmax.f32 %v490_v27, 0.0  ;;  %v544_v42 = vmax.f32 %v418_v28, 0.0 }
  0xf0   : > { %v547_v39 = vmax.f32 %v429_v32, 0.0  ;;  %v485_v40 = vadd.f32 %v1649_v22, %v484_v37  ;;  %v560_v45 = vmax.f32 %v482_v31, 0.0 }
  0xf1   : > { %v563_v43 = vmax.f32 %v493_v35, 0.0  ;;  %v545_v44 = vmax.f32 %v421_v36, 0.0 }
  0xf2   : > { %v1208_v46 = vpack.c.bf16 %v547_v39, %v546_v38  ;;  %v561_v47 = vmax.f32 %v485_v40, 0.0 }
  0xf3   : > { %v1248_v48 = vpack.c.bf16 %v563_v43, %v562_v41  ;;  %v1203_v49 = vpack.c.bf16 %v545_v44, %v544_v42  ;;  %v1323_v50 = vpop.f32.mrb[4].mxu0 }
  0xf4   : > { %1280 = vst [vmem:[%s1660_s8 + $0x8] sm:$0xff] %v1208_v46   ;;  %v1243_v51 = vpack.c.bf16 %v561_v47, %v560_v45  ;;  %v442_v52 = vadd.f32 %v1323_v50, %v1649_v22  ;;  %v1339_v53 = vpop.f32.mrb[4].mxu1  ;;  %v433_v54 = vpop.f32.mrb[5].mxu0 }
  0xf5   : > { %1288 = vst [vmem:[%s1660_s8 + $0x48] sm:$0xff] %v1248_v48   ;;  %1204 = vst [vmem:[%s1660_s8] sm:$0xff] %v1203_v49   ;;  %v506_v55 = vadd.f32 %v1339_v53, %v1649_v22  ;;  %v434_v56 = vadd.f32 %v1649_v22, %v433_v54  ;;  %v497_v57 = vpop.f32.mrb[5].mxu1  ;;  %v1324_v58 = vpop.f32.mrb[6].mxu0 }
  0xf6   : > { %1287 = vst [vmem:[%s1660_s8 + $0x40] sm:$0xff] %v1243_v51   ;;  %v498_v59 = vadd.f32 %v1649_v22, %v497_v57  ;;  %v445_v60 = vadd.f32 %v1324_v58, %v1649_v22  ;;  %v1340_v61 = vpop.f32.mrb[6].mxu1  ;;  %v436_v62 = vpop.f32.mrb[7].mxu0  ;;  %v550_v2 = vmax.f32 %v442_v52, 0.0 }
  0xf7   : > { %v509_v63 = vadd.f32 %v1340_v61, %v1649_v22  ;;  %v437_v0 = vadd.f32 %v1649_v22, %v436_v62  ;;  %v500_v1 = vpop.f32.mrb[7].mxu1  ;;  %v566_v5 = vmax.f32 %v506_v55, 0.0  ;;  %v548_v6 = vmax.f32 %v434_v56, 0.0 }
  0xf8   : > { %v551_v3 = vmax.f32 %v445_v60, 0.0  ;;  %v501_v4 = vadd.f32 %v1649_v22, %v500_v1  ;;  %v564_v9 = vmax.f32 %v498_v59, 0.0 }
  0xf9   : > { %v567_v7 = vmax.f32 %v509_v63, 0.0  ;;  %v549_v8 = vmax.f32 %v437_v0, 0.0 }
  0xfa   : > { %v1218_v10 = vpack.c.bf16 %v551_v3, %v550_v2  ;;  %v565_v11 = vmax.f32 %v501_v4, 0.0 }
  0xfb   : > { %v1258_v12 = vpack.c.bf16 %v567_v7, %v566_v5  ;;  %v1213_v13 = vpack.c.bf16 %v549_v8, %v548_v6  ;;  %v1327_v14 = vpop.f32.mrb[8].mxu0 }
  0xfc   : > { %1282 = vst [vmem:[%s1660_s8 + $0x18] sm:$0xff] %v1218_v10   ;;  %v1253_v15 = vpack.c.bf16 %v565_v11, %v564_v9  ;;  %v458_v16 = vadd.f32 %v1327_v14, %v1649_v22  ;;  %v1343_v17 = vpop.f32.mrb[8].mxu1  ;;  %v449_v18 = vpop.f32.mrb[9].mxu0 }
  0xfd   : > { %1290 = vst [vmem:[%s1660_s8 + $0x58] sm:$0xff] %v1258_v12   ;;  %1281 = vst [vmem:[%s1660_s8 + $0x10] sm:$0xff] %v1213_v13   ;;  %v522_v19 = vadd.f32 %v1343_v17, %v1649_v22  ;;  %v450_v20 = vadd.f32 %v1649_v22, %v449_v18  ;;  %v513_v21 = vpop.f32.mrb[9].mxu1  ;;  %v1328_v23 = vpop.f32.mrb[10].mxu0 }
  0xfe   : > { %1289 = vst [vmem:[%s1660_s8 + $0x50] sm:$0xff] %v1253_v15   ;;  %v514_v24 = vadd.f32 %v1649_v22, %v513_v21  ;;  %v461_v25 = vadd.f32 %v1328_v23, %v1649_v22  ;;  %v1344_v26 = vpop.f32.mrb[10].mxu1  ;;  %v452_v27 = vpop.f32.mrb[11].mxu0  ;;  %v554_v31 = vmax.f32 %v458_v16, 0.0 }
  0xff   : > { %v525_v28 = vadd.f32 %v1344_v26, %v1649_v22  ;;  %v453_v29 = vadd.f32 %v1649_v22, %v452_v27  ;;  %v516_v30 = vpop.f32.mrb[11].mxu1  ;;  %v570_v34 = vmax.f32 %v522_v19, 0.0  ;;  %v552_v35 = vmax.f32 %v450_v20, 0.0 }
 0x100   : > { %v555_v32 = vmax.f32 %v461_v25, 0.0  ;;  %v517_v33 = vadd.f32 %v1649_v22, %v516_v30  ;;  %v568_v38 = vmax.f32 %v514_v24, 0.0 }
 0x101   : > { %v571_v36 = vmax.f32 %v525_v28, 0.0  ;;  %v553_v37 = vmax.f32 %v453_v29, 0.0 }
 0x102   : > { %v1228_v39 = vpack.c.bf16 %v555_v32, %v554_v31  ;;  %v569_v40 = vmax.f32 %v517_v33, 0.0 }
 0x103   : > { %v1268_v41 = vpack.c.bf16 %v571_v36, %v570_v34  ;;  %v1223_v42 = vpack.c.bf16 %v553_v37, %v552_v35  ;;  %v1331_v43 = vpop.f32.mrb[12].mxu0 }
 0x104   : > { %1284 = vst [vmem:[%s1660_s8 + $0x28] sm:$0xff] %v1228_v39   ;;  %v1263_v44 = vpack.c.bf16 %v569_v40, %v568_v38  ;;  %v474_v45 = vadd.f32 %v1331_v43, %v1649_v22  ;;  %v1347_v46 = vpop.f32.mrb[12].mxu1  ;;  %v465_v47 = vpop.f32.mrb[13].mxu0 }
 0x105   : > { %1292 = vst [vmem:[%s1660_s8 + $0x68] sm:$0xff] %v1268_v41   ;;  %1283 = vst [vmem:[%s1660_s8 + $0x20] sm:$0xff] %v1223_v42   ;;  %v538_v48 = vadd.f32 %v1347_v46, %v1649_v22  ;;  %v466_v49 = vadd.f32 %v1649_v22, %v465_v47  ;;  %v529_v50 = vpop.f32.mrb[13].mxu1  ;;  %v1332_v51 = vpop.f32.mrb[14].mxu0 }
 0x106   : > { %1291 = vst [vmem:[%s1660_s8 + $0x60] sm:$0xff] %v1263_v44   ;;  %v530_v52 = vadd.f32 %v1649_v22, %v529_v50  ;;  %v477_v53 = vadd.f32 %v1332_v51, %v1649_v22  ;;  %v1348_v54 = vpop.f32.mrb[14].mxu1  ;;  %v468_v55 = vpop.f32.mrb[15].mxu0  ;;  %v558_v59 = vmax.f32 %v474_v45, 0.0 }
 0x107   : > { %v541_v56 = vadd.f32 %v1348_v54, %v1649_v22  ;;  %v469_v57 = vadd.f32 %v1649_v22, %v468_v55  ;;  %v532_v58 = vpop.f32.mrb[15].mxu1  ;;  %v574_v62 = vmax.f32 %v538_v48, 0.0  ;;  %v556_v63 = vmax.f32 %v466_v49, 0.0 }
 0x108   : > { %v559_v60 = vmax.f32 %v477_v53, 0.0  ;;  %v533_v61 = vadd.f32 %v1649_v22, %v532_v58  ;;  %v572_v2 = vmax.f32 %v530_v52, 0.0  ;;  %742 = sbr.rel (!%p1594_p4) target bundleno = 341 (0x155), region = 36 }
 0x109   : > { %v575_v0 = vmax.f32 %v541_v56, 0.0  ;;  %v557_v1 = vmax.f32 %v469_v57, 0.0 }
 0x10a   : > { %v1238_v3 = vpack.c.bf16 %v559_v60, %v558_v59  ;;  %v573_v4 = vmax.f32 %v533_v61, 0.0 }
 0x10b   : > { %v1278_v5 = vpack.c.bf16 %v575_v0, %v574_v62  ;;  %v1233_v6 = vpack.c.bf16 %v557_v1, %v556_v63 }
 0x10c   : > { %1286 = vst [vmem:[%s1660_s8 + $0x38] sm:$0xff] %v1238_v3   ;;  %v1273_v7 = vpack.c.bf16 %v573_v4, %v572_v2 }
 0x10d   : > { %1294 = vst [vmem:[%s1660_s8 + $0x78] sm:$0xff] %v1278_v5   ;;  %1285 = vst [vmem:[%s1660_s8 + $0x30] sm:$0xff] %v1233_v6  }
 0x10e   : > { %1293 = vst [vmem:[%s1660_s8 + $0x70] sm:$0xff] %v1273_v7  }
 0x10f   : > { %s1849_s9 = smov (!%p745_p8, %s744_s9), 32 }
 0x110   : > { %s1150_s17 = sshll.u32 %s1849_s9, 6 }
 0x111   : > { %p1153_p9 = scmp.eq.s32.totalorder %s1150_s17, 0 }
 0x112   : > { %s1715_s18 = sshrl.u32 (!%p1153_p9), %s1849_s9, 5 }
 0x113   : > { %753 = sbr.rel (%p1153_p9) target bundleno = 341 (0x155), region = 40  ;;  %p1154_p10 = scmp.le.s32.totalorder (!%p1153_p9), %s1715_s18, 0 }
 0x11a   : > { %1030 = sbr.rel (%p1154_p10) target bundleno = 320 (0x140), region = 112  ;;  %s1842_s15 = smov (!%p1154_p10), %s1709_s14 }
 0x11b   : > { %s1843_s20 = smov (!%p1154_p10), %s1660_s8  ;;  %s1724_s21 = smov (!%p1154_p10), 0  }
 0x11c   : > { %s1726_s22 = smov (!%p1154_p10), 0  }
 0x121 LB: >> { %v769_v22 = vld [vmem:[%s1522_s20] sm:$0xf]  ;;  %v771_v8 = vld [vmem:[%s1522_s20 + $0x4] sm:$0xf]  ;;  %v773_v9 = vld [vmem:[%s1522_s20 + $0x8] sm:$0xf]  ;;  %s1530_s22 = sphi %s1726_s22, %s763_s22   ;;  %s1526_s21 = sphi %s1724_s21, %s1844_s21   ;;  %s1522_s20 = sphi %s1843_s20, %s838_s20   ;;  %s1518_s15 = sphi %s1842_s15, %s839_s15  }
 0x122   : >> { %770 = vst [vmem:[%s1518_s15] sm:$0xf] %v769_v22  ;;  %772 = vst [vmem:[%s1518_s15 + $0x4] sm:$0xf] %v771_v8  ;;  %v775_v10 = vld [vmem:[%s1522_s20 + $0xc] sm:$0xf]  ;;  %s833_s23 = sadd.s32 1, %s1526_s21 }
 0x123   : >> { %774 = vst [vmem:[%s1518_s15 + $0x8] sm:$0xf] %v773_v9  ;;  %v777_v11 = vld [vmem:[%s1522_s20 + $0x10] sm:$0xf]  ;;  %v779_v12 = vld [vmem:[%s1522_s20 + $0x14] sm:$0xf]  ;;  %p834_p11 = scmp.ge.s32.totalorder %s833_s23, %s1715_s18 }
 0x124   : >> { %776 = vst [vmem:[%s1518_s15 + $0xc] sm:$0xf] %v775_v10  ;;  %778 = vst [vmem:[%s1518_s15 + $0x10] sm:$0xf] %v777_v11  ;;  %v781_v13 = vld [vmem:[%s1522_s20 + $0x18] sm:$0xf] }
 0x125   : >> { %780 = vst [vmem:[%s1518_s15 + $0x14] sm:$0xf] %v779_v12  ;;  %v783_v14 = vld [vmem:[%s1522_s20 + $0x1c] sm:$0xf]  ;;  %v785_v15 = vld [vmem:[%s1522_s20 + $0x20] sm:$0xf] }
 0x126   : >> { %782 = vst [vmem:[%s1518_s15 + $0x18] sm:$0xf] %v781_v13  ;;  %784 = vst [vmem:[%s1518_s15 + $0x1c] sm:$0xf] %v783_v14  ;;  %v787_v16 = vld [vmem:[%s1522_s20 + $0x24] sm:$0xf] }
 0x127   : >> { %786 = vst [vmem:[%s1518_s15 + $0x20] sm:$0xf] %v785_v15  ;;  %v789_v17 = vld [vmem:[%s1522_s20 + $0x28] sm:$0xf]  ;;  %v791_v18 = vld [vmem:[%s1522_s20 + $0x2c] sm:$0xf] }
 0x128   : >> { %788 = vst [vmem:[%s1518_s15 + $0x24] sm:$0xf] %v787_v16  ;;  %790 = vst [vmem:[%s1518_s15 + $0x28] sm:$0xf] %v789_v17  ;;  %v793_v19 = vld [vmem:[%s1522_s20 + $0x30] sm:$0xf] }
 0x129   : >> { %792 = vst [vmem:[%s1518_s15 + $0x2c] sm:$0xf] %v791_v18  ;;  %v795_v20 = vld [vmem:[%s1522_s20 + $0x34] sm:$0xf]  ;;  %v797_v21 = vld [vmem:[%s1522_s20 + $0x38] sm:$0xf] }
 0x12a   : >> { %794 = vst [vmem:[%s1518_s15 + $0x30] sm:$0xf] %v793_v19  ;;  %796 = vst [vmem:[%s1518_s15 + $0x34] sm:$0xf] %v795_v20  ;;  %v799_v23 = vld [vmem:[%s1522_s20 + $0x3c] sm:$0xf] }
 0x12b   : >> { %798 = vst [vmem:[%s1518_s15 + $0x38] sm:$0xf] %v797_v21  ;;  %v801_v24 = vld [vmem:[%s1522_s20 + $0x40] sm:$0xf]  ;;  %v803_v25 = vld [vmem:[%s1522_s20 + $0x44] sm:$0xf] }
 0x12c   : >> { %800 = vst [vmem:[%s1518_s15 + $0x3c] sm:$0xf] %v799_v23  ;;  %802 = vst [vmem:[%s1518_s15 + $0x40] sm:$0xf] %v801_v24  ;;  %v805_v26 = vld [vmem:[%s1522_s20 + $0x48] sm:$0xf] }
 0x12d   : >> { %804 = vst [vmem:[%s1518_s15 + $0x44] sm:$0xf] %v803_v25  ;;  %v807_v27 = vld [vmem:[%s1522_s20 + $0x4c] sm:$0xf]  ;;  %v809_v28 = vld [vmem:[%s1522_s20 + $0x50] sm:$0xf] }
 0x12e   : >> { %806 = vst [vmem:[%s1518_s15 + $0x48] sm:$0xf] %v805_v26  ;;  %808 = vst [vmem:[%s1518_s15 + $0x4c] sm:$0xf] %v807_v27  ;;  %v811_v29 = vld [vmem:[%s1522_s20 + $0x54] sm:$0xf] }
 0x12f   : >> { %810 = vst [vmem:[%s1518_s15 + $0x50] sm:$0xf] %v809_v28  ;;  %v813_v30 = vld [vmem:[%s1522_s20 + $0x58] sm:$0xf]  ;;  %v815_v31 = vld [vmem:[%s1522_s20 + $0x5c] sm:$0xf] }
 0x130   : >> { %812 = vst [vmem:[%s1518_s15 + $0x54] sm:$0xf] %v811_v29  ;;  %814 = vst [vmem:[%s1518_s15 + $0x58] sm:$0xf] %v813_v30  ;;  %v817_v32 = vld [vmem:[%s1522_s20 + $0x60] sm:$0xf] }
 0x131   : >> { %816 = vst [vmem:[%s1518_s15 + $0x5c] sm:$0xf] %v815_v31  ;;  %v819_v33 = vld [vmem:[%s1522_s20 + $0x64] sm:$0xf]  ;;  %v821_v34 = vld [vmem:[%s1522_s20 + $0x68] sm:$0xf] }
 0x132   : >> { %818 = vst [vmem:[%s1518_s15 + $0x60] sm:$0xf] %v817_v32  ;;  %820 = vst [vmem:[%s1518_s15 + $0x64] sm:$0xf] %v819_v33  ;;  %v823_v35 = vld [vmem:[%s1522_s20 + $0x6c] sm:$0xf] }
 0x133   : >> { %822 = vst [vmem:[%s1518_s15 + $0x68] sm:$0xf] %v821_v34  ;;  %v825_v36 = vld [vmem:[%s1522_s20 + $0x70] sm:$0xf]  ;;  %v827_v37 = vld [vmem:[%s1522_s20 + $0x74] sm:$0xf] }
 0x134   : >> { %824 = vst [vmem:[%s1518_s15 + $0x6c] sm:$0xf] %v823_v35  ;;  %826 = vst [vmem:[%s1518_s15 + $0x70] sm:$0xf] %v825_v36  ;;  %v829_v38 = vld [vmem:[%s1522_s20 + $0x78] sm:$0xf] }
 0x135   : >> { %828 = vst [vmem:[%s1518_s15 + $0x74] sm:$0xf] %v827_v37  ;;  %v831_v39 = vld [vmem:[%s1522_s20 + $0x7c] sm:$0xf]  ;;  %830 = vst [vmem:[%s1518_s15 + $0x78] sm:$0xf] %v829_v38 }
 0x136   : >> { %832 = vst [vmem:[%s1518_s15 + $0x7c] sm:$0xf] %v831_v39  ;;  %s1851_s23 = smov (%p834_p11, %s833_s23), 0  ;;  %s763_s22 = sadd.s32 1, %s1530_s22  }
 0x137   : >> { %s1155_s24 = sshll.u32 %s1851_s23, 7  ;;  %p762_p12 = scmp.ge.s32.totalorder %s763_s22, %s1715_s18 }
 0x138   : >> { %s838_s20 = scalar_lea.vmem %s1660_s8, %s1155_s24 [#allocation2]   ;;  %s839_s15 = scalar_lea.vmem %s1709_s14, %s1155_s24  }
 0x139   : >> { %s1844_s21 = smov %s1851_s23  ;;  %765 = sbr.rel (!%p762_p12) target bundleno = 289 (0x121), region = 118 }
 0x140 PF: > { %s1819_s25 = sand.u32 31, %s1849_s9   ;;  %s1198_s26 = sshll.u32 %s1715_s18, 7 }
 0x141   : > { %s844_s27 = scalar_lea.vmem %s1660_s8, %s1198_s26 [#allocation2]   ;;  %s846_s28 = scalar_lea.vmem %s1709_s14, %s1198_s26  }
 0x142   : > { %p1160_p13 = scmp.le.s32.totalorder %s1819_s25, 0 }
 0x143   : > { %s1532_s29 = smov (!%p1160_p13), %s846_s28   ;;  %s1536_s30 = smov (!%p1160_p13), %s844_s27  }
 0x144   : > { %1044 = sbr.rel (%p1160_p13) target bundleno = 341 (0x155), region = 123  ;;  %s1540_s4 = smov (!%p1160_p13), 0  }
 0x145   : > { %s1544_s5 = smov (!%p1160_p13), 0  }
 0x14b LB: >> { %v856_v40 = vld [vmem:[%s1538_s30] sm:$0xf]  ;;  %s858_s6 = sadd.s32 1, %s1542_s4  ;;  %s850_s5 = sadd.s32 1, %s1546_s5   ;;  %s1546_s5 = sphi %s1544_s5, %s850_s5   ;;  %s1542_s4 = sphi %s1540_s4, %s1541_s4   ;;  %s1538_s30 = sphi %s1536_s30, %s863_s30   ;;  %s1534_s29 = sphi %s1532_s29, %s864_s29  }
 0x14c   : >> { %857 = vst [vmem:[%s1534_s29] sm:$0xf] %v856_v40  ;;  %p859_p0 = scmp.ge.s32.totalorder %s858_s6, %s1819_s25  ;;  %p849_p1 = scmp.ge.s32.totalorder %s850_s5, %s1819_s25 }
 0x14e   : >> { %s1853_s6 = smov (%p859_p0, %s858_s6), 0  ;;  %852 = sbr.rel (!%p849_p1) target bundleno = 331 (0x14b), region = 129 }
 0x14f   : >> { %s1161_s7 = sshll.u32 %s1853_s6, 2  ;;  %s1541_s4 = smov %s1853_s6  }
 0x150   : >> { %s863_s30 = scalar_lea.vmem %s844_s27, %s1161_s7 [#allocation2]   ;;  %s864_s29 = scalar_lea.vmem %s846_s28, %s1161_s7  }
 0x155 PF: > { %p10_p2 = scmp.ge.s32.totalorder %s1584_s16, 10   ;;  %s1845_s12 = smov %s1510_s13 }
 0x156   : > { %s1846_s13 = smov %s1592_s19  ;;  %s1847_s14 = smov %s1584_s16 }
 0x157   :  { %12 = sbr.rel (!%p10_p2) target bundleno = 2 (0x2), region = 140 }

// kernel: conv_branch_2d_regression_forward.8
= control target key start
LH: loop header
LB: loop body
LE: loop exit
PB: predicated region body
PF: predicated region fallthrough
CT: control target
= control target key end

     0   :  { %s782_s0 = inlined_call_operand.vmem [shape: bf16[30,1920], index: 0, kind: input, shape index: {}]   ;;  %s783_s1 = inlined_call_operand.vmem [shape: bf16[30,1920], index: 1, kind: input, shape index: {}]   ;;  %s784_s2 = inlined_call_operand.vmem [shape: bf16[30,1920], index: 2, kind: input, shape index: {}]   ;;  %s785_s3 = inlined_call_operand.vmem [shape: bf16[30,1920], index: 3, kind: input, shape index: {}]   ;;  %s786_s4 = inlined_call_operand.vmem [shape: bf16[30,1920], index: 4, kind: output, shape index: {}]  }
   0x1   :  { %v17_v0 = vld [vmem:[%s782_s0] sm:$0xff]  ;;  %v18_v5 = vld [vmem:[%s782_s0 + $0x8] sm:$0xff]  ;;  %v19_v11 = vld [vmem:[%s782_s0 + $0x10] sm:$0xff] }
   0x2   :  { %v49_v1 = vld [vmem:[%s783_s1] sm:$0xff]  ;;  %v50_v6 = vld [vmem:[%s783_s1 + $0x8] sm:$0xff]  ;;  %v51_v13 = vld [vmem:[%s783_s1 + $0x10] sm:$0xff] }
   0x3   :  { %v113_v2 = vld [vmem:[%s784_s2] sm:$0xff]  ;;  %v81_v3 = vmax.bf16 %v49_v1, %v17_v0  ;;  %v82_v8 = vmax.bf16 %v50_v6, %v18_v5  ;;  %v114_v9 = vld [vmem:[%s784_s2 + $0x8] sm:$0xff]  ;;  %v115_v14 = vld [vmem:[%s784_s2 + $0x10] sm:$0xff]  ;;  %v83_v17 = vmax.bf16 %v51_v13, %v19_v11 }
   0x4   :  { %v145_v4 = vld [vmem:[%s785_s3] sm:$0xff]  ;;  %v146_v10 = vld [vmem:[%s785_s3 + $0x8] sm:$0xff]  ;;  %v147_v15 = vld [vmem:[%s785_s3 + $0x10] sm:$0xff] }
   0x5   :  { %v177_v7 = vmax.bf16 %v145_v4, %v113_v2  ;;  %v178_v12 = vmax.bf16 %v146_v10, %v114_v9  ;;  %v179_v18 = vmax.bf16 %v147_v15, %v115_v14  ;;  %v20_v19 = vld [vmem:[%s782_s0 + $0x18] sm:$0xff]  ;;  %v21_v25 = vld [vmem:[%s782_s0 + $0x20] sm:$0xff]  ;;  %v22_v32 = vld [vmem:[%s782_s0 + $0x28] sm:$0xff] }
   0x6   :  { %v52_v20 = vld [vmem:[%s783_s1 + $0x18] sm:$0xff]  ;;  %v53_v26 = vld [vmem:[%s783_s1 + $0x20] sm:$0xff]  ;;  %v54_v34 = vld [vmem:[%s783_s1 + $0x28] sm:$0xff] }
   0x7   :  { %v209_v16 = vmax.bf16 %v177_v7, %v81_v3  ;;  %v116_v21 = vld [vmem:[%s784_s2 + $0x18] sm:$0xff]  ;;  %v210_v22 = vmax.bf16 %v178_v12, %v82_v8  ;;  %v84_v23 = vmax.bf16 %v52_v20, %v20_v19  ;;  %v211_v27 = vmax.bf16 %v179_v18, %v83_v17  ;;  %v117_v30 = vld [vmem:[%s784_s2 + $0x20] sm:$0xff]  ;;  %v118_v35 = vld [vmem:[%s784_s2 + $0x28] sm:$0xff] }
   0x8   :  { %v148_v24 = vld [vmem:[%s785_s3 + $0x18] sm:$0xff]  ;;  %v85_v29 = vmax.bf16 %v53_v26, %v21_v25  ;;  %v149_v31 = vld [vmem:[%s785_s3 + $0x20] sm:$0xff]  ;;  %v150_v36 = vld [vmem:[%s785_s3 + $0x28] sm:$0xff]  ;;  %v86_v38 = vmax.bf16 %v54_v34, %v22_v32 }
   0x9   :  { %241 = vst [vmem:[%s786_s4] sm:$0xff] %v209_v16  ;;  %v180_v28 = vmax.bf16 %v148_v24, %v116_v21  ;;  %242 = vst [vmem:[%s786_s4 + $0x8] sm:$0xff] %v210_v22  ;;  %v181_v33 = vmax.bf16 %v149_v31, %v117_v30  ;;  %v182_v39 = vmax.bf16 %v150_v36, %v118_v35  ;;  %v23_v40 = vld [vmem:[%s782_s0 + $0x30] sm:$0xff]  ;;  %v24_v46 = vld [vmem:[%s782_s0 + $0x38] sm:$0xf] }
   0xa   :  { %243 = vst [vmem:[%s786_s4 + $0x10] sm:$0xff] %v211_v27  ;;  %v55_v41 = vld [vmem:[%s783_s1 + $0x30] sm:$0xff]  ;;  %v56_v47 = vld [vmem:[%s783_s1 + $0x38] sm:$0xf]  ;;  %v25_v53 = vld [vmem:[%s782_s0 + $0x3c] sm:$0xff] }
   0xb   :  { %v212_v37 = vmax.bf16 %v180_v28, %v84_v23  ;;  %v119_v42 = vld [vmem:[%s784_s2 + $0x30] sm:$0xff]  ;;  %v213_v43 = vmax.bf16 %v181_v33, %v85_v29  ;;  %v87_v44 = vmax.bf16 %v55_v41, %v23_v40  ;;  %v214_v48 = vmax.bf16 %v182_v39, %v86_v38  ;;  %v120_v51 = vld [vmem:[%s784_s2 + $0x38] sm:$0xf]  ;;  %v57_v55 = vld [vmem:[%s783_s1 + $0x3c] sm:$0xff] }
   0xc   :  { %v151_v45 = vld [vmem:[%s785_s3 + $0x30] sm:$0xff]  ;;  %v88_v50 = vmax.bf16 %v56_v47, %v24_v46  ;;  %v152_v52 = vld [vmem:[%s785_s3 + $0x38] sm:$0xf]  ;;  %v121_v56 = vld [vmem:[%s784_s2 + $0x3c] sm:$0xff]  ;;  %v89_v59 = vmax.bf16 %v57_v55, %v25_v53 }
   0xd   :  { %244 = vst [vmem:[%s786_s4 + $0x18] sm:$0xff] %v212_v37  ;;  %v183_v49 = vmax.bf16 %v151_v45, %v119_v42  ;;  %245 = vst [vmem:[%s786_s4 + $0x20] sm:$0xff] %v213_v43  ;;  %v184_v54 = vmax.bf16 %v152_v52, %v120_v51  ;;  %v153_v57 = vld [vmem:[%s785_s3 + $0x3c] sm:$0xff]  ;;  %v26_v61 = vld [vmem:[%s782_s0 + $0x44] sm:$0xff] }
   0xe   :  { %246 = vst [vmem:[%s786_s4 + $0x28] sm:$0xff] %v214_v48  ;;  %v185_v60 = vmax.bf16 %v153_v57, %v121_v56  ;;  %v58_v62 = vld [vmem:[%s783_s1 + $0x44] sm:$0xff]  ;;  %v27_v3 = vld [vmem:[%s782_s0 + $0x4c] sm:$0xff]  ;;  %v28_v10 = vld [vmem:[%s782_s0 + $0x54] sm:$0xff] }
   0xf   :  { %v215_v58 = vmax.bf16 %v183_v49, %v87_v44  ;;  %v122_v63 = vld [vmem:[%s784_s2 + $0x44] sm:$0xff]  ;;  %v216_v0 = vmax.bf16 %v184_v54, %v88_v50  ;;  %v90_v1 = vmax.bf16 %v58_v62, %v26_v61  ;;  %v59_v4 = vld [vmem:[%s783_s1 + $0x4c] sm:$0xff]  ;;  %v60_v12 = vld [vmem:[%s783_s1 + $0x54] sm:$0xff] }
  0x10   :  { %v154_v2 = vld [vmem:[%s785_s3 + $0x44] sm:$0xff]  ;;  %v217_v5 = vmax.bf16 %v185_v60, %v89_v59  ;;  %v91_v7 = vmax.bf16 %v59_v4, %v27_v3  ;;  %v123_v8 = vld [vmem:[%s784_s2 + $0x4c] sm:$0xff]  ;;  %v124_v13 = vld [vmem:[%s784_s2 + $0x54] sm:$0xff]  ;;  %v92_v16 = vmax.bf16 %v60_v12, %v28_v10 }
  0x11   :  { %247 = vst [vmem:[%s786_s4 + $0x30] sm:$0xff] %v215_v58  ;;  %v186_v6 = vmax.bf16 %v154_v2, %v122_v63  ;;  %v155_v9 = vld [vmem:[%s785_s3 + $0x4c] sm:$0xff]  ;;  %248 = vst [vmem:[%s786_s4 + $0x38] sm:$0xf] %v216_v0  ;;  %v156_v14 = vld [vmem:[%s785_s3 + $0x54] sm:$0xff] }
  0x12   :  { %v187_v11 = vmax.bf16 %v155_v9, %v123_v8  ;;  %249 = vst [vmem:[%s786_s4 + $0x3c] sm:$0xff] %v217_v5  ;;  %v188_v17 = vmax.bf16 %v156_v14, %v124_v13  ;;  %v29_v18 = vld [vmem:[%s782_s0 + $0x5c] sm:$0xff]  ;;  %v30_v24 = vld [vmem:[%s782_s0 + $0x64] sm:$0xff]  ;;  %v31_v31 = vld [vmem:[%s782_s0 + $0x6c] sm:$0xff] }
  0x13   :  { %v218_v15 = vmax.bf16 %v186_v6, %v90_v1  ;;  %v61_v19 = vld [vmem:[%s783_s1 + $0x5c] sm:$0xff]  ;;  %v62_v25 = vld [vmem:[%s783_s1 + $0x64] sm:$0xff]  ;;  %v63_v33 = vld [vmem:[%s783_s1 + $0x6c] sm:$0xff] }
  0x14   :  { %v125_v20 = vld [vmem:[%s784_s2 + $0x5c] sm:$0xff]  ;;  %v219_v21 = vmax.bf16 %v187_v11, %v91_v7  ;;  %v93_v22 = vmax.bf16 %v61_v19, %v29_v18  ;;  %v220_v26 = vmax.bf16 %v188_v17, %v92_v16  ;;  %v94_v28 = vmax.bf16 %v62_v25, %v30_v24  ;;  %v126_v29 = vld [vmem:[%s784_s2 + $0x64] sm:$0xff]  ;;  %v127_v34 = vld [vmem:[%s784_s2 + $0x6c] sm:$0xff] }
  0x15   :  { %v157_v23 = vld [vmem:[%s785_s3 + $0x5c] sm:$0xff]  ;;  %250 = vst [vmem:[%s786_s4 + $0x44] sm:$0xff] %v218_v15  ;;  %v158_v30 = vld [vmem:[%s785_s3 + $0x64] sm:$0xff]  ;;  %v159_v35 = vld [vmem:[%s785_s3 + $0x6c] sm:$0xff]  ;;  %v95_v37 = vmax.bf16 %v63_v33, %v31_v31 }
  0x16   :  { %v189_v27 = vmax.bf16 %v157_v23, %v125_v20  ;;  %251 = vst [vmem:[%s786_s4 + $0x4c] sm:$0xff] %v219_v21  ;;  %v190_v32 = vmax.bf16 %v158_v30, %v126_v29  ;;  %252 = vst [vmem:[%s786_s4 + $0x54] sm:$0xff] %v220_v26  ;;  %v191_v38 = vmax.bf16 %v159_v35, %v127_v34  ;;  %v32_v39 = vld [vmem:[%s782_s0 + $0x74] sm:$0xf]  ;;  %v33_v45 = vld [vmem:[%s782_s0 + $0x78] sm:$0xff] }
  0x17   :  { %v64_v40 = vld [vmem:[%s783_s1 + $0x74] sm:$0xf]  ;;  %v65_v46 = vld [vmem:[%s783_s1 + $0x78] sm:$0xff]  ;;  %v34_v52 = vld [vmem:[%s782_s0 + $0x80] sm:$0xff] }
  0x18   :  { %v221_v36 = vmax.bf16 %v189_v27, %v93_v22  ;;  %v128_v41 = vld [vmem:[%s784_s2 + $0x74] sm:$0xf]  ;;  %v222_v42 = vmax.bf16 %v190_v32, %v94_v28  ;;  %v96_v43 = vmax.bf16 %v64_v40, %v32_v39  ;;  %v223_v47 = vmax.bf16 %v191_v38, %v95_v37  ;;  %v129_v50 = vld [vmem:[%s784_s2 + $0x78] sm:$0xff]  ;;  %v66_v54 = vld [vmem:[%s783_s1 + $0x80] sm:$0xff] }
  0x19   :  { %v160_v44 = vld [vmem:[%s785_s3 + $0x74] sm:$0xf]  ;;  %v97_v49 = vmax.bf16 %v65_v46, %v33_v45  ;;  %v161_v51 = vld [vmem:[%s785_s3 + $0x78] sm:$0xff]  ;;  %v130_v55 = vld [vmem:[%s784_s2 + $0x80] sm:$0xff]  ;;  %v98_v58 = vmax.bf16 %v66_v54, %v34_v52 }
  0x1a   :  { %253 = vst [vmem:[%s786_s4 + $0x5c] sm:$0xff] %v221_v36  ;;  %v192_v48 = vmax.bf16 %v160_v44, %v128_v41  ;;  %254 = vst [vmem:[%s786_s4 + $0x64] sm:$0xff] %v222_v42  ;;  %v193_v53 = vmax.bf16 %v161_v51, %v129_v50  ;;  %v162_v56 = vld [vmem:[%s785_s3 + $0x80] sm:$0xff]  ;;  %v35_v60 = vld [vmem:[%s782_s0 + $0x88] sm:$0xff] }
  0x1b   :  { %255 = vst [vmem:[%s786_s4 + $0x6c] sm:$0xff] %v223_v47  ;;  %v194_v59 = vmax.bf16 %v162_v56, %v130_v55  ;;  %v67_v61 = vld [vmem:[%s783_s1 + $0x88] sm:$0xff]  ;;  %v36_v2 = vld [vmem:[%s782_s0 + $0x90] sm:$0xff]  ;;  %v37_v9 = vld [vmem:[%s782_s0 + $0x98] sm:$0xff] }
  0x1c   :  { %v224_v57 = vmax.bf16 %v192_v48, %v96_v43  ;;  %v131_v62 = vld [vmem:[%s784_s2 + $0x88] sm:$0xff]  ;;  %v225_v63 = vmax.bf16 %v193_v53, %v97_v49  ;;  %v99_v0 = vmax.bf16 %v67_v61, %v35_v60  ;;  %v68_v3 = vld [vmem:[%s783_s1 + $0x90] sm:$0xff]  ;;  %v69_v11 = vld [vmem:[%s783_s1 + $0x98] sm:$0xff] }
  0x1d   :  { %v163_v1 = vld [vmem:[%s785_s3 + $0x88] sm:$0xff]  ;;  %v226_v4 = vmax.bf16 %v194_v59, %v98_v58  ;;  %v100_v6 = vmax.bf16 %v68_v3, %v36_v2  ;;  %v132_v7 = vld [vmem:[%s784_s2 + $0x90] sm:$0xff]  ;;  %v133_v12 = vld [vmem:[%s784_s2 + $0x98] sm:$0xff]  ;;  %v101_v15 = vmax.bf16 %v69_v11, %v37_v9 }
  0x1e   :  { %256 = vst [vmem:[%s786_s4 + $0x74] sm:$0xf] %v224_v57  ;;  %v195_v5 = vmax.bf16 %v163_v1, %v131_v62  ;;  %v164_v8 = vld [vmem:[%s785_s3 + $0x90] sm:$0xff]  ;;  %257 = vst [vmem:[%s786_s4 + $0x78] sm:$0xff] %v225_v63  ;;  %v165_v13 = vld [vmem:[%s785_s3 + $0x98] sm:$0xff] }
  0x1f   :  { %v196_v10 = vmax.bf16 %v164_v8, %v132_v7  ;;  %258 = vst [vmem:[%s786_s4 + $0x80] sm:$0xff] %v226_v4  ;;  %v197_v16 = vmax.bf16 %v165_v13, %v133_v12  ;;  %v38_v17 = vld [vmem:[%s782_s0 + $0xa0] sm:$0xff]  ;;  %v39_v23 = vld [vmem:[%s782_s0 + $0xa8] sm:$0xff]  ;;  %v40_v30 = vld [vmem:[%s782_s0 + $0xb0] sm:$0xf] }
  0x20   :  { %v227_v14 = vmax.bf16 %v195_v5, %v99_v0  ;;  %v70_v18 = vld [vmem:[%s783_s1 + $0xa0] sm:$0xff]  ;;  %v71_v24 = vld [vmem:[%s783_s1 + $0xa8] sm:$0xff]  ;;  %v72_v32 = vld [vmem:[%s783_s1 + $0xb0] sm:$0xf] }
  0x21   :  { %v134_v19 = vld [vmem:[%s784_s2 + $0xa0] sm:$0xff]  ;;  %v228_v20 = vmax.bf16 %v196_v10, %v100_v6  ;;  %v102_v21 = vmax.bf16 %v70_v18, %v38_v17  ;;  %v229_v25 = vmax.bf16 %v197_v16, %v101_v15  ;;  %v103_v27 = vmax.bf16 %v71_v24, %v39_v23  ;;  %v135_v28 = vld [vmem:[%s784_s2 + $0xa8] sm:$0xff]  ;;  %v136_v33 = vld [vmem:[%s784_s2 + $0xb0] sm:$0xf] }
  0x22   :  { %v166_v22 = vld [vmem:[%s785_s3 + $0xa0] sm:$0xff]  ;;  %259 = vst [vmem:[%s786_s4 + $0x88] sm:$0xff] %v227_v14  ;;  %v167_v29 = vld [vmem:[%s785_s3 + $0xa8] sm:$0xff]  ;;  %v168_v34 = vld [vmem:[%s785_s3 + $0xb0] sm:$0xf]  ;;  %v104_v36 = vmax.bf16 %v72_v32, %v40_v30 }
  0x23   :  { %v198_v26 = vmax.bf16 %v166_v22, %v134_v19  ;;  %260 = vst [vmem:[%s786_s4 + $0x90] sm:$0xff] %v228_v20  ;;  %v199_v31 = vmax.bf16 %v167_v29, %v135_v28  ;;  %261 = vst [vmem:[%s786_s4 + $0x98] sm:$0xff] %v229_v25  ;;  %v200_v37 = vmax.bf16 %v168_v34, %v136_v33  ;;  %v41_v38 = vld [vmem:[%s782_s0 + $0xb4] sm:$0x77]  ;;  %v42_v44 = vld [vmem:[%s782_s0 + $0xbc] sm:$0x77] }
  0x24   :  { %v73_v39 = vld [vmem:[%s783_s1 + $0xb4] sm:$0x77]  ;;  %v74_v45 = vld [vmem:[%s783_s1 + $0xbc] sm:$0x77]  ;;  %v43_v51 = vld [vmem:[%s782_s0 + $0xc4] sm:$0x77] }
  0x25   :  { %v230_v35 = vmax.bf16 %v198_v26, %v102_v21  ;;  %v137_v40 = vld [vmem:[%s784_s2 + $0xb4] sm:$0x77]  ;;  %v231_v41 = vmax.bf16 %v199_v31, %v103_v27  ;;  %v105_v42 = vmax.bf16 %v73_v39, %v41_v38  ;;  %v232_v46 = vmax.bf16 %v200_v37, %v104_v36  ;;  %v138_v49 = vld [vmem:[%s784_s2 + $0xbc] sm:$0x77]  ;;  %v75_v53 = vld [vmem:[%s783_s1 + $0xc4] sm:$0x77] }
  0x26   :  { %v169_v43 = vld [vmem:[%s785_s3 + $0xb4] sm:$0x77]  ;;  %v106_v48 = vmax.bf16 %v74_v45, %v42_v44  ;;  %v170_v50 = vld [vmem:[%s785_s3 + $0xbc] sm:$0x77]  ;;  %v139_v54 = vld [vmem:[%s784_s2 + $0xc4] sm:$0x77]  ;;  %v107_v57 = vmax.bf16 %v75_v53, %v43_v51 }
  0x27   :  { %262 = vst [vmem:[%s786_s4 + $0xa0] sm:$0xff] %v230_v35  ;;  %v201_v47 = vmax.bf16 %v169_v43, %v137_v40  ;;  %263 = vst [vmem:[%s786_s4 + $0xa8] sm:$0xff] %v231_v41  ;;  %v202_v52 = vmax.bf16 %v170_v50, %v138_v49  ;;  %v171_v55 = vld [vmem:[%s785_s3 + $0xc4] sm:$0x77]  ;;  %v44_v59 = vld [vmem:[%s782_s0 + $0xcc] sm:$0x77] }
  0x28   :  { %264 = vst [vmem:[%s786_s4 + $0xb0] sm:$0xf] %v232_v46  ;;  %v203_v58 = vmax.bf16 %v171_v55, %v139_v54  ;;  %v76_v60 = vld [vmem:[%s783_s1 + $0xcc] sm:$0x77]  ;;  %v45_v1 = vld [vmem:[%s782_s0 + $0xd4] sm:$0x77] }
  0x29   :  { %v233_v56 = vmax.bf16 %v201_v47, %v105_v42  ;;  %v140_v61 = vld [vmem:[%s784_s2 + $0xcc] sm:$0x77]  ;;  %v234_v62 = vmax.bf16 %v202_v52, %v106_v48  ;;  %v108_v63 = vmax.bf16 %v76_v60, %v44_v59  ;;  %v77_v2 = vld [vmem:[%s783_s1 + $0xd4] sm:$0x77]  ;;  %v46_v8 = vld [vmem:[%s782_s0 + $0xdc] sm:$0x77] }
  0x2a   :  { %v172_v0 = vld [vmem:[%s785_s3 + $0xcc] sm:$0x77]  ;;  %v235_v3 = vmax.bf16 %v203_v58, %v107_v57  ;;  %v109_v5 = vmax.bf16 %v77_v2, %v45_v1  ;;  %v141_v6 = vld [vmem:[%s784_s2 + $0xd4] sm:$0x77]  ;;  %v78_v10 = vld [vmem:[%s783_s1 + $0xdc] sm:$0x77] }
  0x2b   :  { %265 = vst [vmem:[%s786_s4 + $0xb4] sm:$0x77] %v233_v56  ;;  %v204_v4 = vmax.bf16 %v172_v0, %v140_v61  ;;  %v173_v7 = vld [vmem:[%s785_s3 + $0xd4] sm:$0x77]  ;;  %266 = vst [vmem:[%s786_s4 + $0xbc] sm:$0x77] %v234_v62  ;;  %v110_v14 = vmax.bf16 %v78_v10, %v46_v8 }
  0x2c   :  { %v205_v9 = vmax.bf16 %v173_v7, %v141_v6  ;;  %v142_v11 = vld [vmem:[%s784_s2 + $0xdc] sm:$0x77]  ;;  %267 = vst [vmem:[%s786_s4 + $0xc4] sm:$0x77] %v235_v3  ;;  %v47_v16 = vld [vmem:[%s782_s0 + $0xe4] sm:$0x77] }
  0x2d   :  { %v174_v12 = vld [vmem:[%s785_s3 + $0xdc] sm:$0x77]  ;;  %v236_v13 = vmax.bf16 %v204_v4, %v108_v63  ;;  %v79_v17 = vld [vmem:[%s783_s1 + $0xe4] sm:$0x77]  ;;  %v48_v22 = vld [vmem:[%s782_s0 + $0xec] sm:$0x7] }
  0x2e   :  { %v206_v15 = vmax.bf16 %v174_v12, %v142_v11  ;;  %v143_v18 = vld [vmem:[%s784_s2 + $0xe4] sm:$0x77]  ;;  %v237_v19 = vmax.bf16 %v205_v9, %v109_v5  ;;  %v111_v20 = vmax.bf16 %v79_v17, %v47_v16  ;;  %v80_v23 = vld [vmem:[%s783_s1 + $0xec] sm:$0x7] }
  0x2f   :  { %v175_v21 = vld [vmem:[%s785_s3 + $0xe4] sm:$0x77]  ;;  %268 = vst [vmem:[%s786_s4 + $0xcc] sm:$0x77] %v236_v13  ;;  %v112_v26 = vmax.bf16 %v80_v23, %v48_v22  ;;  %v144_v27 = vld [vmem:[%s784_s2 + $0xec] sm:$0x7] }
  0x30   :  { %v238_v24 = vmax.bf16 %v206_v15, %v110_v14  ;;  %v207_v25 = vmax.bf16 %v175_v21, %v143_v18  ;;  %v176_v28 = vld [vmem:[%s785_s3 + $0xec] sm:$0x7]  ;;  %269 = vst [vmem:[%s786_s4 + $0xd4] sm:$0x77] %v237_v19 }
  0x31   :  { %v208_v29 = vmax.bf16 %v176_v28, %v144_v27 }
  0x32   :  { %270 = vst [vmem:[%s786_s4 + $0xdc] sm:$0x77] %v238_v24  ;;  %v239_v30 = vmax.bf16 %v207_v25, %v111_v20 }
  0x33   :  { %v240_v31 = vmax.bf16 %v208_v29, %v112_v26 }
  0x34   :  { %271 = vst [vmem:[%s786_s4 + $0xe4] sm:$0x77] %v239_v30 }
  0x35   :  { %272 = vst [vmem:[%s786_s4 + $0xec] sm:$0x7] %v240_v31 }

// kernel: conv_branch_2d_regression_forward.9
= control target key start
LH: loop header
LB: loop body
LE: loop exit
PB: predicated region body
PF: predicated region fallthrough
CT: control target
= control target key end

     0   :  { %s3697_s12 = smov 0   ;;  %s3699_s13 = smov 0   ;;  %s4415_s0 = inlined_call_operand.vmem [shape: bf16[338,800], index: 0, kind: input, shape index: {}]   ;;  %s4416_s1 = inlined_call_operand.vmem [shape: bf16[800,128], index: 1, kind: input, shape index: {}]   ;;  %s4417_s2 = inlined_call_operand.vmem [shape: f32[1,128], index: 2, kind: input, shape index: {}]   ;;  %s4418_s3 = inlined_call_operand.vmem [shape: bf16[338,128], index: 3, kind: output, shape index: {}]  }
   0x1   :  { %s3701_s14 = smov 0  }
   0x2 LB: > { %s3710_s15 = sadd.s32 4294967295, %s3643_s14   ;;  %s3712_s16 = sadd.s32 1, %s3643_s14   ;;  %s3643_s14 = sphi %s3701_s14, %s4425_s14   ;;  %s3639_s13 = sphi %s3699_s13, %s4424_s13   ;;  %s3635_s12 = sphi %s3697_s12, %s4423_s12  }
   0x3   : > { %s85_s17 = ssub.s32 %s3643_s14, %s3712_s16  ;;  %s88_s18 = sadd.s32 1, %s3639_s13 }
   0x4   : > { %p86_p0 = scmp.eq.s32.totalorder %s85_s17, 0  ;;  %p98_p1 = scmp.ne.s32.totalorder %s3639_s13, %s3635_s12 }
   0x5   : > { %p99_p2 = scmp.eq.s32.totalorder %s3710_s15, 1  ;;  %p2522_p3 = scmp.ge.s32.totalorder %s3643_s14, 1 }
   0x6   : > { %s3720_s19 = scalar_select %p86_p0, %s3639_s13, %s88_s18  }
   0x7   : > { %p3722_p4 = por %p99_p2, %p98_p1  ;;  %p149_p5 = scmp.lt.s32.totalorder %s3643_s14, 3 }
   0x9   : > { %p150_p6 = pnand %p2522_p3, %p149_p5 }
   0xa   : > { %v3379_v0 = vld [vmem:[%s4416_s1 + $0x40] sm:$0xff] (!%p150_p6)   ;;  %s3730_s23 = sshll.u32 (!%p150_p6), %s3710_s15, 5  ;;  %v3381_v2 = vld [vmem:[%s4416_s1 + $0x48] sm:$0xff] (!%p150_p6)   ;;  %v3383_v4 = vld [vmem:[%s4416_s1 + $0x50] sm:$0xff] (!%p150_p6)   ;;  %vm1296_vm0 = vcmask (!%p150_p6), 261120  }
   0xb   : > { %153 = sbr.rel (%p150_p6) target bundleno = 555 (0x22b), region = 32  ;;  %v3380_v1 = vld [vmem:[%s4416_s1] sm:$0xff] (!%p150_p6)   ;;  %2884 = vmatprep.subr.bf16.mxu0 (!%p150_p6), %v3379_v0  ;;  %3274 = vmatprep.subr.bf16.mxu1 (!%p150_p6), %v3379_v0  ;;  %p184_p7 = scmp.lt.s32.totalorder (!%p150_p6), %s3730_s23, 42  ;;  %v3382_v3 = vld [vmem:[%s4416_s1 + $0x8] sm:$0xff] (!%p150_p6)   ;;  %v3384_v5 = vld [vmem:[%s4416_s1 + $0x10] sm:$0xff] (!%p150_p6)  }
   0xc   : > { %2885 = vmatpush3.bf16.msra.mxu0 (!%p150_p6), %v3380_v1  ;;  %3282 = vmatpush3.bf16.msra.mxu1 (!%p150_p6), %v3380_v1  ;;  %v3385_v6 = vld [vmem:[%s4416_s1 + $0x58] sm:$0xff] (!%p150_p6)   ;;  %v3387_v8 = vld [vmem:[%s4416_s1 + $0x60] sm:$0xff] (!%p150_p6)   ;;  %v3389_v10 = vld [vmem:[%s4416_s1 + $0x68] sm:$0xff] (!%p150_p6)  }
   0xd   : > { %2886 = vmatprep.subr.bf16.mxu0 (!%p150_p6), %v3381_v2  ;;  %3275 = vmatprep.subr.bf16.mxu1 (!%p150_p6), %v3381_v2  ;;  %v3386_v7 = vld [vmem:[%s4416_s1 + $0x18] sm:$0xff] (!%p150_p6)   ;;  %v3388_v9 = vld [vmem:[%s4416_s1 + $0x20] sm:$0xff] (!%p150_p6)   ;;  %v3390_v13 = vld [vmem:[%s4416_s1 + $0x28] sm:$0xff] (!%p150_p6)  }
   0xe   : > { %v3391_v14 = vld [vmem:[%s4416_s1 + $0x70] sm:$0xff] (!%p150_p6)   ;;  %v3393_v16 = vld [vmem:[%s4416_s1 + $0x78] sm:$0xff] (!%p150_p6)   ;;  %v3401_v18 = vld [vmem:[%s4416_s1 + $0xc0] sm:$0xff] (!%p150_p6)  }
   0xf   : > { %v3392_v15 = vld [vmem:[%s4416_s1 + $0x30] sm:$0xff] (!%p150_p6)   ;;  %v3394_v17 = vld [vmem:[%s4416_s1 + $0x38] sm:$0xff] (!%p150_p6)   ;;  %v3402_v21 = vld [vmem:[%s4416_s1 + $0x140] sm:$0xff] (!%p150_p6)  }
  0x10   : > { %2887 = vmatpush3.bf16.msra.mxu0 (!%p150_p6), %v3382_v3  ;;  %3283 = vmatpush3.bf16.msra.mxu1 (!%p150_p6), %v3382_v3  ;;  %v3403_v22 = vld [vmem:[%s4416_s1 + $0x80] sm:$0xff] (!%p150_p6)   ;;  %v3405_v24 = vld [vmem:[%s4416_s1 + $0xc8] sm:$0xff] (!%p150_p6)   ;;  %v3413_v32 = vld [vmem:[%s4416_s1 + $0xd0] sm:$0xff] (!%p150_p6)  }
  0x11   : > { %2888 = vmatprep.subr.bf16.mxu0 (!%p150_p6), %v3383_v4  ;;  %3276 = vmatprep.subr.bf16.mxu1 (!%p150_p6), %v3383_v4  ;;  %v3404_v23 = vld [vmem:[%s4416_s1 + $0x100] sm:$0xff] (!%p150_p6)   ;;  %v3416_v27 = vld [vmem:[%s4416_s1 + $0x148] sm:$0xff] (!%p150_p6)   ;;  %v3414_v33 = vld [vmem:[%s4416_s1 + $0x90] sm:$0xff] (!%p150_p6)  }
  0x12   : > { %s185_s5 = scalar_select %p184_p7, %s3730_s23, 42  ;;  %v3406_v28 = vld [vmem:[%s4416_s1 + $0x88] sm:$0xff]   ;;  %v3415_v34 = vld [vmem:[%s4416_s1 + $0xd8] sm:$0xff]   ;;  %v3425_v38 = vld [vmem:[%s4416_s1 + $0xe0] sm:$0xff]  }
  0x13   : > { %v3418_v29 = vld [vmem:[%s4416_s1 + $0x108] sm:$0xff]   ;;  %v3417_v37 = vld [vmem:[%s4416_s1 + $0x98] sm:$0xff]   ;;  %v3436_v41 = vld [vmem:[%s4416_s1 + $0x150] sm:$0xff]   ;;  %s2189_s7 = ssub.s32 (%p3722_p4), 43, %s3730_s23  ;;  %s2786_s8 = sshll.u32 (%p3722_p4), %s3710_s15, 7 }
  0x14   : > { %s3290_s10 = smul.u32 28, %s185_s5  ;;  %2889 = vmatpush3.bf16.msra.mxu0 %v3384_v5  ;;  %3284 = vmatpush3.bf16.msra.mxu1 %v3384_v5  ;;  %v3426_v42 = vld [vmem:[%s4416_s1 + $0xa0] sm:$0xff]   ;;  %v3427_v43 = vld [vmem:[%s4416_s1 + $0xe8] sm:$0xff]   ;;  %v3438_v44 = vld [vmem:[%s4416_s1 + $0x110] sm:$0xff]   ;;  %s175_s5 = sand.u32 1, %s3635_s12  }
  0x15   : > { %2890 = vmatprep.subr.bf16.mxu0 %v3385_v6  ;;  %3277 = vmatprep.subr.bf16.mxu1 %v3385_v6  ;;  %v3428_v47 = vld [vmem:[%s4416_s1 + $0xa8] sm:$0xff]   ;;  %v3435_v48 = vld [vmem:[%s4416_s1 + $0xf0] sm:$0xff]   ;;  %v3447_v51 = vld [vmem:[%s4416_s1 + $0x158] sm:$0xff]   ;;  %s2523_s6 = sshll.u32 %s175_s5, 7  ;;  %p2190_p8 = scmp.lt.s32.totalorder (%p3722_p4), %s2189_s7, 32 }
  0x16   : > { %s3761_s24 = scalar_lea.vmem %s4415_s0, %s3290_s10  ;;  %v3437_v52 = vld [vmem:[%s4416_s1 + $0xb0] sm:$0xff]   ;;  %v3449_v53 = vld [vmem:[%s4416_s1 + $0x118] sm:$0xff]   ;;  %v3448_v58 = vld [vmem:[%s4416_s1 + $0x180] sm:$0xff]   ;;  %s4228_s12 = scalar_lea.vmem [#allocation2], %s2523_s6  }
  0x17   : > { %v3397_v11 = vld [vmem:[%s3761_s24 + $0x4] ss:$28 sps:$4 sm:$0xff]   ;;  %v3407_v25 = vld [vmem:[%s3761_s24 + $0x3c] ss:$28 sps:$4 sm:$0xff]   ;;  %v3419_v35 = vld [vmem:[%s3761_s24 + $0x74] ss:$28 sps:$4 sm:$0xff]   ;;  %s4287_s11 = scalar_lea.vmem (%p3722_p4), %s4418_s3, %s2786_s8  }
  0x18   : > { %2891 = vmatpush3.bf16.msra.mxu0 %v3386_v7  ;;  %3285 = vmatpush3.bf16.msra.mxu1 %v3386_v7  ;;  %v3400_v12 = vld [vmem:[%s3761_s24 + $0x2a4] ss:$28 sps:$4 sm:$0xff]   ;;  %v3409_v26 = vld [vmem:[%s3761_s24 + $0x2dc] ss:$28 sps:$4 sm:$0xff]   ;;  %v3421_v36 = vld [vmem:[%s3761_s24 + $0x314] ss:$28 sps:$4 sm:$0xff]  }
  0x19   : > { %2892 = vmatprep.subr.bf16.mxu0 %v3387_v8  ;;  %3278 = vmatprep.subr.bf16.mxu1 %v3387_v8  ;;  %v3395_v19 = vld [vmem:[%s3761_s24] ss:$28 sps:$4 sm:$0xff]   ;;  %v3411_v30 = vld [vmem:[%s3761_s24 + $0x38] ss:$28 sps:$4 sm:$0xff]   ;;  %v3423_v39 = vld [vmem:[%s3761_s24 + $0x70] ss:$28 sps:$4 sm:$0xff]  }
  0x1a   : > { %1377 = vmatprep.mubr.bf16.mxu0 %v3397_v11  ;;  %1473 = vmatprep.mubr.bf16.mxu1 %v3400_v12  ;;  %v3398_v20 = vld [vmem:[%s3761_s24 + $0x2a0] ss:$28 sps:$4 sm:$0xff]   ;;  %v3412_v31 = vld [vmem:[%s3761_s24 + $0x2d8] ss:$28 sps:$4 sm:$0xff]   ;;  %v3424_v40 = vld [vmem:[%s3761_s24 + $0x310] ss:$28 sps:$4 sm:$0xff]  }
  0x1b   : > { %v3429_v45 = vld [vmem:[%s3761_s24 + $0xac] ss:$28 sps:$4 sm:$0xff]   ;;  %v3441_v54 = vld [vmem:[%s3761_s24 + $0xe4] ss:$28 sps:$4 sm:$0xff]   ;;  %v3439_v55 = vld [vmem:[%s4416_s1 + $0xf8] sm:$0xff]  }
  0x1c   : > { %2893 = vmatpush3.bf16.msra.mxu0 %v3388_v9  ;;  %3286 = vmatpush3.bf16.msra.mxu1 %v3388_v9  ;;  %v3431_v46 = vld [vmem:[%s3761_s24 + $0x34c] ss:$28 sps:$4 sm:$0xff]   ;;  %v3440_v57 = vld [vmem:[%s4416_s1 + $0xb8] sm:$0xff]   ;;  %v3462_v60 = vld [vmem:[%s4416_s1 + $0x160] sm:$0xff]  }
  0x1d   : > { %2894 = vmatprep.subr.bf16.mxu0 %v3389_v10  ;;  %3279 = vmatprep.subr.bf16.mxu1 %v3389_v10  ;;  %v3433_v49 = vld [vmem:[%s3761_s24 + $0xa8] ss:$28 sps:$4 sm:$0xff]   ;;  %v3446_v62 = vld [vmem:[%s3761_s24 + $0xe0] ss:$28 sps:$4 sm:$0xff]   ;;  %v3454_v3 = vld [vmem:[%s3761_s24 + $0x118] ss:$28 sps:$4 sm:$0xff]  }
  0x1e   : > { %v3434_v50 = vld [vmem:[%s3761_s24 + $0x348] ss:$28 sps:$4 sm:$0xff]   ;;  %v3450_v63 = vld [vmem:[%s3761_s24 + $0x11c] ss:$28 sps:$4 sm:$0xff]   ;;  %v3456_v5 = vld [vmem:[%s3761_s24 + $0x154] ss:$28 sps:$4 sm:$0xff]  }
  0x1f   : > { %v3445_v56 = vld [vmem:[%s3761_s24 + $0xc] ss:$28 sps:$4 sm:$0xff]   ;;  %v3463_v61 = vld [vmem:[%s4416_s1 + $0x120] sm:$0xff]   ;;  %v3458_v6 = vld [vmem:[%s3761_s24 + $0x7c] ss:$28 sps:$4 sm:$0xff]  }
  0x20   : > { %2895 = vmatpush3.bf16.msra.mxu0 %v3390_v13  ;;  %3287 = vmatpush3.bf16.msra.mxu1 %v3390_v13  ;;  %v3443_v59 = vld [vmem:[%s3761_s24 + $0x8] ss:$28 sps:$4 sm:$0xff]   ;;  %v3455_v4 = vld [vmem:[%s3761_s24 + $0x40] ss:$28 sps:$4 sm:$0xff]   ;;  %v3484_v7 = vld [vmem:[%s4416_s1 + $0x170] sm:$0xff]  }
  0x21   : > { %2896 = vmatprep.subr.bf16.mxu0 %v3391_v14  ;;  %3280 = vmatprep.subr.bf16.mxu1 %v3391_v14  ;;  %v3452_v0 = vld [vmem:[%s3761_s24 + $0x44] ss:$28 sps:$4 sm:$0xff]   ;;  %v3470_v1 = vld [vmem:[%s4416_s1 + $0x168] sm:$0xff]   ;;  %v3485_v8 = vld [vmem:[%s4416_s1 + $0x130] sm:$0xff]  }
  0x22   : > { %v3471_v2 = vld [vmem:[%s4416_s1 + $0x128] sm:$0xff]   ;;  %v3461_v10 = vld [vmem:[%s3761_s24 + $0x78] ss:$28 sps:$4 sm:$0xff]  }
  0x23   : > { %v3460_v9 = vld [vmem:[%s3761_s24 + $0x150] ss:$28 sps:$4 sm:$0xff]   ;;  %v3492_v12 = vld [vmem:[%s4416_s1 + $0x178] sm:$0xff]  }
  0x24   : > { %2897 = vmatpush3.bf16.msra.mxu0 %v3392_v15  ;;  %3288 = vmatpush3.bf16.msra.mxu1 %v3392_v15  ;;  %v3464_v11 = vld [vmem:[%s3761_s24 + $0x18c] ss:$28 sps:$4 sm:$0xff]   ;;  %v3493_v13 = vld [vmem:[%s4416_s1 + $0x138] sm:$0xff]   ;;  %v3466_v14 = vld [vmem:[%s3761_s24 + $0xb4] ss:$28 sps:$4 sm:$0xff]  }
  0x25   : > { %2898 = vmatprep.subr.bf16.mxu0 %v3393_v16  ;;  %3281 = vmatprep.subr.bf16.mxu1 %v3393_v16  ;;  %v3506_v15 = vld [vmem:[%s4416_s1 + $0x188] sm:$0xff]  }
  0x26   : > { %v3468_v16 = vld [vmem:[%s3761_s24 + $0x188] ss:$28 sps:$4 sm:$0xff]  }
  0x28   : > { %2899 = vmatpush3.bf16.msra.mxu0 %v3394_v17  ;;  %3289 = vmatpush3.bf16.msra.mxu1 %v3394_v17  ;;  %v3469_v17 = vld [vmem:[%s3761_s24 + $0xb0] ss:$28 sps:$4 sm:$0xff]  }
  0x29   : > { %2996 = vmatprep.subr.bf16.mxu1 %v3401_v18  ;;  %3108 = vmatprep.subr.bf16.mxu0 %v3402_v21  ;;  %v3472_v18 = vld [vmem:[%s3761_s24 + $0x1c4] ss:$28 sps:$4 sm:$0xff]  }
  0x2a   : > { %v3477_v21 = vld [vmem:[%s3761_s24 + $0xe8] ss:$28 sps:$4 sm:$0xff]  }
  0x2b   : > { %1378 = vmatmul.mubr.bf16.vlgmr.msra.gmra.mrb[0].mxu0 %v3395_v19  ;;  %1474 = vmatmul.mubr.bf16.vlgmr.msra.gmra.mrb[0].mxu1 %v3398_v20  ;;  %v3474_v19 = vld [vmem:[%s3761_s24 + $0xec] ss:$28 sps:$4 sm:$0xff]   ;;  %v3476_v20 = vld [vmem:[%s3761_s24 + $0x1c0] ss:$28 sps:$4 sm:$0xff]  }
  0x2c   : > { %2997 = vmatpush3.bf16.msra.mxu1 %v3403_v22  ;;  %3109 = vmatpush3.bf16.msra.mxu0 %v3404_v23  ;;  %v3478_v22 = vld [vmem:[%s3761_s24 + $0x1fc] ss:$28 sps:$4 sm:$0xff]   ;;  %v3480_v23 = vld [vmem:[%s3761_s24 + $0x124] ss:$28 sps:$4 sm:$0xff]  }
  0x2d   : > { %2998 = vmatprep.subr.bf16.mxu1 %v3405_v24  ;;  %1385 = vmatprep.mubr.bf16.mxu0 %v3407_v25  ;;  %v3482_v24 = vld [vmem:[%s3761_s24 + $0x1f8] ss:$28 sps:$4 sm:$0xff]   ;;  %v3483_v25 = vld [vmem:[%s3761_s24 + $0x120] ss:$28 sps:$4 sm:$0xff]  }
  0x2e   : > { %1481 = vmatprep.mubr.bf16.mxu1 %v3409_v26  ;;  %3110 = vmatprep.subr.bf16.mxu0 %v3416_v27  ;;  %v3486_v26 = vld [vmem:[%s3761_s24 + $0x234] ss:$28 sps:$4 sm:$0xff]   ;;  %v3488_v27 = vld [vmem:[%s3761_s24 + $0x15c] ss:$28 sps:$4 sm:$0xff]  }
  0x30   : > { %2999 = vmatpush3.bf16.msra.mxu1 %v3406_v28  ;;  %3111 = vmatpush3.bf16.msra.mxu0 %v3418_v29  ;;  %v3490_v28 = vld [vmem:[%s3761_s24 + $0x230] ss:$28 sps:$4 sm:$0xff]   ;;  %v3491_v29 = vld [vmem:[%s3761_s24 + $0x158] ss:$28 sps:$4 sm:$0xff]  }
  0x31   : > { %3000 = vmatprep.subr.bf16.mxu1 %v3413_v32  ;;  %3112 = vmatprep.subr.bf16.mxu0 %v3436_v41  ;;  %v3498_v32 = vld [vmem:[%s3761_s24 + $0x268] ss:$28 sps:$4 sm:$0xff]  }
  0x32   : > { %v3512_v41 = vld [vmem:[%s3761_s24 + $0x48] ss:$28 sps:$4 sm:$0xff]  }
  0x33   : > { %1386 = vmatmul.mubr.bf16.gmra.mrb[4].mxu0 %v3411_v30  ;;  %1482 = vmatmul.mubr.bf16.gmra.mrb[4].mxu1 %v3412_v31  ;;  %v3494_v30 = vld [vmem:[%s3761_s24 + $0x26c] ss:$28 sps:$4 sm:$0xff]   ;;  %v3496_v31 = vld [vmem:[%s3761_s24 + $0x194] ss:$28 sps:$4 sm:$0xff]  }
  0x34   : > { %3001 = vmatpush3.bf16.msra.mxu1 %v3414_v33  ;;  %1393 = vmatprep.mubr.bf16.mxu0 %v3419_v35  ;;  %v3499_v33 = vld [vmem:[%s3761_s24 + $0x190] ss:$28 sps:$4 sm:$0xff]  }
  0x35   : > { %3002 = vmatprep.subr.bf16.mxu1 %v3415_v34  ;;  %1489 = vmatprep.mubr.bf16.mxu1 %v3421_v36  ;;  %v3500_v34 = vld [vmem:[%s3761_s24 + $0x1cc] ss:$28 sps:$4 sm:$0xff]   ;;  %v3504_v35 = vld [vmem:[%s3761_s24 + $0x14] ss:$28 sps:$4 sm:$0xff]  }
  0x36   : > { %3113 = vmatpush3.bf16.msra.mxu0 %v3438_v44  ;;  %v3502_v36 = vld [vmem:[%s3761_s24 + $0x10] ss:$28 sps:$4 sm:$0xff]   ;;  %v3517_v44 = vld [vmem:[%s3761_s24 + $0x238] ss:$28 sps:$4 sm:$0xff]  }
  0x37   : > { %3114 = vmatprep.subr.bf16.mxu0 %v3447_v51  ;;  %v3527_v51 = vld [vmem:[%s3761_s24 + $0xf4] ss:$28 sps:$4 sm:$0xff]  }
  0x38   : > { %3003 = vmatpush3.bf16.msra.mxu1 %v3417_v37  ;;  %v3505_v37 = vld [vmem:[%s3761_s24 + $0x1c8] ss:$28 sps:$4 sm:$0xff]  }
  0x39   : > { %3004 = vmatprep.subr.bf16.mxu1 %v3425_v38  ;;  %v3507_v38 = vld [vmem:[%s3761_s24 + $0x204] ss:$28 sps:$4 sm:$0xff]  }
  0x3a   : > { %3115 = vmatpush3.bf16.msra.mxu0 %v3449_v53  ;;  %v3530_v53 = vld [vmem:[%s3761_s24 + $0xf0] ss:$28 sps:$4 sm:$0xff]  }
  0x3b   : > { %1394 = vmatmul.mubr.bf16.gmra.mrb[8].mxu0 %v3423_v39  ;;  %1490 = vmatmul.mubr.bf16.gmra.mrb[8].mxu1 %v3424_v40  ;;  %v3509_v39 = vld [vmem:[%s3761_s24 + $0x4c] ss:$28 sps:$4 sm:$0xff]   ;;  %v3511_v40 = vld [vmem:[%s3761_s24 + $0x200] ss:$28 sps:$4 sm:$0xff]  }
  0x3c   : > { %3005 = vmatpush3.bf16.msra.mxu1 %v3426_v42  ;;  %1401 = vmatprep.mubr.bf16.mxu0 %v3429_v45  ;;  %v3513_v42 = vld [vmem:[%s3761_s24 + $0x23c] ss:$28 sps:$4 sm:$0xff]  }
  0x3d   : > { %3006 = vmatprep.subr.bf16.mxu1 %v3427_v43  ;;  %1497 = vmatprep.mubr.bf16.mxu1 %v3431_v46  ;;  %v3515_v43 = vld [vmem:[%s3761_s24 + $0x84] ss:$28 sps:$4 sm:$0xff]   ;;  %v3519_v46 = vld [vmem:[%s3761_s24 + $0x274] ss:$28 sps:$4 sm:$0xff]  }
  0x3e   : > { %3116 = vmatprep.subr.bf16.mxu0 %v3462_v60  ;;  %v3518_v45 = vld [vmem:[%s3761_s24 + $0x80] ss:$28 sps:$4 sm:$0xff]   ;;  %v3541_v60 = vld [vmem:[%s3761_s24 + $0x318] ss:$28 sps:$4 sm:$0xff]  }
  0x3f   : > { %3117 = vmatpush3.bf16.msra.mxu0 %v3463_v61  ;;  %v3542_v61 = vld [vmem:[%s3761_s24 + $0x160] ss:$28 sps:$4 sm:$0xff]  }
  0x40   : > { %3007 = vmatpush3.bf16.msra.mxu1 %v3428_v47  ;;  %3118 = vmatprep.subr.bf16.mxu0 %v3470_v1  ;;  %v3521_v47 = vld [vmem:[%s3761_s24 + $0xbc] ss:$28 sps:$4 sm:$0xff]  }
  0x41   : > { %3008 = vmatprep.subr.bf16.mxu1 %v3435_v48  ;;  %v3523_v48 = vld [vmem:[%s3761_s24 + $0x270] ss:$28 sps:$4 sm:$0xff]   ;;  %v3548_v1 = vld [vmem:[%s3761_s24 + $0x198] ss:$28 sps:$4 sm:$0xff]  }
  0x43   : > { %1402 = vmatmul.mubr.bf16.gmra.mrb[12].mxu0 %v3433_v49  ;;  %1498 = vmatmul.mubr.bf16.gmra.mrb[12].mxu1 %v3434_v50  ;;  %v3524_v49 = vld [vmem:[%s3761_s24 + $0xb8] ss:$28 sps:$4 sm:$0xff]   ;;  %v3525_v50 = vld [vmem:[%s3761_s24 + $0x2ac] ss:$28 sps:$4 sm:$0xff]  }
  0x44   : > { %3009 = vmatpush3.bf16.msra.mxu1 %v3437_v52  ;;  %1409 = vmatprep.mubr.bf16.mxu0 %v3441_v54  ;;  %v3529_v52 = vld [vmem:[%s3761_s24 + $0x2a8] ss:$28 sps:$4 sm:$0xff]  }
  0x45   : > { %3010 = vmatprep.subr.bf16.mxu1 %v3439_v55  ;;  %1538 = vmatprep.mubr.bf16.mxu1 %v3445_v56  ;;  %v3531_v54 = vld [vmem:[%s3761_s24 + $0x2e4] ss:$28 sps:$4 sm:$0xff]   ;;  %v3533_v55 = vld [vmem:[%s3761_s24 + $0x12c] ss:$28 sps:$4 sm:$0xff]  }
  0x46   : > { %3119 = vmatpush3.bf16.msra.mxu0 %v3471_v2  ;;  %v3535_v56 = vld [vmem:[%s3761_s24 + $0x2e0] ss:$28 sps:$4 sm:$0xff]   ;;  %v3549_v2 = vld [vmem:[%s3761_s24 + $0x1d4] ss:$28 sps:$4 sm:$0xff]  }
  0x47   : > { %3120 = vmatprep.subr.bf16.mxu0 %v3484_v7  ;;  %v3556_v7 = vld [vmem:[%s3761_s24 + $0x88] ss:$28 sps:$4 sm:$0xff]  }
  0x48   : > { %3011 = vmatpush3.bf16.msra.mxu1 %v3440_v57  ;;  %v3536_v57 = vld [vmem:[%s3761_s24 + $0x128] ss:$28 sps:$4 sm:$0xff]  }
  0x49   : > { %3238 = vmatprep.subr.bf16.mxu1 %v3448_v58 }
  0x4a   : > { %3121 = vmatpush3.bf16.msra.mxu0 %v3485_v8  ;;  %v3557_v8 = vld [vmem:[%s3761_s24 + $0x208] ss:$28 sps:$4 sm:$0xff]  }
  0x4b   : > { %1410 = vmatmul.mubr.bf16.gmra.mrb[16].mxu0 %v3446_v62  ;;  %1539 = vmatmul.mubr.bf16.vlgmr.msra.gmra.mrb[16].mxu1 %v3443_v59  ;;  %v3539_v59 = vld [vmem:[%s3761_s24 + $0x164] ss:$28 sps:$4 sm:$0xff]   ;;  %v3543_v62 = vld [vmem:[%s3761_s24 + $0x354] ss:$28 sps:$4 sm:$0xff]  }
  0x4c   : > { %3239 = vmatpush3.bf16.msra.mxu1 %v3448_v58  ;;  %1417 = vmatprep.mubr.bf16.mxu0 %v3450_v63  ;;  %v3537_v58 = vld [vmem:[%s3761_s24 + $0x31c] ss:$28 sps:$4 sm:$0xff]  }
  0x4d   : > { %1546 = vmatprep.mubr.bf16.mxu1 %v3452_v0  ;;  %3122 = vmatprep.subr.bf16.mxu0 %v3492_v12  ;;  %v3545_v63 = vld [vmem:[%s3761_s24 + $0x19c] ss:$28 sps:$4 sm:$0xff]   ;;  %v3547_v0 = vld [vmem:[%s3761_s24 + $0x350] ss:$28 sps:$4 sm:$0xff]  }
  0x4e   : > { %3123 = vmatpush3.bf16.msra.mxu0 %v3493_v13  ;;  %3240 = vmatprep.subr.bf16.mxu1 %v3506_v15  ;;  %v3562_v12 = vld [vmem:[%s3761_s24 + $0x240] ss:$28 sps:$4 sm:$0xff]   ;;  %v3563_v13 = vld [vmem:[%s3761_s24 + $0x130] ss:$28 sps:$4 sm:$0xff]  }
  0x50   : > { %3241 = vmatpush3.bf16.msra.mxu1 %v3506_v15  ;;  %v3566_v15 = vld [vmem:[%s3761_s24 + $0x168] ss:$28 sps:$4 sm:$0xff]  }
  0x53   : > { %1418 = vmatmul.mubr.bf16.gmra.mrb[20].mxu0 %v3454_v3  ;;  %1547 = vmatmul.mubr.bf16.gmra.mrb[20].mxu1 %v3455_v4  ;;  %v3551_v3 = vld [vmem:[%s3761_s24 + $0x18] ss:$28 sps:$4 sm:$0xff]   ;;  %v3552_v4 = vld [vmem:[%s3761_s24 + $0x1d0] ss:$28 sps:$4 sm:$0xff]  }
  0x54   : > { %1425 = vmatprep.mubr.bf16.mxu0 %v3456_v5  ;;  %1554 = vmatprep.mubr.bf16.mxu1 %v3458_v6  ;;  %v3553_v5 = vld [vmem:[%s3761_s24 + $0x50] ss:$28 sps:$4 sm:$0xff]  }
  0x55   : > { %v3554_v6 = vld [vmem:[%s3761_s24 + $0x20c] ss:$28 sps:$4 sm:$0xff]  }
  0x5b   : > { %1426 = vmatmul.mubr.bf16.gmra.mrb[24].mxu0 %v3460_v9  ;;  %1555 = vmatmul.mubr.bf16.gmra.mrb[24].mxu1 %v3461_v10  ;;  %v3558_v9 = vld [vmem:[%s3761_s24 + $0xc0] ss:$28 sps:$4 sm:$0xff]  }
  0x5c   : > { %1433 = vmatprep.mubr.bf16.mxu0 %v3464_v11  ;;  %1562 = vmatprep.mubr.bf16.mxu1 %v3466_v14  ;;  %v3559_v10 = vld [vmem:[%s3761_s24 + $0x244] ss:$28 sps:$4 sm:$0xff]   ;;  %v3561_v11 = vld [vmem:[%s3761_s24 + $0xf8] ss:$28 sps:$4 sm:$0xff]  }
  0x5d   : > { %v3564_v14 = vld [vmem:[%s3761_s24 + $0x27c] ss:$28 sps:$4 sm:$0xff]  }
  0x63   : > { %1434 = vmatmul.mubr.bf16.gmra.mrb[28].mxu0 %v3468_v16  ;;  %1563 = vmatmul.mubr.bf16.gmra.mrb[28].mxu1 %v3469_v17  ;;  %v3567_v16 = vld [vmem:[%s3761_s24 + $0x278] ss:$28 sps:$4 sm:$0xff]   ;;  %v3568_v17 = vld [vmem:[%s3761_s24 + $0x1a0] ss:$28 sps:$4 sm:$0xff]  }
  0x64   : > { %1441 = vmatprep.mubr.bf16.mxu0 %v3472_v18  ;;  %1570 = vmatprep.mubr.bf16.mxu1 %v3474_v19  ;;  %v3569_v18 = vld [vmem:[%s3761_s24 + $0x2b4] ss:$28 sps:$4 sm:$0xff]  }
  0x65   : > { %v3571_v19 = vld [vmem:[%s3761_s24 + $0x1d8] ss:$28 sps:$4 sm:$0xff]  }
  0x6b   : > { %1442 = vmatmul.mubr.bf16.gmra.mrb[32].mxu0 %v3476_v20  ;;  %1571 = vmatmul.mubr.bf16.gmra.mrb[32].mxu1 %v3477_v21  ;;  %v3572_v20 = vld [vmem:[%s3761_s24 + $0x2b0] ss:$28 sps:$4 sm:$0xff]  }
  0x6c   : > { %1449 = vmatprep.mubr.bf16.mxu0 %v3478_v22  ;;  %1578 = vmatprep.mubr.bf16.mxu1 %v3480_v23  ;;  %v3573_v21 = vld [vmem:[%s3761_s24 + $0x210] ss:$28 sps:$4 sm:$0xff]   ;;  %v3576_v23 = vld [vmem:[%s3761_s24 + $0x248] ss:$28 sps:$4 sm:$0xff]  }
  0x6d   : > { %v3574_v22 = vld [vmem:[%s3761_s24 + $0x2ec] ss:$28 sps:$4 sm:$0xff]  }
  0x73   : > { %1450 = vmatmul.mubr.bf16.gmra.mrb[36].mxu0 %v3482_v24  ;;  %1579 = vmatmul.mubr.bf16.gmra.mrb[36].mxu1 %v3483_v25  ;;  %v3577_v24 = vld [vmem:[%s3761_s24 + $0x2e8] ss:$28 sps:$4 sm:$0xff]   ;;  %v3578_v25 = vld [vmem:[%s3761_s24 + $0x280] ss:$28 sps:$4 sm:$0xff]  }
  0x74   : > { %1457 = vmatprep.mubr.bf16.mxu0 %v3486_v26  ;;  %1586 = vmatprep.mubr.bf16.mxu1 %v3488_v27  ;;  %v3579_v26 = vld [vmem:[%s3761_s24 + $0x324] ss:$28 sps:$4 sm:$0xff]   ;;  %v3581_v27 = vld [vmem:[%s3761_s24 + $0x2b8] ss:$28 sps:$4 sm:$0xff]  }
  0x7b   : > { %1458 = vmatmul.mubr.bf16.gmra.mrb[40].mxu0 %v3490_v28  ;;  %1587 = vmatmul.mubr.bf16.gmra.mrb[40].mxu1 %v3491_v29  ;;  %v3582_v28 = vld [vmem:[%s3761_s24 + $0x320] ss:$28 sps:$4 sm:$0xff]   ;;  %v3583_v29 = vld [vmem:[%s3761_s24 + $0x2f0] ss:$28 sps:$4 sm:$0xff]  }
  0x7c   : > { %1465 = vmatprep.mubr.bf16.mxu0 %v3494_v30  ;;  %1594 = vmatprep.mubr.bf16.mxu1 %v3496_v31  ;;  %v3584_v30 = vld [vmem:[%s3761_s24 + $0x35c] ss:$28 sps:$4 sm:$0xff]   ;;  %v3586_v31 = vld [vmem:[%s3761_s24 + $0x328] ss:$28 sps:$4 sm:$0xff]  }
  0x83   : > { %1466 = vmatmul.mubr.bf16.gmra.mrb[44].mxu0 %v3498_v32  ;;  %1595 = vmatmul.mubr.bf16.gmra.mrb[44].mxu1 %v3499_v33 }
  0x84   : > { %1602 = vmatprep.mubr.bf16.mxu1 %v3500_v34  ;;  %1699 = vmatprep.mubr.bf16.mxu0 %v3504_v35 }
  0x8b   : > { %1603 = vmatmul.mubr.bf16.gmra.mrb[48].mxu1 %v3505_v37  ;;  %1700 = vmatmul.mubr.bf16.vlgmr.msra.gmra.mrb[48].mxu0 %v3502_v36  ;;  %v3587_v36 = vld [vmem:[%s3761_s24 + $0x358] ss:$28 sps:$4 sm:$0xff]   ;;  %v3588_v37 = vld [vmem:[%s3761_s24 + $0x360] ss:$28 sps:$4 sm:$0xff]  }
  0x8c   : > { %1610 = vmatprep.mubr.bf16.mxu1 %v3507_v38  ;;  %1707 = vmatprep.mubr.bf16.mxu0 %v3509_v39 }
  0x93   : > { %1611 = vmatmul.mubr.bf16.gmra.mrb[52].mxu1 %v3511_v40  ;;  %1708 = vmatmul.mubr.bf16.gmra.mrb[52].mxu0 %v3512_v41 }
  0x94   : > { %1618 = vmatprep.mubr.bf16.mxu1 %v3513_v42  ;;  %1715 = vmatprep.mubr.bf16.mxu0 %v3515_v43 }
  0x9b   : > { %1619 = vmatmul.mubr.bf16.gmra.mrb[56].mxu1 %v3517_v44  ;;  %1716 = vmatmul.mubr.bf16.gmra.mrb[56].mxu0 %v3518_v45 }
  0x9c   : > { %1626 = vmatprep.mubr.bf16.mxu1 %v3519_v46  ;;  %1723 = vmatprep.mubr.bf16.mxu0 %v3521_v47 }
  0xa3   : > { %1627 = vmatmul.mubr.bf16.gmra.mrb[60].mxu1 %v3523_v48  ;;  %1724 = vmatmul.mubr.bf16.gmra.mrb[60].mxu0 %v3524_v49 }
  0xa4   : > { %1634 = vmatprep.mubr.bf16.mxu1 %v3525_v50  ;;  %1731 = vmatprep.mubr.bf16.mxu0 %v3527_v51 }
  0xab   : > { %1635 = vmatmul.mubr.bf16.gmra.mrb[64].mxu1 %v3529_v52  ;;  %1732 = vmatmul.mubr.bf16.gmra.mrb[64].mxu0 %v3530_v53 }
  0xac   : > { %1642 = vmatprep.mubr.bf16.mxu1 %v3531_v54  ;;  %1739 = vmatprep.mubr.bf16.mxu0 %v3533_v55 }
  0xb3   : > { %1643 = vmatmul.mubr.bf16.gmra.mrb[68].mxu1 %v3535_v56  ;;  %1740 = vmatmul.mubr.bf16.gmra.mrb[68].mxu0 %v3536_v57 }
  0xb4   : > { %1650 = vmatprep.mubr.bf16.mxu1 %v3537_v58  ;;  %1747 = vmatprep.mubr.bf16.mxu0 %v3539_v59 }
  0xbb   : > { %1651 = vmatmul.mubr.bf16.gmra.mrb[72].mxu1 %v3541_v60  ;;  %1748 = vmatmul.mubr.bf16.gmra.mrb[72].mxu0 %v3542_v61 }
  0xbc   : > { %1658 = vmatprep.mubr.bf16.mxu1 %v3543_v62  ;;  %1755 = vmatprep.mubr.bf16.mxu0 %v3545_v63 }
  0xc3   : > { %1659 = vmatmul.mubr.bf16.gmra.mrb[76].mxu1 %v3547_v0  ;;  %1756 = vmatmul.mubr.bf16.gmra.mrb[76].mxu0 %v3548_v1 }
  0xc4   : > { %1763 = vmatprep.mubr.bf16.mxu0 %v3549_v2  ;;  %3242 = vmatprep.mubr.msk.bf16.mxu1 %vm1296_vm0, %v3551_v3 }
  0xcb   : > { %1764 = vmatmul.mubr.bf16.gmra.mrb[80].mxu0 %v3552_v4  ;;  %3243 = vmatmul.mubr.msk.bf16.vlgmr.msra.gmra.mrb[80].mxu1 %vm1296_vm0, %v3553_v5 }
  0xcc   : > { %1771 = vmatprep.mubr.bf16.mxu0 %v3554_v6  ;;  %3246 = vmatprep.mubr.msk.bf16.mxu1 %vm1296_vm0, %v3556_v7 }
  0xd3   : > { %1772 = vmatmul.mubr.bf16.gmra.mrb[84].mxu0 %v3557_v8  ;;  %3247 = vmatmul.mubr.msk.bf16.gmra.mrb[84].mxu1 %vm1296_vm0, %v3558_v9 }
  0xd4   : > { %1779 = vmatprep.mubr.bf16.mxu0 %v3559_v10  ;;  %3250 = vmatprep.mubr.msk.bf16.mxu1 %vm1296_vm0, %v3561_v11 }
  0xdb   : > { %1780 = vmatmul.mubr.bf16.gmra.mrb[88].mxu0 %v3562_v12  ;;  %3251 = vmatmul.mubr.msk.bf16.gmra.mrb[88].mxu1 %vm1296_vm0, %v3563_v13 }
  0xdc   : > { %1787 = vmatprep.mubr.bf16.mxu0 %v3564_v14  ;;  %3254 = vmatprep.mubr.msk.bf16.mxu1 %vm1296_vm0, %v3566_v15 }
  0xe3   : > { %1788 = vmatmul.mubr.bf16.gmra.mrb[92].mxu0 %v3567_v16  ;;  %3255 = vmatmul.mubr.msk.bf16.gmra.mrb[92].mxu1 %vm1296_vm0, %v3568_v17 }
  0xe4   : > { %1795 = vmatprep.mubr.bf16.mxu0 %v3569_v18  ;;  %3258 = vmatprep.mubr.msk.bf16.mxu1 %vm1296_vm0, %v3571_v19  ;;  %v4033_v18 = vld [vmem:[%s4417_s2] ss:$0 sm:$0xff] }
  0xeb   : > { %1796 = vmatmul.mubr.bf16.gmra.mrb[96].mxu0 %v3572_v20  ;;  %3259 = vmatmul.mubr.msk.bf16.gmra.mrb[96].mxu1 %vm1296_vm0, %v3573_v21 }
  0xec   : > { %1803 = vmatprep.mubr.bf16.mxu0 %v3574_v22  ;;  %3262 = vmatprep.mubr.msk.bf16.mxu1 %vm1296_vm0, %v3576_v23 }
  0xf3   : > { %1804 = vmatmul.mubr.bf16.gmra.mrb[100].mxu0 %v3577_v24  ;;  %3263 = vmatmul.mubr.msk.bf16.gmra.mrb[100].mxu1 %vm1296_vm0, %v3578_v25 }
  0xf4   : > { %1811 = vmatprep.mubr.bf16.mxu0 %v3579_v26  ;;  %3266 = vmatprep.mubr.msk.bf16.mxu1 %vm1296_vm0, %v3581_v27 }
  0xfb   : > { %1812 = vmatmul.mubr.bf16.gmra.mrb[104].mxu0 %v3582_v28  ;;  %3267 = vmatmul.mubr.msk.bf16.gmra.mrb[104].mxu1 %vm1296_vm0, %v3583_v29 }
  0xfc   : > { %1819 = vmatprep.mubr.bf16.mxu0 %v3584_v30  ;;  %3270 = vmatprep.mubr.msk.bf16.mxu1 %vm1296_vm0, %v3586_v31 }
  0xfe   : > { %v2900_v32 = vpop.f32.mrb[0].mxu0  ;;  %v2972_v33 = vpop.f32.mrb[0].mxu1 }
  0xff   : > { %v2901_v34 = vpop.f32.mrb[1].mxu0  ;;  %v2973_v35 = vpop.f32.mrb[1].mxu1 }
 0x100   : > { %v2902_v38 = vadd.f32 %v2901_v34, %v2900_v32  ;;  %v2903_v39 = vpop.f32.mrb[2].mxu0  ;;  %v4013_v40 = vadd.f32 %v2973_v35, %v2972_v33  ;;  %v2975_v41 = vpop.f32.mrb[2].mxu1 }
 0x101   : > { %v2904_v42 = vpop.f32.mrb[3].mxu0  ;;  %v2976_v43 = vpop.f32.mrb[3].mxu1 }
 0x102   : > { %v2905_v44 = vadd.f32 %v2904_v42, %v2903_v39  ;;  %v4015_v45 = vadd.f32 %v2976_v43, %v2975_v41  ;;  %v1380_v23 = vadd.f32 %v2902_v38, %v4033_v18 }
 0x103   : > { %1820 = vmatmul.mubr.bf16.gmra.mrb[108].mxu0 %v3587_v36  ;;  %3271 = vmatmul.mubr.msk.bf16.gmra.mrb[108].mxu1 %vm1296_vm0, %v3588_v37 }
 0x104   : > { %v1383_v30 = vadd.f32 %v2905_v44, %v4033_v18 }
 0x106   : > { %v2906_v46 = vpop.f32.mrb[4].mxu0  ;;  %v2978_v47 = vpop.f32.mrb[4].mxu1 }
 0x107   : > { %v2907_v48 = vpop.f32.mrb[5].mxu0  ;;  %v2979_v49 = vpop.f32.mrb[5].mxu1 }
 0x108   : > { %v2908_v50 = vadd.f32 %v2907_v48, %v2906_v46  ;;  %v2909_v51 = vpop.f32.mrb[6].mxu0  ;;  %v4018_v52 = vadd.f32 %v2979_v49, %v2978_v47  ;;  %v2981_v53 = vpop.f32.mrb[6].mxu1 }
 0x109   : > { %v2910_v54 = vpop.f32.mrb[7].mxu0  ;;  %v2982_v55 = vpop.f32.mrb[7].mxu1 }
 0x10a   : > { %v2911_v56 = vadd.f32 %v2910_v54, %v2909_v51  ;;  %v4020_v57 = vadd.f32 %v2982_v55, %v2981_v53  ;;  %v1388_v38 = vadd.f32 %v2908_v50, %v4033_v18 }
 0x10c   : > { %v1391_v44 = vadd.f32 %v2911_v56, %v4033_v18 }
 0x10e   : > { %v2912_v58 = vpop.f32.mrb[8].mxu0  ;;  %v2984_v59 = vpop.f32.mrb[8].mxu1 }
 0x10f   : > { %v2913_v60 = vpop.f32.mrb[9].mxu0  ;;  %v2985_v61 = vpop.f32.mrb[9].mxu1 }
 0x110   : > { %v2914_v62 = vadd.f32 %v2913_v60, %v2912_v58  ;;  %v2915_v63 = vpop.f32.mrb[10].mxu0  ;;  %v4022_v0 = vadd.f32 %v2985_v61, %v2984_v59  ;;  %v2987_v1 = vpop.f32.mrb[10].mxu1 }
 0x111   : > { %v2916_v2 = vpop.f32.mrb[11].mxu0  ;;  %v2988_v3 = vpop.f32.mrb[11].mxu1 }
 0x112   : > { %v2917_v4 = vadd.f32 %v2916_v2, %v2915_v63  ;;  %v4024_v5 = vadd.f32 %v2988_v3, %v2987_v1  ;;  %v1396_v50 = vadd.f32 %v2914_v62, %v4033_v18 }
 0x114   : > { %v1399_v56 = vadd.f32 %v2917_v4, %v4033_v18 }
 0x116   : > { %v2918_v6 = vpop.f32.mrb[12].mxu0  ;;  %v2990_v7 = vpop.f32.mrb[12].mxu1 }
 0x117   : > { %v2919_v8 = vpop.f32.mrb[13].mxu0  ;;  %v2991_v9 = vpop.f32.mrb[13].mxu1 }
 0x118   : > { %v2920_v10 = vadd.f32 %v2919_v8, %v2918_v6  ;;  %v2921_v11 = vpop.f32.mrb[14].mxu0  ;;  %v4026_v12 = vadd.f32 %v2991_v9, %v2990_v7  ;;  %v2993_v13 = vpop.f32.mrb[14].mxu1 }
 0x119   : > { %v2922_v14 = vpop.f32.mrb[15].mxu0  ;;  %v2994_v15 = vpop.f32.mrb[15].mxu1 }
 0x11a   : > { %v2923_v16 = vadd.f32 %v2922_v14, %v2921_v11  ;;  %v4028_v17 = vadd.f32 %v2994_v15, %v2993_v13  ;;  %v1404_v62 = vadd.f32 %v2920_v10, %v4033_v18 }
 0x11c   : > { %v1407_v4 = vadd.f32 %v2923_v16, %v4033_v18 }
 0x11e   : > { %v2924_v19 = vpop.f32.mrb[16].mxu0  ;;  %v3012_v20 = vpop.f32.mrb[16].mxu1 }
 0x11f   : > { %v2925_v21 = vpop.f32.mrb[17].mxu0  ;;  %v3013_v22 = vpop.f32.mrb[17].mxu1 }
 0x120   : > { %v4036_v24 = vadd.f32 %v2925_v21, %v2924_v19  ;;  %v3014_v25 = vadd.f32 %v3013_v22, %v3012_v20  ;;  %v2927_v26 = vpop.f32.mrb[18].mxu0  ;;  %v3015_v27 = vpop.f32.mrb[18].mxu1 }
 0x121   : > { %v2928_v28 = vpop.f32.mrb[19].mxu0  ;;  %v3016_v29 = vpop.f32.mrb[19].mxu1 }
 0x122   : > { %v4039_v31 = vadd.f32 %v3014_v25, %v1380_v23  ;;  %v2929_v32 = vadd.f32 %v2928_v28, %v2927_v26  ;;  %v3017_v33 = vadd.f32 %v3016_v29, %v3015_v27  ;;  %v1412_v10 = vadd.f32 %v4036_v24, %v4033_v18 }
 0x124   : > { %v4041_v34 = vadd.f32 %v3017_v33, %v1383_v30 }
 0x126   : > { %v2930_v35 = vpop.f32.mrb[20].mxu0  ;;  %v3018_v36 = vpop.f32.mrb[20].mxu1 }
 0x127   : > { %v2931_v37 = vpop.f32.mrb[21].mxu0  ;;  %v3019_v39 = vpop.f32.mrb[21].mxu1 }
 0x128   : > { %v4044_v41 = vadd.f32 %v2931_v37, %v2930_v35  ;;  %v3020_v42 = vadd.f32 %v3019_v39, %v3018_v36  ;;  %v2933_v43 = vpop.f32.mrb[22].mxu0  ;;  %v3021_v46 = vpop.f32.mrb[22].mxu1 }
 0x129   : > { %v2934_v47 = vpop.f32.mrb[23].mxu0  ;;  %v3022_v48 = vpop.f32.mrb[23].mxu1 }
 0x12a   : > { %v4047_v49 = vadd.f32 %v3020_v42, %v1388_v38  ;;  %v2935_v51 = vadd.f32 %v2934_v47, %v2933_v43  ;;  %v3023_v53 = vadd.f32 %v3022_v48, %v3021_v46  ;;  %v1415_v47 = vadd.f32 %v2929_v32, %v4033_v18 }
 0x12b   : > { %v1420_v24 = vadd.f32 %v4044_v41, %v4033_v18 }
 0x12c   : > { %v4049_v54 = vadd.f32 %v3023_v53, %v1391_v44 }
 0x12e   : > { %v2936_v55 = vpop.f32.mrb[24].mxu0  ;;  %v3024_v58 = vpop.f32.mrb[24].mxu1 }
 0x12f   : > { %v2937_v59 = vpop.f32.mrb[25].mxu0  ;;  %v3025_v60 = vpop.f32.mrb[25].mxu1 }
 0x130   : > { %v4052_v61 = vadd.f32 %v2937_v59, %v2936_v55  ;;  %v3026_v63 = vadd.f32 %v3025_v60, %v3024_v58  ;;  %v2939_v1 = vpop.f32.mrb[26].mxu0  ;;  %v3027_v2 = vpop.f32.mrb[26].mxu1 }
 0x131   : > { %v2940_v3 = vpop.f32.mrb[27].mxu0  ;;  %v3028_v6 = vpop.f32.mrb[27].mxu1 }
 0x132   : > { %v4055_v7 = vadd.f32 %v3026_v63, %v1396_v50  ;;  %v2941_v8 = vadd.f32 %v2940_v3, %v2939_v1  ;;  %v3029_v9 = vadd.f32 %v3028_v6, %v3027_v2  ;;  %v1428_v41 = vadd.f32 %v4052_v61, %v4033_v18 }
 0x134   : > { %v4057_v11 = vadd.f32 %v3029_v9, %v1399_v56  ;;  %v1423_v56 = vadd.f32 %v2935_v51, %v4033_v18 }
 0x136   : > { %v2942_v13 = vpop.f32.mrb[28].mxu0  ;;  %v3030_v14 = vpop.f32.mrb[28].mxu1 }
 0x137   : > { %v2943_v15 = vpop.f32.mrb[29].mxu0  ;;  %v3031_v19 = vpop.f32.mrb[29].mxu1 }
 0x138   : > { %v4060_v20 = vadd.f32 %v2943_v15, %v2942_v13  ;;  %v3032_v21 = vadd.f32 %v3031_v19, %v3030_v14  ;;  %v2945_v22 = vpop.f32.mrb[30].mxu0  ;;  %v3033_v23 = vpop.f32.mrb[30].mxu1 }
 0x139   : > { %v2946_v25 = vpop.f32.mrb[31].mxu0  ;;  %v3034_v26 = vpop.f32.mrb[31].mxu1 }
 0x13a   : > { %v4063_v27 = vadd.f32 %v3032_v21, %v1404_v62  ;;  %v2947_v28 = vadd.f32 %v2946_v25, %v2945_v22  ;;  %v3035_v29 = vadd.f32 %v3034_v26, %v3033_v23 }
 0x13c   : > { %v4065_v30 = vadd.f32 %v3035_v29, %v1407_v4 }
 0x13e   : > { %v2948_v33 = vpop.f32.mrb[32].mxu0  ;;  %v3036_v35 = vpop.f32.mrb[32].mxu1 }
 0x13f   : > { %v2949_v36 = vpop.f32.mrb[33].mxu0  ;;  %v3037_v37 = vpop.f32.mrb[33].mxu1 }
 0x140   : > { %v4069_v39 = vadd.f32 %v2949_v36, %v2948_v33  ;;  %v3038_v38 = vadd.f32 %v3037_v37, %v3036_v35  ;;  %v2951_v42 = vpop.f32.mrb[34].mxu0  ;;  %v3039_v43 = vpop.f32.mrb[34].mxu1  ;;  %v1431_v33 = vadd.f32 %v2941_v8, %v4033_v18 }
 0x141   : > { %v2952_v46 = vpop.f32.mrb[35].mxu0  ;;  %v3040_v16 = vpop.f32.mrb[35].mxu1 }
 0x142   : > { %v4072_v48 = vadd.f32 %v3038_v38, %v1412_v10  ;;  %v2953_v44 = vadd.f32 %v2952_v46, %v2951_v42  ;;  %v3041_v53 = vadd.f32 %v3040_v16, %v3039_v43  ;;  %v1436_v46 = vadd.f32 %v4060_v20, %v4033_v18 }
 0x144   : > { %v4074_v55 = vadd.f32 %v3041_v53, %v1415_v47 }
 0x146   : > { %v2954_v58 = vpop.f32.mrb[36].mxu0  ;;  %v3042_v59 = vpop.f32.mrb[36].mxu1 }
 0x147   : > { %v2955_v60 = vpop.f32.mrb[37].mxu0  ;;  %v3043_v50 = vpop.f32.mrb[37].mxu1 }
 0x148   : > { %v4078_v63 = vadd.f32 %v2955_v60, %v2954_v58  ;;  %v3044_v1 = vadd.f32 %v3043_v50, %v3042_v59  ;;  %v2957_v2 = vpop.f32.mrb[38].mxu0  ;;  %v3045_v3 = vpop.f32.mrb[38].mxu1  ;;  %v1439_v60 = vadd.f32 %v2947_v28, %v4033_v18  ;;  %v1447_v28 = vadd.f32 %v2953_v44, %v4033_v18 }
 0x149   : > { %v2958_v6 = vpop.f32.mrb[39].mxu0  ;;  %v3046_v32 = vpop.f32.mrb[39].mxu1 }
 0x14a   : > { %v4081_v9 = vadd.f32 %v3044_v1, %v1420_v24  ;;  %v2959_v13 = vadd.f32 %v2958_v6, %v2957_v2  ;;  %v3047_v14 = vadd.f32 %v3046_v32, %v3045_v3  ;;  %v1452_v44 = vadd.f32 %v4078_v63, %v4033_v18 }
 0x14c   : > { %v4083_v15 = vadd.f32 %v3047_v14, %v1423_v56  ;;  %v1444_v56 = vadd.f32 %v4069_v39, %v4033_v18 }
 0x14e   : > { %v2960_v19 = vpop.f32.mrb[40].mxu0  ;;  %v3048_v62 = vpop.f32.mrb[40].mxu1 }
 0x14f   : > { %v2961_v21 = vpop.f32.mrb[41].mxu0  ;;  %v3049_v22 = vpop.f32.mrb[41].mxu1 }
 0x150   : > { %v4087_v23 = vadd.f32 %v2961_v21, %v2960_v19  ;;  %v3050_v25 = vadd.f32 %v3049_v22, %v3048_v62  ;;  %v2963_v26 = vpop.f32.mrb[42].mxu0  ;;  %v3051_v4 = vpop.f32.mrb[42].mxu1 }
 0x151   : > { %v2964_v29 = vpop.f32.mrb[43].mxu0  ;;  %v3052_v51 = vpop.f32.mrb[43].mxu1 }
 0x152   : > { %v4090_v35 = vadd.f32 %v3050_v25, %v1428_v41  ;;  %v4092_v36 = vadd.f32 %v2964_v29, %v2963_v26  ;;  %v3053_v37 = vadd.f32 %v3052_v51, %v3051_v4 }
 0x154   : > { %v4094_v10 = vadd.f32 %v3053_v37, %v1431_v33 }
 0x156   : > { %v2966_v38 = vpop.f32.mrb[44].mxu0  ;;  %v3054_v42 = vpop.f32.mrb[44].mxu1 }
 0x157   : > { %v2967_v43 = vpop.f32.mrb[45].mxu0  ;;  %v3055_v61 = vpop.f32.mrb[45].mxu1 }
 0x158   : > { %v4098_v16 = vadd.f32 %v2967_v43, %v2966_v38  ;;  %v3056_v47 = vadd.f32 %v3055_v61, %v3054_v42  ;;  %v2969_v53 = vpop.f32.mrb[46].mxu0  ;;  %v3057_v58 = vpop.f32.mrb[46].mxu1 }
 0x159   : > { %v2970_v8 = vpop.f32.mrb[47].mxu0  ;;  %v3058_v59 = vpop.f32.mrb[47].mxu1 }
 0x15a   : > { %v4101_v50 = vadd.f32 %v3056_v47, %v1436_v46  ;;  %v4103_v24 = vadd.f32 %v2970_v8, %v2969_v53  ;;  %v3059_v1 = vadd.f32 %v3058_v59, %v3057_v58  ;;  %v1455_v53 = vadd.f32 %v2959_v13, %v4033_v18 }
 0x15b   : > { %v1460_v13 = vadd.f32 %v4087_v23, %v4033_v18 }
 0x15c   : > { %v4105_v2 = vadd.f32 %v3059_v1, %v1439_v60 }
 0x15e   : > { %v3060_v3 = vpop.f32.mrb[48].mxu1  ;;  %v3124_v6 = vpop.f32.mrb[48].mxu0 }
 0x15f   : > { %v3061_v32 = vpop.f32.mrb[49].mxu1  ;;  %v3125_v20 = vpop.f32.mrb[49].mxu0 }
 0x160   : > { %v3062_v14 = vadd.f32 %v3061_v32, %v3060_v3  ;;  %v3126_v19 = vadd.f32 %v3125_v20, %v3124_v6  ;;  %v3063_v62 = vpop.f32.mrb[50].mxu1  ;;  %v3127_v21 = vpop.f32.mrb[50].mxu0 }
 0x161   : > { %v3064_v22 = vpop.f32.mrb[51].mxu1  ;;  %v3128_v41 = vpop.f32.mrb[51].mxu0 }
 0x162   : > { %v4110_v25 = vadd.f32 %v3062_v14, %v1444_v56  ;;  %v3065_v26 = vadd.f32 %v3064_v22, %v3063_v62  ;;  %v3129_v4 = vadd.f32 %v3128_v41, %v3127_v21  ;;  %v4113_v29 = vadd.f32 %v3126_v19, %v4039_v31 }
 0x164   : > { %v4115_v51 = vadd.f32 %v3065_v26, %v1447_v28  ;;  %v4118_v33 = vadd.f32 %v3129_v4, %v4041_v34 }
 0x166   : > { %v3066_v39 = vpop.f32.mrb[52].mxu1  ;;  %v3130_v37 = vpop.f32.mrb[52].mxu0 }
 0x167   : > { %v3067_v38 = vpop.f32.mrb[53].mxu1  ;;  %v3131_v42 = vpop.f32.mrb[53].mxu0 }
 0x168   : > { %v3068_v43 = vadd.f32 %v3067_v38, %v3066_v39  ;;  %v3132_v61 = vadd.f32 %v3131_v42, %v3130_v37  ;;  %v3069_v46 = vpop.f32.mrb[54].mxu1  ;;  %v3133_v47 = vpop.f32.mrb[54].mxu0 }
 0x169   : > { %v3070_v31 = vpop.f32.mrb[55].mxu1  ;;  %v3134_v58 = vpop.f32.mrb[55].mxu0 }
 0x16a   : > { %v4123_v8 = vadd.f32 %v3068_v43, %v1452_v44  ;;  %v3071_v59 = vadd.f32 %v3070_v31, %v3069_v46  ;;  %v3135_v34 = vadd.f32 %v3134_v58, %v3133_v47  ;;  %v4126_v60 = vadd.f32 %v3132_v61, %v4047_v49 }
 0x16b   : > { %v1463_v49 = vadd.f32 %v4092_v36, %v4033_v18  ;;  %v1468_v36 = vadd.f32 %v4098_v16, %v4033_v18 }
 0x16c   : > { %v4128_v1 = vadd.f32 %v3071_v59, %v1455_v53  ;;  %v4131_v3 = vadd.f32 %v3135_v34, %v4049_v54 }
 0x16e   : > { %v3072_v63 = vpop.f32.mrb[56].mxu1  ;;  %v3136_v6 = vpop.f32.mrb[56].mxu0 }
 0x16f   : > { %v3073_v32 = vpop.f32.mrb[57].mxu1  ;;  %v3137_v20 = vpop.f32.mrb[57].mxu0 }
 0x170   : > { %v3074_v56 = vadd.f32 %v3073_v32, %v3072_v63  ;;  %v3138_v14 = vadd.f32 %v3137_v20, %v3136_v6  ;;  %v3075_v19 = vpop.f32.mrb[58].mxu1  ;;  %v3139_v62 = vpop.f32.mrb[58].mxu0 }
 0x171   : > { %v3076_v21 = vpop.f32.mrb[59].mxu1  ;;  %v3140_v28 = vpop.f32.mrb[59].mxu0 }
 0x172   : > { %v4137_v22 = vadd.f32 %v3074_v56, %v1460_v13  ;;  %v3077_v54 = vadd.f32 %v3076_v21, %v3075_v19  ;;  %v3141_v41 = vadd.f32 %v3140_v28, %v3139_v62  ;;  %v4140_v26 = vadd.f32 %v3138_v14, %v4055_v7 }
 0x173   : > { %v1471_v7 = vadd.f32 %v4103_v24, %v4033_v18  ;;  %v1476_v24 = vadd.f32 %v4013_v40, %v4033_v18 }
 0x174   : > { %v4142_v4 = vadd.f32 %v3077_v54, %v1463_v49  ;;  %v4145_v23 = vadd.f32 %v3141_v41, %v4057_v11 }
 0x176   : > { %v3078_v39 = vpop.f32.mrb[60].mxu1  ;;  %v3142_v37 = vpop.f32.mrb[60].mxu0 }
 0x177   : > { %v3079_v38 = vpop.f32.mrb[61].mxu1  ;;  %v3143_v42 = vpop.f32.mrb[61].mxu0 }
 0x178   : > { %v3080_v44 = vadd.f32 %v3079_v38, %v3078_v39  ;;  %v3144_v43 = vadd.f32 %v3143_v42, %v3142_v37  ;;  %v3081_v61 = vpop.f32.mrb[62].mxu1  ;;  %v3145_v46 = vpop.f32.mrb[62].mxu0 }
 0x179   : > { %v3082_v47 = vpop.f32.mrb[63].mxu1  ;;  %v3146_v53 = vpop.f32.mrb[63].mxu0 }
 0x17a   : > { %v4151_v31 = vadd.f32 %v3080_v44, %v1468_v36  ;;  %v3083_v11 = vadd.f32 %v3082_v47, %v3081_v61  ;;  %v3147_v58 = vadd.f32 %v3146_v53, %v3145_v46  ;;  %v4154_v59 = vadd.f32 %v3144_v43, %v4063_v27 }
 0x17b   : > { %v1479_v27 = vadd.f32 %v4015_v45, %v4033_v18  ;;  %v1484_v45 = vadd.f32 %v4018_v52, %v4033_v18 }
 0x17c   : > { %v4156_v34 = vadd.f32 %v3083_v11, %v1471_v7  ;;  %v4159_v16 = vadd.f32 %v3147_v58, %v4065_v30 }
 0x17e   : > { %v3084_v63 = vpop.f32.mrb[64].mxu1  ;;  %v3148_v6 = vpop.f32.mrb[64].mxu0 }
 0x17f   : > { %v3085_v32 = vpop.f32.mrb[65].mxu1  ;;  %v3149_v20 = vpop.f32.mrb[65].mxu0 }
 0x180   : > { %v3086_v13 = vadd.f32 %v3085_v32, %v3084_v63  ;;  %v3150_v56 = vadd.f32 %v3149_v20, %v3148_v6  ;;  %v3087_v14 = vpop.f32.mrb[66].mxu1  ;;  %v3151_v19 = vpop.f32.mrb[66].mxu0 }
 0x181   : > { %v3088_v62 = vpop.f32.mrb[67].mxu1  ;;  %v3152_v49 = vpop.f32.mrb[67].mxu0 }
 0x182   : > { %v4165_v21 = vadd.f32 %v3086_v13, %v1476_v24  ;;  %v3089_v30 = vadd.f32 %v3088_v62, %v3087_v14  ;;  %v3153_v28 = vadd.f32 %v3152_v49, %v3151_v19  ;;  %v4168_v54 = vadd.f32 %v3150_v56, %v4072_v48 }
 0x183   : > { %v1487_v48 = vadd.f32 %v4020_v57, %v4033_v18  ;;  %v1492_v57 = vadd.f32 %v4022_v0, %v4033_v18 }
 0x184   : > { %v4170_v41 = vadd.f32 %v3089_v30, %v1479_v27  ;;  %v4173_v40 = vadd.f32 %v3153_v28, %v4074_v55 }
 0x186   : > { %v3090_v39 = vpop.f32.mrb[68].mxu1  ;;  %v3154_v37 = vpop.f32.mrb[68].mxu0 }
 0x187   : > { %v3091_v38 = vpop.f32.mrb[69].mxu1  ;;  %v3155_v42 = vpop.f32.mrb[69].mxu0 }
 0x188   : > { %v3092_v36 = vadd.f32 %v3091_v38, %v3090_v39  ;;  %v3156_v44 = vadd.f32 %v3155_v42, %v3154_v37  ;;  %v3093_v43 = vpop.f32.mrb[70].mxu1  ;;  %v3157_v61 = vpop.f32.mrb[70].mxu0 }
 0x189   : > { %v3094_v46 = vpop.f32.mrb[71].mxu1  ;;  %v3158_v7 = vpop.f32.mrb[71].mxu0 }
 0x18a   : > { %v4179_v47 = vadd.f32 %v3092_v36, %v1484_v45  ;;  %v3095_v55 = vadd.f32 %v3094_v46, %v3093_v43  ;;  %v3159_v53 = vadd.f32 %v3158_v7, %v3157_v61  ;;  %v4182_v11 = vadd.f32 %v3156_v44, %v4081_v9 }
 0x18b   : > { %v1495_v9 = vadd.f32 %v4024_v5, %v4033_v18  ;;  %v1500_v5 = vadd.f32 %v4026_v12, %v4033_v18 }
 0x18c   : > { %v4184_v58 = vadd.f32 %v3095_v55, %v1487_v48  ;;  %v4187_v52 = vadd.f32 %v3159_v53, %v4083_v15 }
 0x18e   : > { %v3096_v63 = vpop.f32.mrb[72].mxu1  ;;  %v3160_v6 = vpop.f32.mrb[72].mxu0 }
 0x18f   : > { %v3097_v32 = vpop.f32.mrb[73].mxu1  ;;  %v3161_v20 = vpop.f32.mrb[73].mxu0 }
 0x190   : > { %v3098_v24 = vadd.f32 %v3097_v32, %v3096_v63  ;;  %v3162_v13 = vadd.f32 %v3161_v20, %v3160_v6  ;;  %v3099_v56 = vpop.f32.mrb[74].mxu1  ;;  %v3163_v14 = vpop.f32.mrb[74].mxu0 }
 0x191   : > { %v3100_v19 = vpop.f32.mrb[75].mxu1  ;;  %v3164_v27 = vpop.f32.mrb[75].mxu0 }
 0x192   : > { %v4193_v62 = vadd.f32 %v3098_v24, %v1492_v57  ;;  %v3101_v15 = vadd.f32 %v3100_v19, %v3099_v56  ;;  %v3165_v49 = vadd.f32 %v3164_v27, %v3163_v14  ;;  %v4196_v30 = vadd.f32 %v3162_v13, %v4090_v35 }
 0x193   : > { %v1503_v35 = vadd.f32 %v4028_v17, %v4033_v18 }
 0x194   : > { %v4198_v28 = vadd.f32 %v3101_v15, %v1495_v9  ;;  %v4201_v0 = vadd.f32 %v3165_v49, %v4094_v10 }
 0x196   : > { %v3102_v39 = vpop.f32.mrb[76].mxu1  ;;  %v3166_v37 = vpop.f32.mrb[76].mxu0 }
 0x197   : > { %v3103_v38 = vpop.f32.mrb[77].mxu1  ;;  %v3167_v42 = vpop.f32.mrb[77].mxu0 }
 0x198   : > { %v3104_v45 = vadd.f32 %v3103_v38, %v3102_v39  ;;  %v3168_v36 = vadd.f32 %v3167_v42, %v3166_v37  ;;  %v3105_v44 = vpop.f32.mrb[78].mxu1  ;;  %v3169_v43 = vpop.f32.mrb[78].mxu0 }
 0x199   : > { %v3106_v61 = vpop.f32.mrb[79].mxu1  ;;  %v3170_v48 = vpop.f32.mrb[79].mxu0 }
 0x19a   : > { %v4207_v46 = vadd.f32 %v3104_v45, %v1500_v5  ;;  %v3107_v10 = vadd.f32 %v3106_v61, %v3105_v44  ;;  %v3171_v7 = vadd.f32 %v3170_v48, %v3169_v43  ;;  %v4210_v55 = vadd.f32 %v3168_v36, %v4101_v50 }
 0x19c   : > { %v4212_v53 = vadd.f32 %v3107_v10, %v1503_v35  ;;  %v4215_v12 = vadd.f32 %v3171_v7, %v4105_v2 }
 0x19e   : > { %v3172_v63 = vpop.f32.mrb[80].mxu0  ;;  %v3244_v6 = vpop.f32.mrb[80].mxu1 }
 0x19f   : > { %v1871_v32 = vadd.f32 %v3244_v6, %v4126_v60  ;;  %v3173_v17 = vpop.f32.mrb[81].mxu0  ;;  %v1862_v18 = vpop.f32.mrb[81].mxu1 }
 0x1a0   : > { %v3174_v20 = vadd.f32 %v3173_v17, %v3172_v63  ;;  %v1863_v57 = vadd.f32 %v1862_v18, %v4113_v29  ;;  %v3175_v24 = vpop.f32.mrb[82].mxu0  ;;  %v3245_v13 = vpop.f32.mrb[82].mxu1 }
 0x1a1   : > { %v1874_v50 = vadd.f32 %v3245_v13, %v4131_v3  ;;  %v3176_v56 = vpop.f32.mrb[83].mxu0  ;;  %v1865_v14 = vpop.f32.mrb[83].mxu1  ;;  %v1991_v27 = vmax.f32 %v1871_v32, 0.0 }
 0x1a2   : > { %v3177_v9 = vadd.f32 %v3176_v56, %v3175_v24  ;;  %v1866_v2 = vadd.f32 %v1865_v14, %v4118_v33  ;;  %v4223_v19 = vadd.f32 %v3174_v20, %v4110_v25  ;;  %v1989_v15 = vmax.f32 %v1863_v57, 0.0 }
 0x1a3   : > { %v1992_v60 = vmax.f32 %v1874_v50, 0.0 }
 0x1a4   : > { %v1990_v49 = vmax.f32 %v1866_v2, 0.0  ;;  %v4226_v39 = vadd.f32 %v3177_v9, %v4115_v51 }
 0x1a5   : > { %v2797_v29 = vpack.c.bf16 %v1992_v60, %v1991_v27 }
 0x1a6   : > { %v2792_v37 = vpack.c.bf16 %v1990_v49, %v1989_v15  ;;  %v3178_v38 = vpop.f32.mrb[84].mxu0  ;;  %v3248_v42 = vpop.f32.mrb[84].mxu1 }
 0x1a7   : > { %2869 = vst [vmem:[%s4228_s12 + $0x8] sm:$0xff] %v2797_v29   ;;  %v1887_v33 = vadd.f32 %v3248_v42, %v4154_v59  ;;  %v3179_v25 = vpop.f32.mrb[85].mxu0  ;;  %v1878_v3 = vpop.f32.mrb[85].mxu1 }
 0x1a8   : > { %2793 = vst [vmem:[%s4228_s12] sm:$0xff] %v2792_v37   ;;  %v3180_v5 = vadd.f32 %v3179_v25, %v3178_v38  ;;  %v1879_v45 = vadd.f32 %v1878_v3, %v4140_v26  ;;  %v3181_v36 = vpop.f32.mrb[86].mxu0  ;;  %v3249_v51 = vpop.f32.mrb[86].mxu1 }
 0x1a9   : > { %v1890_v44 = vadd.f32 %v3249_v51, %v4159_v16  ;;  %v3182_v43 = vpop.f32.mrb[87].mxu0  ;;  %v1881_v35 = vpop.f32.mrb[87].mxu1  ;;  %v1995_v59 = vmax.f32 %v1887_v33, 0.0 }
 0x1aa   : > { %v3183_v61 = vadd.f32 %v3182_v43, %v3181_v36  ;;  %v1882_v48 = vadd.f32 %v1881_v35, %v4145_v23  ;;  %v1774_v10 = vadd.f32 %v3180_v5, %v4123_v8  ;;  %v1993_v63 = vmax.f32 %v1879_v45, 0.0 }
 0x1ab   : > { %v1996_v7 = vmax.f32 %v1890_v44, 0.0 }
 0x1ac   : > { %v1994_v6 = vmax.f32 %v1882_v48, 0.0  ;;  %v1777_v32 = vadd.f32 %v3183_v61, %v4128_v1 }
 0x1ad   : > { %v2807_v26 = vpack.c.bf16 %v1996_v7, %v1995_v59 }
 0x1ae   : > { %v2802_v17 = vpack.c.bf16 %v1994_v6, %v1993_v63  ;;  %v3184_v18 = vpop.f32.mrb[88].mxu0  ;;  %v3252_v20 = vpop.f32.mrb[88].mxu1 }
 0x1af   : > { %2871 = vst [vmem:[%s4228_s12 + $0x18] sm:$0xff] %v2807_v26   ;;  %v1903_v16 = vadd.f32 %v3252_v20, %v4182_v11  ;;  %v3185_v57 = vpop.f32.mrb[89].mxu0  ;;  %v1894_v24 = vpop.f32.mrb[89].mxu1 }
 0x1b0   : > { %2870 = vst [vmem:[%s4228_s12 + $0x10] sm:$0xff] %v2802_v17   ;;  %v3186_v13 = vadd.f32 %v3185_v57, %v3184_v18  ;;  %v1895_v23 = vadd.f32 %v1894_v24, %v4168_v54  ;;  %v3187_v8 = vpop.f32.mrb[90].mxu0  ;;  %v3253_v50 = vpop.f32.mrb[90].mxu1 }
 0x1b1   : > { %v1906_v56 = vadd.f32 %v3253_v50, %v4187_v52  ;;  %v3188_v14 = vpop.f32.mrb[91].mxu0  ;;  %v1897_v1 = vpop.f32.mrb[91].mxu1  ;;  %v1999_v11 = vmax.f32 %v1903_v16, 0.0 }
 0x1b2   : > { %v3189_v9 = vadd.f32 %v3188_v14, %v3187_v8  ;;  %v1898_v2 = vadd.f32 %v1897_v1, %v4173_v40  ;;  %v4245_v27 = vadd.f32 %v3186_v13, %v4137_v22  ;;  %v1997_v15 = vmax.f32 %v1895_v23, 0.0 }
 0x1b3   : > { %v2000_v60 = vmax.f32 %v1906_v56, 0.0 }
 0x1b4   : > { %v1998_v49 = vmax.f32 %v1898_v2, 0.0  ;;  %v4248_v54 = vadd.f32 %v3189_v9, %v4142_v4 }
 0x1b5   : > { %v2817_v29 = vpack.c.bf16 %v2000_v60, %v1999_v11 }
 0x1b6   : > { %v2812_v37 = vpack.c.bf16 %v1998_v49, %v1997_v15  ;;  %v3190_v38 = vpop.f32.mrb[92].mxu0  ;;  %v3256_v52 = vpop.f32.mrb[92].mxu1 }
 0x1b7   : > { %2873 = vst [vmem:[%s4228_s12 + $0x28] sm:$0xff] %v2817_v29   ;;  %v1919_v42 = vadd.f32 %v3256_v52, %v4210_v55  ;;  %v3191_v33 = vpop.f32.mrb[93].mxu0  ;;  %v1910_v25 = vpop.f32.mrb[93].mxu1 }
 0x1b8   : > { %2872 = vst [vmem:[%s4228_s12 + $0x20] sm:$0xff] %v2812_v37   ;;  %v3192_v40 = vadd.f32 %v3191_v33, %v3190_v38  ;;  %v1911_v22 = vadd.f32 %v1910_v25, %v4196_v30  ;;  %v3193_v3 = vpop.f32.mrb[94].mxu0  ;;  %v3257_v5 = vpop.f32.mrb[94].mxu1 }
 0x1b9   : > { %v1922_v45 = vadd.f32 %v3257_v5, %v4215_v12  ;;  %v3194_v4 = vpop.f32.mrb[95].mxu0  ;;  %v1913_v36 = vpop.f32.mrb[95].mxu1  ;;  %v2003_v55 = vmax.f32 %v1919_v42, 0.0 }
 0x1ba   : > { %v3195_v51 = vadd.f32 %v3194_v4, %v3193_v3  ;;  %v1914_v44 = vadd.f32 %v1913_v36, %v4201_v0  ;;  %v1790_v43 = vadd.f32 %v3192_v40, %v4151_v31  ;;  %v2001_v61 = vmax.f32 %v1911_v22, 0.0 }
 0x1bb   : > { %v2004_v35 = vmax.f32 %v1922_v45, 0.0 }
 0x1bc   : > { %v2002_v48 = vmax.f32 %v1914_v44, 0.0  ;;  %v1793_v59 = vadd.f32 %v3195_v51, %v4156_v34 }
 0x1bd   : > { %v2827_v30 = vpack.c.bf16 %v2004_v35, %v2003_v55 }
 0x1be   : > { %v2822_v7 = vpack.c.bf16 %v2002_v48, %v2001_v61  ;;  %v3196_v63 = vpop.f32.mrb[96].mxu0  ;;  %v3260_v6 = vpop.f32.mrb[96].mxu1 }
 0x1bf   : > { %2875 = vst [vmem:[%s4228_s12 + $0x38] sm:$0xff] %v2827_v30   ;;  %v1935_v12 = vadd.f32 %v3260_v6, %v1774_v10  ;;  %v3197_v26 = vpop.f32.mrb[97].mxu0  ;;  %v1926_v17 = vpop.f32.mrb[97].mxu1 }
 0x1c0   : > { %2874 = vst [vmem:[%s4228_s12 + $0x30] sm:$0xff] %v2822_v7   ;;  %v3198_v18 = vadd.f32 %v3197_v26, %v3196_v63  ;;  %v1927_v0 = vadd.f32 %v1926_v17, %v4223_v19  ;;  %v3199_v20 = vpop.f32.mrb[98].mxu0  ;;  %v3261_v31 = vpop.f32.mrb[98].mxu1 }
 0x1c1   : > { %v1938_v16 = vadd.f32 %v3261_v31, %v1777_v32  ;;  %v3200_v57 = vpop.f32.mrb[99].mxu0  ;;  %v1929_v24 = vpop.f32.mrb[99].mxu1  ;;  %v2007_v8 = vmax.f32 %v1935_v12, 0.0 }
 0x1c2   : > { %v3201_v13 = vadd.f32 %v3200_v57, %v3199_v20  ;;  %v1930_v34 = vadd.f32 %v1929_v24, %v4226_v39  ;;  %v1798_v23 = vadd.f32 %v3198_v18, %v4165_v21  ;;  %v2005_v50 = vmax.f32 %v1927_v0, 0.0 }
 0x1c3   : > { %v2008_v10 = vmax.f32 %v1938_v16, 0.0 }
 0x1c4   : > { %v2006_v56 = vmax.f32 %v1930_v34, 0.0  ;;  %v1801_v14 = vadd.f32 %v3201_v13, %v4170_v41 }
 0x1c5   : > { %v2837_v1 = vpack.c.bf16 %v2008_v10, %v2007_v8 }
 0x1c6   : > { %v2832_v19 = vpack.c.bf16 %v2006_v56, %v2005_v50  ;;  %v3202_v9 = vpop.f32.mrb[100].mxu0  ;;  %v3264_v2 = vpop.f32.mrb[100].mxu1 }
 0x1c7   : > { %2877 = vst [vmem:[%s4228_s12 + $0x48] sm:$0xff] %v2837_v1   ;;  %v1951_v32 = vadd.f32 %v3264_v2, %v1790_v43  ;;  %v3203_v11 = vpop.f32.mrb[101].mxu0  ;;  %v1942_v60 = vpop.f32.mrb[101].mxu1 }
 0x1c8   : > { %2876 = vst [vmem:[%s4228_s12 + $0x40] sm:$0xff] %v2832_v19   ;;  %v3204_v15 = vadd.f32 %v3203_v11, %v3202_v9  ;;  %v1943_v39 = vadd.f32 %v1942_v60, %v4245_v27  ;;  %v3205_v49 = vpop.f32.mrb[102].mxu0  ;;  %v3265_v21 = vpop.f32.mrb[102].mxu1 }
 0x1c9   : > { %v1954_v29 = vadd.f32 %v3265_v21, %v1793_v59  ;;  %v3206_v37 = vpop.f32.mrb[103].mxu0  ;;  %v1945_v38 = vpop.f32.mrb[103].mxu1  ;;  %v2011_v33 = vmax.f32 %v1951_v32, 0.0 }
 0x1ca   : > { %v3207_v52 = vadd.f32 %v3206_v37, %v3205_v49  ;;  %v1946_v41 = vadd.f32 %v1945_v38, %v4248_v54  ;;  %v1806_v42 = vadd.f32 %v3204_v15, %v4179_v47  ;;  %v2009_v40 = vmax.f32 %v1943_v39, 0.0 }
 0x1cb   : > { %v2012_v25 = vmax.f32 %v1954_v29, 0.0 }
 0x1cc   : > { %v2010_v22 = vmax.f32 %v1946_v41, 0.0  ;;  %v1809_v3 = vadd.f32 %v3207_v52, %v4184_v58 }
 0x1cd   : > { %v2847_v5 = vpack.c.bf16 %v2012_v25, %v2011_v33 }
 0x1ce   : > { %v2842_v27 = vpack.c.bf16 %v2010_v22, %v2009_v40  ;;  %v3208_v45 = vpop.f32.mrb[104].mxu0  ;;  %v3268_v4 = vpop.f32.mrb[104].mxu1 }
 0x1cf   : > { %2879 = vst [vmem:[%s4228_s12 + $0x58] sm:$0xff] %v2847_v5   ;;  %v1967_v36 = vadd.f32 %v3268_v4, %v1806_v42  ;;  %v3209_v51 = vpop.f32.mrb[105].mxu0  ;;  %v1958_v44 = vpop.f32.mrb[105].mxu1 }
 0x1d0   : > { %2878 = vst [vmem:[%s4228_s12 + $0x50] sm:$0xff] %v2842_v27   ;;  %v3210_v43 = vadd.f32 %v3209_v51, %v3208_v45  ;;  %v1959_v55 = vadd.f32 %v1958_v44, %v1798_v23  ;;  %v3211_v54 = vpop.f32.mrb[106].mxu0  ;;  %v3269_v35 = vpop.f32.mrb[106].mxu1 }
 0x1d1   : > { %v1970_v47 = vadd.f32 %v3269_v35, %v1809_v3  ;;  %v3212_v61 = vpop.f32.mrb[107].mxu0  ;;  %v1961_v48 = vpop.f32.mrb[107].mxu1  ;;  %v2015_v7 = vmax.f32 %v1967_v36, 0.0 }
 0x1d2   : > { %v3213_v59 = vadd.f32 %v3212_v61, %v3211_v54  ;;  %v1962_v58 = vadd.f32 %v1961_v48, %v1801_v14  ;;  %v1814_v30 = vadd.f32 %v3210_v43, %v4193_v62  ;;  %v2013_v6 = vmax.f32 %v1959_v55, 0.0 }
 0x1d3   : > { %v2016_v63 = vmax.f32 %v1970_v47, 0.0 }
 0x1d4   : > { %v2014_v12 = vmax.f32 %v1962_v58, 0.0  ;;  %v1817_v26 = vadd.f32 %v3213_v59, %v4198_v28 }
 0x1d5   : > { %v2857_v17 = vpack.c.bf16 %v2016_v63, %v2015_v7 }
 0x1d6   : > { %v2852_v18 = vpack.c.bf16 %v2014_v12, %v2013_v6  ;;  %v3214_v0 = vpop.f32.mrb[108].mxu0  ;;  %v3272_v20 = vpop.f32.mrb[108].mxu1 }
 0x1d7   : > { %2881 = vst [vmem:[%s4228_s12 + $0x68] sm:$0xff] %v2857_v17   ;;  %v3215_v31 = vpop.f32.mrb[109].mxu0  ;;  %v1974_v16 = vpop.f32.mrb[109].mxu1 }
 0x1d8   : > { %2880 = vst [vmem:[%s4228_s12 + $0x60] sm:$0xff] %v2852_v18   ;;  %v3216_v57 = vadd.f32 %v3215_v31, %v3214_v0  ;;  %v1975_v24 = vadd.f32 %v1974_v16, %v1814_v30  ;;  %v3217_v13 = vpop.f32.mrb[110].mxu0  ;;  %v3273_v34 = vpop.f32.mrb[110].mxu1 }
 0x1d9   : > { %v3218_v62 = vpop.f32.mrb[111].mxu0  ;;  %v1977_v23 = vpop.f32.mrb[111].mxu1 }
 0x1da   : > { %v1822_v8 = vadd.f32 %v3216_v57, %v4207_v46  ;;  %v3219_v10 = vadd.f32 %v3218_v62, %v3217_v13  ;;  %v1978_v28 = vadd.f32 %v1977_v23, %v1817_v26  ;;  %v2017_v56 = vmax.f32 %v1975_v24, 0.0 }
 0x1dc   : > { %v1983_v50 = vadd.f32 %v3272_v20, %v1822_v8  ;;  %v1825_v14 = vadd.f32 %v3219_v10, %v4212_v53  ;;  %v2018_v1 = vmax.f32 %v1978_v28, 0.0 }
 0x1de   : > { %v1986_v19 = vadd.f32 %v3273_v34, %v1825_v14  ;;  %v2862_v9 = vpack.c.bf16 %v2018_v1, %v2017_v56  ;;  %v2019_v2 = vmax.f32 %v1983_v50, 0.0  ;;  %2187 = sbr.rel (!%p3722_p4) target bundleno = 555 (0x22b), region = 36 }
 0x1e0   : > { %v2020_v32 = vmax.f32 %v1986_v19, 0.0  ;;  %2882 = vst [vmem:[%s4228_s12 + $0x70] sm:$0xff] %v2862_v9  }
 0x1e2   : > { %v2867_v11 = vpack.c.bf16 %v2020_v32, %v2019_v2 }
 0x1e4   : > { %2883 = vst [vmem:[%s4228_s12 + $0x78] sm:$0xff] %v2867_v11  }
 0x1e5   : > { %s4427_s7 = smov (!%p2190_p8, %s2189_s7), 32 }
 0x1e6   : > { %s2739_s14 = sshll.u32 %s4427_s7, 6 }
 0x1e7   : > { %p2742_p9 = scmp.eq.s32.totalorder %s2739_s14, 0 }
 0x1e8   : > { %s4293_s17 = sshrl.u32 (!%p2742_p9), %s4427_s7, 5 }
 0x1e9   : > { %2198 = sbr.rel (%p2742_p9) target bundleno = 555 (0x22b), region = 40  ;;  %p2743_p10 = scmp.le.s32.totalorder (!%p2742_p9), %s4293_s17, 0 }
 0x1f0   : > { %2475 = sbr.rel (%p2743_p10) target bundleno = 534 (0x216), region = 112  ;;  %s4420_s15 = smov (!%p2743_p10), %s4287_s11 }
 0x1f1   : > { %s4421_s20 = smov (!%p2743_p10), %s4228_s12  ;;  %s4302_s23 = smov (!%p2743_p10), 0  }
 0x1f2   : > { %s4304_s18 = smov (!%p2743_p10), 0  }
 0x1f7 LB: >> { %v2214_v46 = vld [vmem:[%s3651_s20] sm:$0xf]  ;;  %v2216_v53 = vld [vmem:[%s3651_s20 + $0x4] sm:$0xf]  ;;  %v2218_v60 = vld [vmem:[%s3651_s20 + $0x8] sm:$0xf]  ;;  %s3659_s18 = sphi %s4304_s18, %s2208_s18   ;;  %s3655_s23 = sphi %s4302_s23, %s4422_s23   ;;  %s3651_s20 = sphi %s4421_s20, %s2283_s20   ;;  %s3647_s15 = sphi %s4420_s15, %s2284_s15  }
 0x1f8   : >> { %2215 = vst [vmem:[%s3647_s15] sm:$0xf] %v2214_v46  ;;  %2217 = vst [vmem:[%s3647_s15 + $0x4] sm:$0xf] %v2216_v53  ;;  %v2220_v15 = vld [vmem:[%s3651_s20 + $0xc] sm:$0xf]  ;;  %s2278_s21 = sadd.s32 1, %s3655_s23 }
 0x1f9   : >> { %2219 = vst [vmem:[%s3647_s15 + $0x8] sm:$0xf] %v2218_v60  ;;  %v2222_v39 = vld [vmem:[%s3651_s20 + $0x10] sm:$0xf]  ;;  %v2224_v49 = vld [vmem:[%s3651_s20 + $0x14] sm:$0xf]  ;;  %p2279_p11 = scmp.ge.s32.totalorder %s2278_s21, %s4293_s17 }
 0x1fa   : >> { %2221 = vst [vmem:[%s3647_s15 + $0xc] sm:$0xf] %v2220_v15  ;;  %2223 = vst [vmem:[%s3647_s15 + $0x10] sm:$0xf] %v2222_v39  ;;  %v2226_v21 = vld [vmem:[%s3651_s20 + $0x18] sm:$0xf] }
 0x1fb   : >> { %2225 = vst [vmem:[%s3647_s15 + $0x14] sm:$0xf] %v2224_v49  ;;  %v2228_v29 = vld [vmem:[%s3651_s20 + $0x1c] sm:$0xf]  ;;  %v2230_v37 = vld [vmem:[%s3651_s20 + $0x20] sm:$0xf] }
 0x1fc   : >> { %2227 = vst [vmem:[%s3647_s15 + $0x18] sm:$0xf] %v2226_v21  ;;  %2229 = vst [vmem:[%s3647_s15 + $0x1c] sm:$0xf] %v2228_v29  ;;  %v2232_v38 = vld [vmem:[%s3651_s20 + $0x24] sm:$0xf] }
 0x1fd   : >> { %2231 = vst [vmem:[%s3647_s15 + $0x20] sm:$0xf] %v2230_v37  ;;  %v2234_v52 = vld [vmem:[%s3651_s20 + $0x28] sm:$0xf]  ;;  %v2236_v41 = vld [vmem:[%s3651_s20 + $0x2c] sm:$0xf] }
 0x1fe   : >> { %2233 = vst [vmem:[%s3647_s15 + $0x24] sm:$0xf] %v2232_v38  ;;  %2235 = vst [vmem:[%s3647_s15 + $0x28] sm:$0xf] %v2234_v52  ;;  %v2238_v42 = vld [vmem:[%s3651_s20 + $0x30] sm:$0xf] }
 0x1ff   : >> { %2237 = vst [vmem:[%s3647_s15 + $0x2c] sm:$0xf] %v2236_v41  ;;  %v2240_v33 = vld [vmem:[%s3651_s20 + $0x34] sm:$0xf]  ;;  %v2242_v25 = vld [vmem:[%s3651_s20 + $0x38] sm:$0xf] }
 0x200   : >> { %2239 = vst [vmem:[%s3647_s15 + $0x30] sm:$0xf] %v2238_v42  ;;  %2241 = vst [vmem:[%s3647_s15 + $0x34] sm:$0xf] %v2240_v33  ;;  %v2244_v40 = vld [vmem:[%s3651_s20 + $0x3c] sm:$0xf] }
 0x201   : >> { %2243 = vst [vmem:[%s3647_s15 + $0x38] sm:$0xf] %v2242_v25  ;;  %v2246_v22 = vld [vmem:[%s3651_s20 + $0x40] sm:$0xf]  ;;  %v2248_v3 = vld [vmem:[%s3651_s20 + $0x44] sm:$0xf] }
 0x202   : >> { %2245 = vst [vmem:[%s3647_s15 + $0x3c] sm:$0xf] %v2244_v40  ;;  %2247 = vst [vmem:[%s3647_s15 + $0x40] sm:$0xf] %v2246_v22  ;;  %v2250_v5 = vld [vmem:[%s3651_s20 + $0x48] sm:$0xf] }
 0x203   : >> { %2249 = vst [vmem:[%s3647_s15 + $0x44] sm:$0xf] %v2248_v3  ;;  %v2252_v27 = vld [vmem:[%s3651_s20 + $0x4c] sm:$0xf]  ;;  %v2254_v45 = vld [vmem:[%s3651_s20 + $0x50] sm:$0xf] }
 0x204   : >> { %2251 = vst [vmem:[%s3647_s15 + $0x48] sm:$0xf] %v2250_v5  ;;  %2253 = vst [vmem:[%s3647_s15 + $0x4c] sm:$0xf] %v2252_v27  ;;  %v2256_v4 = vld [vmem:[%s3651_s20 + $0x54] sm:$0xf] }
 0x205   : >> { %2255 = vst [vmem:[%s3647_s15 + $0x50] sm:$0xf] %v2254_v45  ;;  %v2258_v36 = vld [vmem:[%s3651_s20 + $0x58] sm:$0xf]  ;;  %v2260_v51 = vld [vmem:[%s3651_s20 + $0x5c] sm:$0xf] }
 0x206   : >> { %2257 = vst [vmem:[%s3647_s15 + $0x54] sm:$0xf] %v2256_v4  ;;  %2259 = vst [vmem:[%s3647_s15 + $0x58] sm:$0xf] %v2258_v36  ;;  %v2262_v44 = vld [vmem:[%s3651_s20 + $0x60] sm:$0xf] }
 0x207   : >> { %2261 = vst [vmem:[%s3647_s15 + $0x5c] sm:$0xf] %v2260_v51  ;;  %v2264_v43 = vld [vmem:[%s3651_s20 + $0x64] sm:$0xf]  ;;  %v2266_v55 = vld [vmem:[%s3651_s20 + $0x68] sm:$0xf] }
 0x208   : >> { %2263 = vst [vmem:[%s3647_s15 + $0x60] sm:$0xf] %v2262_v44  ;;  %2265 = vst [vmem:[%s3647_s15 + $0x64] sm:$0xf] %v2264_v43  ;;  %v2268_v54 = vld [vmem:[%s3651_s20 + $0x6c] sm:$0xf] }
 0x209   : >> { %2267 = vst [vmem:[%s3647_s15 + $0x68] sm:$0xf] %v2266_v55  ;;  %v2270_v35 = vld [vmem:[%s3651_s20 + $0x70] sm:$0xf]  ;;  %v2272_v47 = vld [vmem:[%s3651_s20 + $0x74] sm:$0xf] }
 0x20a   : >> { %2269 = vst [vmem:[%s3647_s15 + $0x6c] sm:$0xf] %v2268_v54  ;;  %2271 = vst [vmem:[%s3647_s15 + $0x70] sm:$0xf] %v2270_v35  ;;  %v2274_v61 = vld [vmem:[%s3651_s20 + $0x78] sm:$0xf] }
 0x20b   : >> { %2273 = vst [vmem:[%s3647_s15 + $0x74] sm:$0xf] %v2272_v47  ;;  %v2276_v48 = vld [vmem:[%s3651_s20 + $0x7c] sm:$0xf]  ;;  %2275 = vst [vmem:[%s3647_s15 + $0x78] sm:$0xf] %v2274_v61 }
 0x20c   : >> { %2277 = vst [vmem:[%s3647_s15 + $0x7c] sm:$0xf] %v2276_v48  ;;  %s4429_s21 = smov (%p2279_p11, %s2278_s21), 0  ;;  %s2208_s18 = sadd.s32 1, %s3659_s18  }
 0x20d   : >> { %s2744_s22 = sshll.u32 %s4429_s21, 7  ;;  %p2207_p12 = scmp.ge.s32.totalorder %s2208_s18, %s4293_s17 }
 0x20e   : >> { %s2283_s20 = scalar_lea.vmem %s4228_s12, %s2744_s22 [#allocation2]   ;;  %s2284_s15 = scalar_lea.vmem %s4287_s11, %s2744_s22  }
 0x20f   : >> { %s4422_s23 = smov %s4429_s21  ;;  %2210 = sbr.rel (!%p2207_p12) target bundleno = 503 (0x1f7), region = 118 }
 0x216 PF: > { %s4397_s25 = sand.u32 31, %s4427_s7   ;;  %s2787_s26 = sshll.u32 %s4293_s17, 7 }
 0x217   : > { %s2289_s27 = scalar_lea.vmem %s4228_s12, %s2787_s26 [#allocation2]   ;;  %s2291_s28 = scalar_lea.vmem %s4287_s11, %s2787_s26  }
 0x218   : > { %p2749_p13 = scmp.le.s32.totalorder %s4397_s25, 0 }
 0x219   : > { %s3661_s29 = smov (!%p2749_p13), %s2291_s28   ;;  %s3665_s30 = smov (!%p2749_p13), %s2289_s27  }
 0x21a   : > { %2489 = sbr.rel (%p2749_p13) target bundleno = 555 (0x22b), region = 123  ;;  %s3669_s24 = smov (!%p2749_p13), 0  }
 0x21b   : > { %s3673_s4 = smov (!%p2749_p13), 0  }
 0x221 LB: >> { %v2301_v59 = vld [vmem:[%s3667_s30] sm:$0xf]  ;;  %s2303_s5 = sadd.s32 1, %s3671_s24  ;;  %s2295_s4 = sadd.s32 1, %s3675_s4   ;;  %s3675_s4 = sphi %s3673_s4, %s2295_s4   ;;  %s3671_s24 = sphi %s3669_s24, %s3670_s24   ;;  %s3667_s30 = sphi %s3665_s30, %s2308_s30   ;;  %s3663_s29 = sphi %s3661_s29, %s2309_s29  }
 0x222   : >> { %2302 = vst [vmem:[%s3663_s29] sm:$0xf] %v2301_v59  ;;  %p2304_p0 = scmp.ge.s32.totalorder %s2303_s5, %s4397_s25  ;;  %p2294_p1 = scmp.ge.s32.totalorder %s2295_s4, %s4397_s25 }
 0x224   : >> { %s4431_s5 = smov (%p2304_p0, %s2303_s5), 0  ;;  %2297 = sbr.rel (!%p2294_p1) target bundleno = 545 (0x221), region = 129 }
 0x225   : >> { %s2750_s6 = sshll.u32 %s4431_s5, 2  ;;  %s3670_s24 = smov %s4431_s5  }
 0x226   : >> { %s2308_s30 = scalar_lea.vmem %s2289_s27, %s2750_s6 [#allocation2]   ;;  %s2309_s29 = scalar_lea.vmem %s2291_s28, %s2750_s6  }
 0x22b PF: > { %p10_p2 = scmp.ge.s32.totalorder %s3712_s16, 4   ;;  %s4423_s12 = smov %s3639_s13 }
 0x22c   : > { %s4424_s13 = smov %s3720_s19  ;;  %s4425_s14 = smov %s3712_s16 }
 0x22d   :  { %12 = sbr.rel (!%p10_p2) target bundleno = 2 (0x2), region = 140 }

// kernel: conv_branch_2d_regression_forward.10
= control target key start
LH: loop header
LB: loop body
LE: loop exit
PB: predicated region body
PF: predicated region fallthrough
CT: control target
= control target key end

     0   :  { %s184_s0 = inlined_call_operand.vmem [shape: bf16[12,768], index: 0, kind: input, shape index: {}]   ;;  %s185_s1 = inlined_call_operand.vmem [shape: bf16[12,768], index: 1, kind: input, shape index: {}]   ;;  %s186_s2 = inlined_call_operand.vmem [shape: bf16[12,768], index: 2, kind: input, shape index: {}]   ;;  %s187_s3 = inlined_call_operand.vmem [shape: bf16[12,768], index: 3, kind: input, shape index: {}]   ;;  %s188_s4 = inlined_call_operand.vmem [shape: bf16[12,768], index: 4, kind: output, shape index: {}]  }
   0x1   :  { %v17_v0 = vld [vmem:[%s184_s0] sm:$0xff]  ;;  %v18_v5 = vld [vmem:[%s184_s0 + $0x8] sm:$0xff]  ;;  %v19_v11 = vld [vmem:[%s184_s0 + $0x10] sm:$0xff] }
   0x2   :  { %v23_v1 = vld [vmem:[%s185_s1] sm:$0xff]  ;;  %v24_v6 = vld [vmem:[%s185_s1 + $0x8] sm:$0xff]  ;;  %v25_v13 = vld [vmem:[%s185_s1 + $0x10] sm:$0xff] }
   0x3   :  { %v35_v2 = vld [vmem:[%s186_s2] sm:$0xff]  ;;  %v29_v3 = vmax.bf16 %v23_v1, %v17_v0  ;;  %v30_v8 = vmax.bf16 %v24_v6, %v18_v5  ;;  %v36_v9 = vld [vmem:[%s186_s2 + $0x8] sm:$0xff]  ;;  %v37_v14 = vld [vmem:[%s186_s2 + $0x10] sm:$0xff]  ;;  %v31_v17 = vmax.bf16 %v25_v13, %v19_v11 }
   0x4   :  { %v41_v4 = vld [vmem:[%s187_s3] sm:$0xff]  ;;  %v42_v10 = vld [vmem:[%s187_s3 + $0x8] sm:$0xff]  ;;  %v43_v15 = vld [vmem:[%s187_s3 + $0x10] sm:$0xff] }
   0x5   :  { %v47_v7 = vmax.bf16 %v41_v4, %v35_v2  ;;  %v48_v12 = vmax.bf16 %v42_v10, %v36_v9  ;;  %v49_v18 = vmax.bf16 %v43_v15, %v37_v14  ;;  %v20_v19 = vld [vmem:[%s184_s0 + $0x18] sm:$0x33]  ;;  %v21_v25 = vld [vmem:[%s184_s0 + $0x20] sm:$0x33]  ;;  %v22_v32 = vld [vmem:[%s184_s0 + $0x28] sm:$0x33] }
   0x6   :  { %v26_v20 = vld [vmem:[%s185_s1 + $0x18] sm:$0x33]  ;;  %v27_v26 = vld [vmem:[%s185_s1 + $0x20] sm:$0x33]  ;;  %v28_v34 = vld [vmem:[%s185_s1 + $0x28] sm:$0x33] }
   0x7   :  { %v53_v16 = vmax.bf16 %v47_v7, %v29_v3  ;;  %v38_v21 = vld [vmem:[%s186_s2 + $0x18] sm:$0x33]  ;;  %v54_v22 = vmax.bf16 %v48_v12, %v30_v8  ;;  %v32_v23 = vmax.bf16 %v26_v20, %v20_v19  ;;  %v55_v27 = vmax.bf16 %v49_v18, %v31_v17  ;;  %v39_v30 = vld [vmem:[%s186_s2 + $0x20] sm:$0x33]  ;;  %v40_v35 = vld [vmem:[%s186_s2 + $0x28] sm:$0x33] }
   0x8   :  { %v44_v24 = vld [vmem:[%s187_s3 + $0x18] sm:$0x33]  ;;  %v33_v29 = vmax.bf16 %v27_v26, %v21_v25  ;;  %v45_v31 = vld [vmem:[%s187_s3 + $0x20] sm:$0x33]  ;;  %v46_v36 = vld [vmem:[%s187_s3 + $0x28] sm:$0x33]  ;;  %v34_v38 = vmax.bf16 %v28_v34, %v22_v32 }
   0x9   :  { %59 = vst [vmem:[%s188_s4] sm:$0xff] %v53_v16  ;;  %v50_v28 = vmax.bf16 %v44_v24, %v38_v21  ;;  %60 = vst [vmem:[%s188_s4 + $0x8] sm:$0xff] %v54_v22  ;;  %v51_v33 = vmax.bf16 %v45_v31, %v39_v30  ;;  %v52_v39 = vmax.bf16 %v46_v36, %v40_v35 }
   0xa   :  { %61 = vst [vmem:[%s188_s4 + $0x10] sm:$0xff] %v55_v27 }
   0xb   :  { %v56_v37 = vmax.bf16 %v50_v28, %v32_v23  ;;  %v57_v40 = vmax.bf16 %v51_v33, %v33_v29  ;;  %v58_v41 = vmax.bf16 %v52_v39, %v34_v38 }
   0xd   :  { %62 = vst [vmem:[%s188_s4 + $0x18] sm:$0x33] %v56_v37  ;;  %63 = vst [vmem:[%s188_s4 + $0x20] sm:$0x33] %v57_v40 }
   0xe   :  { %64 = vst [vmem:[%s188_s4 + $0x28] sm:$0x33] %v58_v41 }

// kernel: conv_branch_2d_regression_forward.11
= control target key start
LH: loop header
LB: loop body
LE: loop exit
PB: predicated region body
PF: predicated region fallthrough
CT: control target
= control target key end

     0   :  { %vm980_vm0 = vcmask 523264   ;;  %s2237_s1 = inlined_call_operand.vmem [shape: bf16[1600,128], index: 1, kind: input, shape index: {}]   ;;  %s2238_s0 = inlined_call_operand.vmem [shape: bf16[32,1600], index: 0, kind: input, shape index: {}]   ;;  %s2239_s2 = inlined_call_operand.vmem [shape: f32[1,128], index: 2, kind: input, shape index: {}]   ;;  %s2240_s3 = inlined_call_operand.vmem [shape: bf16[32,128], index: 3, kind: output, shape index: {}]  }
   0x1   :  { %v1692_v0 = vld [vmem:[%s2237_s1 + $0x40] sm:$0xff]   ;;  %v1696_v4 = vld [vmem:[%s2237_s1 + $0x48] sm:$0xff]   ;;  %v1700_v8 = vld [vmem:[%s2237_s1 + $0x50] sm:$0xff]  }
   0x2   :  { %v1693_v1 = vld [vmem:[%s2237_s1] sm:$0xff]   ;;  %1506 = vmatprep.subr.bf16.mxu0 %v1692_v0  ;;  %v1697_v5 = vld [vmem:[%s2237_s1 + $0x8] sm:$0xff]   ;;  %v1701_v9 = vld [vmem:[%s2237_s1 + $0x10] sm:$0xff]  }
   0x3   :  { %v1694_v2 = vld [vmem:[%s2237_s1 + $0xc0] sm:$0xff]   ;;  %1507 = vmatpush3.bf16.msra.mxu0 %v1693_v1  ;;  %v1698_v6 = vld [vmem:[%s2237_s1 + $0xc8] sm:$0xff]   ;;  %v1702_v10 = vld [vmem:[%s2237_s1 + $0xd0] sm:$0xff]  }
   0x4   :  { %v1695_v3 = vld [vmem:[%s2237_s1 + $0x80] sm:$0xff]   ;;  %1534 = vmatprep.subr.bf16.mxu1 %v1694_v2  ;;  %1508 = vmatprep.subr.bf16.mxu0 %v1696_v4  ;;  %v1699_v7 = vld [vmem:[%s2237_s1 + $0x88] sm:$0xff]   ;;  %v1703_v11 = vld [vmem:[%s2237_s1 + $0x90] sm:$0xff]  }
   0x5   :  { %1535 = vmatpush3.bf16.msra.mxu1 %v1695_v3  ;;  %v1704_v12 = vld [vmem:[%s2237_s1 + $0x58] sm:$0xff]   ;;  %v1708_v16 = vld [vmem:[%s2237_s1 + $0x60] sm:$0xff]   ;;  %v1712_v20 = vld [vmem:[%s2237_s1 + $0x68] sm:$0xff]  }
   0x6   :  { %1536 = vmatprep.subr.bf16.mxu1 %v1698_v6  ;;  %v1705_v13 = vld [vmem:[%s2237_s1 + $0x18] sm:$0xff]   ;;  %v1709_v17 = vld [vmem:[%s2237_s1 + $0x20] sm:$0xff]   ;;  %v1713_v21 = vld [vmem:[%s2237_s1 + $0x28] sm:$0xff]  }
   0x7   :  { %1509 = vmatpush3.bf16.msra.mxu0 %v1697_v5  ;;  %v1706_v14 = vld [vmem:[%s2237_s1 + $0xd8] sm:$0xff]   ;;  %v1710_v18 = vld [vmem:[%s2237_s1 + $0xe0] sm:$0xff]   ;;  %v1714_v22 = vld [vmem:[%s2237_s1 + $0xe8] sm:$0xff]  }
   0x8   :  { %1510 = vmatprep.subr.bf16.mxu0 %v1700_v8  ;;  %v1707_v15 = vld [vmem:[%s2237_s1 + $0x98] sm:$0xff]   ;;  %v1711_v19 = vld [vmem:[%s2237_s1 + $0xa0] sm:$0xff]   ;;  %v1715_v23 = vld [vmem:[%s2237_s1 + $0xa8] sm:$0xff]  }
   0x9   :  { %1537 = vmatpush3.bf16.msra.mxu1 %v1699_v7  ;;  %v1716_v24 = vld [vmem:[%s2237_s1 + $0x70] sm:$0xff]   ;;  %v1720_v28 = vld [vmem:[%s2237_s1 + $0x78] sm:$0xff]   ;;  %v1727_v34 = vld [vmem:[%s2237_s1 + $0x140] sm:$0xff]  }
   0xa   :  { %1538 = vmatprep.subr.bf16.mxu1 %v1702_v10  ;;  %v1717_v25 = vld [vmem:[%s2237_s1 + $0x30] sm:$0xff]   ;;  %v1721_v29 = vld [vmem:[%s2237_s1 + $0x38] sm:$0xff]   ;;  %v1730_v36 = vld [vmem:[%s2238_s0 + $0xc] ss:$52 sps:$4 sm:$0xff]  }
   0xb   :  { %1511 = vmatpush3.bf16.msra.mxu0 %v1701_v9  ;;  %v1718_v26 = vld [vmem:[%s2237_s1 + $0xf0] sm:$0xff]   ;;  %v1722_v30 = vld [vmem:[%s2237_s1 + $0xf8] sm:$0xff]   ;;  %v1731_v37 = vld [vmem:[%s2237_s1 + $0x100] sm:$0xff]   ;;  %1068 = vmatprep.mubr.bf16.mxu1 %v1730_v36 }
   0xc   :  { %1512 = vmatprep.subr.bf16.mxu0 %v1704_v12  ;;  %v1719_v27 = vld [vmem:[%s2237_s1 + $0xb0] sm:$0xff]   ;;  %v1725_v32 = vld [vmem:[%s2238_s0 + $0x4] ss:$52 sps:$4 sm:$0xff]   ;;  %v1728_v35 = vld [vmem:[%s2238_s0 + $0x8] ss:$52 sps:$4 sm:$0xff]  }
   0xd   :  { %1539 = vmatpush3.bf16.msra.mxu1 %v1703_v11  ;;  %v1723_v31 = vld [vmem:[%s2238_s0] ss:$52 sps:$4 sm:$0xff]   ;;  %v1726_v33 = vld [vmem:[%s2237_s1 + $0xb8] sm:$0xff]   ;;  %1019 = vmatprep.mubr.bf16.mxu0 %v1725_v32  ;;  %v1734_v40 = vld [vmem:[%s2237_s1 + $0x148] sm:$0xff]  }
   0xe   :  { %1540 = vmatprep.subr.bf16.mxu1 %v1706_v14  ;;  %v1732_v38 = vld [vmem:[%s2237_s1 + $0x1c0] sm:$0xff]   ;;  %v1735_v41 = vld [vmem:[%s2237_s1 + $0x108] sm:$0xff]   ;;  %v1738_v44 = vld [vmem:[%s2237_s1 + $0x150] sm:$0xff]  }
   0xf   :  { %1513 = vmatpush3.bf16.msra.mxu0 %v1705_v13  ;;  %v1733_v39 = vld [vmem:[%s2237_s1 + $0x180] sm:$0xff]   ;;  %v1736_v42 = vld [vmem:[%s2237_s1 + $0x1c8] sm:$0xff]   ;;  %v1739_v45 = vld [vmem:[%s2237_s1 + $0x110] sm:$0xff]  }
  0x10   :  { %1514 = vmatprep.subr.bf16.mxu0 %v1708_v16  ;;  %v1737_v43 = vld [vmem:[%s2237_s1 + $0x188] sm:$0xff]   ;;  %v1740_v46 = vld [vmem:[%s2237_s1 + $0x1d0] sm:$0xff]   ;;  %v1742_v48 = vld [vmem:[%s2237_s1 + $0x158] sm:$0xff]  }
  0x11   :  { %1541 = vmatpush3.bf16.msra.mxu1 %v1707_v15  ;;  %v1741_v47 = vld [vmem:[%s2237_s1 + $0x190] sm:$0xff]   ;;  %v1743_v49 = vld [vmem:[%s2237_s1 + $0x118] sm:$0xff]   ;;  %v1746_v52 = vld [vmem:[%s2237_s1 + $0x160] sm:$0xff]  }
  0x12   :  { %1542 = vmatprep.subr.bf16.mxu1 %v1710_v18  ;;  %v1744_v50 = vld [vmem:[%s2237_s1 + $0x1d8] sm:$0xff]   ;;  %v1747_v53 = vld [vmem:[%s2237_s1 + $0x120] sm:$0xff]   ;;  %v1750_v56 = vld [vmem:[%s2237_s1 + $0x168] sm:$0xff]  }
  0x13   :  { %1515 = vmatpush3.bf16.msra.mxu0 %v1709_v17  ;;  %v1745_v51 = vld [vmem:[%s2237_s1 + $0x198] sm:$0xff]   ;;  %v1748_v54 = vld [vmem:[%s2237_s1 + $0x1e0] sm:$0xff]   ;;  %v1753_v58 = vld [vmem:[%s2237_s1 + $0x128] sm:$0xff]  }
  0x14   :  { %1516 = vmatprep.subr.bf16.mxu0 %v1712_v20  ;;  %v1749_v55 = vld [vmem:[%s2237_s1 + $0x1a0] sm:$0xff]   ;;  %v1754_v59 = vld [vmem:[%s2238_s0 + $0x68] ss:$52 sps:$4 sm:$0xff]   ;;  %v1760_v0 = vld [vmem:[%s2237_s1 + $0x170] sm:$0xff]  }
  0x15   :  { %1543 = vmatpush3.bf16.msra.mxu1 %v1711_v19  ;;  %v1751_v57 = vld [vmem:[%s2238_s0 + $0x6c] ss:$52 sps:$4 sm:$0xff]   ;;  %v1756_v61 = vld [vmem:[%s2238_s0 + $0x74] ss:$52 sps:$4 sm:$0xff]   ;;  %v1759_v63 = vld [vmem:[%s2238_s0 + $0x70] ss:$52 sps:$4 sm:$0xff]  }
  0x16   :  { %1544 = vmatprep.subr.bf16.mxu1 %v1714_v22  ;;  %v1755_v60 = vld [vmem:[%s2237_s1 + $0x1e8] sm:$0xff]   ;;  %v1761_v1 = vld [vmem:[%s2237_s1 + $0x130] sm:$0xff]   ;;  %v1764_v4 = vld [vmem:[%s2237_s1 + $0x178] sm:$0xff]  }
  0x17   :  { %1517 = vmatpush3.bf16.msra.mxu0 %v1713_v21  ;;  %v1758_v62 = vld [vmem:[%s2237_s1 + $0x1a8] sm:$0xff]   ;;  %v1762_v2 = vld [vmem:[%s2237_s1 + $0x1f0] sm:$0xff]   ;;  %v1765_v5 = vld [vmem:[%s2237_s1 + $0x138] sm:$0xff]  }
  0x18   :  { %1518 = vmatprep.subr.bf16.mxu0 %v1716_v24  ;;  %v1763_v3 = vld [vmem:[%s2237_s1 + $0x1b0] sm:$0xff]   ;;  %v1766_v6 = vld [vmem:[%s2237_s1 + $0x1f8] sm:$0xff]   ;;  %v1771_v10 = vld [vmem:[%s2237_s1 + $0x240] sm:$0xff]  }
  0x19   :  { %1545 = vmatpush3.bf16.msra.mxu1 %v1715_v23  ;;  %v1767_v7 = vld [vmem:[%s2238_s0 + $0x10] ss:$52 sps:$4 sm:$0xff]   ;;  %v1769_v8 = vld [vmem:[%s2238_s0 + $0x14] ss:$52 sps:$4 sm:$0xff]   ;;  %v1770_v9 = vld [vmem:[%s2237_s1 + $0x1b8] sm:$0xff]  }
  0x1a   :  { %1546 = vmatprep.subr.bf16.mxu1 %v1718_v26  ;;  %v1772_v11 = vld [vmem:[%s2238_s0 + $0x18] ss:$52 sps:$4 sm:$0xff]   ;;  %v1774_v12 = vld [vmem:[%s2238_s0 + $0x1c] ss:$52 sps:$4 sm:$0xff]   ;;  %v1775_v13 = vld [vmem:[%s2237_s1 + $0x200] sm:$0xff]  }
  0x1b   :  { %1519 = vmatpush3.bf16.msra.mxu0 %v1717_v25  ;;  %v1776_v14 = vld [vmem:[%s2237_s1 + $0x2c0] sm:$0xff]   ;;  %v1778_v16 = vld [vmem:[%s2237_s1 + $0x248] sm:$0xff]   ;;  %v1781_v19 = vld [vmem:[%s2238_s0 + $0x7c] ss:$52 sps:$4 sm:$0xff]  }
  0x1c   :  { %1520 = vmatprep.subr.bf16.mxu0 %v1720_v28  ;;  %v1777_v15 = vld [vmem:[%s2237_s1 + $0x280] sm:$0xff]   ;;  %v1779_v17 = vld [vmem:[%s2237_s1 + $0x208] sm:$0xff]   ;;  %v1785_v22 = vld [vmem:[%s2237_s1 + $0x250] sm:$0xff]  }
  0x1d   :  { %1547 = vmatpush3.bf16.msra.mxu1 %v1719_v27  ;;  %v1780_v18 = vld [vmem:[%s2237_s1 + $0x2c8] sm:$0xff]   ;;  %v1786_v23 = vld [vmem:[%s2238_s0 + $0x84] ss:$52 sps:$4 sm:$0xff]   ;;  %v1788_v24 = vld [vmem:[%s2237_s1 + $0x210] sm:$0xff]  }
  0x1e   :  { %1548 = vmatprep.subr.bf16.mxu1 %v1722_v30  ;;  %v1783_v20 = vld [vmem:[%s2237_s1 + $0x288] sm:$0xff]   ;;  %v1789_v25 = vld [vmem:[%s2238_s0 + $0x80] ss:$52 sps:$4 sm:$0xff]   ;;  %v1792_v28 = vld [vmem:[%s2237_s1 + $0x258] sm:$0xff]  }
  0x1f   :  { %1521 = vmatpush3.bf16.msra.mxu0 %v1721_v29  ;;  %v1784_v21 = vld [vmem:[%s2238_s0 + $0x78] ss:$52 sps:$4 sm:$0xff]   ;;  %v1790_v26 = vld [vmem:[%s2237_s1 + $0x2d0] sm:$0xff]   ;;  %v1796_v32 = vld [vmem:[%s2237_s1 + $0x260] sm:$0xff]  }
  0x20   :  { %1562 = vmatprep.subr.bf16.mxu0 %v1727_v34  ;;  %v1791_v27 = vld [vmem:[%s2237_s1 + $0x290] sm:$0xff]   ;;  %v1793_v29 = vld [vmem:[%s2237_s1 + $0x218] sm:$0xff]   ;;  %v1798_v34 = vld [vmem:[%s2237_s1 + $0x2e0] sm:$0xff]  }
  0x21   :  { %1549 = vmatpush3.bf16.msra.mxu1 %v1726_v33  ;;  %v1794_v30 = vld [vmem:[%s2237_s1 + $0x2d8] sm:$0xff]   ;;  %v1797_v33 = vld [vmem:[%s2237_s1 + $0x220] sm:$0xff]   ;;  %v1800_v36 = vld [vmem:[%s2237_s1 + $0x268] sm:$0xff]  }
  0x22   :  { %1020 = vmatmul.mubr.bf16.vlgmr.msra.gmra.mrb[0].mxu0 %v1723_v31  ;;  %1590 = vmatprep.subr.bf16.mxu1 %v1732_v38  ;;  %v1795_v31 = vld [vmem:[%s2237_s1 + $0x298] sm:$0xff]   ;;  %v1802_v38 = vld [vmem:[%s2237_s1 + $0x2e8] sm:$0xff]  }
  0x23   :  { %1563 = vmatpush3.bf16.msra.mxu0 %v1731_v37  ;;  %1027 = vmatprep.mubr.bf16.mxu0 %v1751_v57  ;;  %v1801_v37 = vld [vmem:[%s2237_s1 + $0x228] sm:$0xff]  }
  0x24   :  { %1069 = vmatmul.mubr.bf16.vlgmr.msra.gmra.mrb[0].mxu1 %v1728_v35  ;;  %1564 = vmatprep.subr.bf16.mxu0 %v1734_v40  ;;  %v1799_v35 = vld [vmem:[%s2237_s1 + $0x2a0] sm:$0xff]   ;;  %v1804_v40 = vld [vmem:[%s2237_s1 + $0x270] sm:$0xff]  }
  0x25   :  { %1591 = vmatpush3.bf16.msra.mxu1 %v1733_v39  ;;  %1076 = vmatprep.mubr.bf16.mxu1 %v1756_v61  ;;  %v1803_v39 = vld [vmem:[%s2237_s1 + $0x2a8] sm:$0xff]  }
  0x26   :  { %1592 = vmatprep.subr.bf16.mxu1 %v1736_v42  ;;  %v1806_v42 = vld [vmem:[%s2237_s1 + $0x2f0] sm:$0xff]   ;;  %v1829_v61 = vld [vmem:[%s2238_s0 + $0x98] ss:$52 sps:$4 sm:$0xff]  }
  0x27   :  { %1565 = vmatpush3.bf16.msra.mxu0 %v1735_v41  ;;  %v1805_v41 = vld [vmem:[%s2237_s1 + $0x230] sm:$0xff]  }
  0x28   :  { %1566 = vmatprep.subr.bf16.mxu0 %v1738_v44  ;;  %v1808_v44 = vld [vmem:[%s2237_s1 + $0x278] sm:$0xff]   ;;  %v1824_v57 = vld [vmem:[%s2238_s0 + $0x94] ss:$52 sps:$4 sm:$0xff]  }
  0x29   :  { %1593 = vmatpush3.bf16.msra.mxu1 %v1737_v43  ;;  %v1807_v43 = vld [vmem:[%s2237_s1 + $0x2b0] sm:$0xff]  }
  0x2a   :  { %1594 = vmatprep.subr.bf16.mxu1 %v1740_v46  ;;  %1028 = vmatmul.mubr.bf16.gmra.mrb[4].mxu0 %v1754_v59  ;;  %v1810_v46 = vld [vmem:[%s2237_s1 + $0x2f8] sm:$0xff]   ;;  %v1828_v59 = vld [vmem:[%s2238_s0 + $0x30] ss:$52 sps:$4 sm:$0xff]  }
  0x2b   :  { %1567 = vmatpush3.bf16.msra.mxu0 %v1739_v45  ;;  %1117 = vmatprep.mubr.bf16.mxu0 %v1769_v8  ;;  %v1809_v45 = vld [vmem:[%s2237_s1 + $0x238] sm:$0xff]  }
  0x2c   :  { %1568 = vmatprep.subr.bf16.mxu0 %v1742_v48  ;;  %1077 = vmatmul.mubr.bf16.gmra.mrb[4].mxu1 %v1759_v63  ;;  %v1813_v48 = vld [vmem:[%s2238_s0 + $0x24] ss:$52 sps:$4 sm:$0xff]   ;;  %v1358_v63 = vld [vmem:[%s2239_s2] ss:$0 sm:$0xff] }
  0x2d   :  { %1595 = vmatpush3.bf16.msra.mxu1 %v1741_v47  ;;  %1166 = vmatprep.mubr.bf16.mxu1 %v1774_v12  ;;  %v1811_v47 = vld [vmem:[%s2238_s0 + $0x20] ss:$52 sps:$4 sm:$0xff]  }
  0x2e   :  { %1596 = vmatprep.subr.bf16.mxu1 %v1744_v50  ;;  %v1815_v50 = vld [vmem:[%s2237_s1 + $0x300] sm:$0xff]  }
  0x2f   :  { %1569 = vmatpush3.bf16.msra.mxu0 %v1743_v49  ;;  %v1814_v49 = vld [vmem:[%s2237_s1 + $0x2b8] sm:$0xff]  }
  0x30   :  { %1570 = vmatprep.subr.bf16.mxu0 %v1746_v52  ;;  %v1818_v52 = vld [vmem:[%s2238_s0 + $0x2c] ss:$52 sps:$4 sm:$0xff]  }
  0x31   :  { %1597 = vmatpush3.bf16.msra.mxu1 %v1745_v51  ;;  %v1816_v51 = vld [vmem:[%s2238_s0 + $0x28] ss:$52 sps:$4 sm:$0xff]  }
  0x32   :  { %1598 = vmatprep.subr.bf16.mxu1 %v1748_v54  ;;  %v1820_v54 = vld [vmem:[%s2238_s0 + $0x8c] ss:$52 sps:$4 sm:$0xff]  }
  0x33   :  { %1571 = vmatpush3.bf16.msra.mxu0 %v1747_v53  ;;  %v1819_v53 = vld [vmem:[%s2237_s1 + $0x308] sm:$0xff]  }
  0x34   :  { %1572 = vmatprep.subr.bf16.mxu0 %v1750_v56  ;;  %v1823_v56 = vld [vmem:[%s2237_s1 + $0x310] sm:$0xff]  }
  0x35   :  { %1599 = vmatpush3.bf16.msra.mxu1 %v1749_v55  ;;  %v1822_v55 = vld [vmem:[%s2238_s0 + $0x88] ss:$52 sps:$4 sm:$0xff]  }
  0x36   :  { %1600 = vmatprep.subr.bf16.mxu1 %v1755_v60  ;;  %v1826_v60 = vld [vmem:[%s2238_s0 + $0x90] ss:$52 sps:$4 sm:$0xff]  }
  0x37   :  { %1573 = vmatpush3.bf16.msra.mxu0 %v1753_v58  ;;  %v1827_v58 = vld [vmem:[%s2237_s1 + $0x318] sm:$0xff]  }
  0x38   :  { %1574 = vmatprep.subr.bf16.mxu0 %v1760_v0 }
  0x39   :  { %1601 = vmatpush3.bf16.msra.mxu1 %v1758_v62 }
  0x3a   :  { %1602 = vmatprep.subr.bf16.mxu1 %v1762_v2 }
  0x3b   :  { %1575 = vmatpush3.bf16.msra.mxu0 %v1761_v1 }
  0x3c   :  { %1576 = vmatprep.subr.bf16.mxu0 %v1764_v4 }
  0x3d   :  { %1603 = vmatpush3.bf16.msra.mxu1 %v1763_v3 }
  0x3e   :  { %1604 = vmatprep.subr.bf16.mxu1 %v1766_v6 }
  0x3f   :  { %1577 = vmatpush3.bf16.msra.mxu0 %v1765_v5 }
  0x40   :  { %1618 = vmatprep.subr.bf16.mxu0 %v1771_v10 }
  0x41   :  { %1605 = vmatpush3.bf16.msra.mxu1 %v1770_v9 }
  0x42   :  { %1118 = vmatmul.mubr.bf16.vlgmr.msra.gmra.mrb[8].mxu0 %v1767_v7  ;;  %1646 = vmatprep.subr.bf16.mxu1 %v1776_v14 }
  0x43   :  { %1619 = vmatpush3.bf16.msra.mxu0 %v1775_v13  ;;  %1125 = vmatprep.mubr.bf16.mxu0 %v1781_v19 }
  0x44   :  { %1167 = vmatmul.mubr.bf16.vlgmr.msra.gmra.mrb[8].mxu1 %v1772_v11  ;;  %1620 = vmatprep.subr.bf16.mxu0 %v1778_v16 }
  0x45   :  { %1647 = vmatpush3.bf16.msra.mxu1 %v1777_v15  ;;  %1174 = vmatprep.mubr.bf16.mxu1 %v1786_v23 }
  0x46   :  { %1648 = vmatprep.subr.bf16.mxu1 %v1780_v18 }
  0x47   :  { %1621 = vmatpush3.bf16.msra.mxu0 %v1779_v17 }
  0x48   :  { %1622 = vmatprep.subr.bf16.mxu0 %v1785_v22 }
  0x49   :  { %1649 = vmatpush3.bf16.msra.mxu1 %v1783_v20 }
  0x4a   :  { %1126 = vmatmul.mubr.bf16.gmra.mrb[12].mxu0 %v1784_v21  ;;  %1650 = vmatprep.subr.bf16.mxu1 %v1790_v26 }
  0x4b   :  { %1623 = vmatpush3.bf16.msra.mxu0 %v1788_v24  ;;  %1215 = vmatprep.mubr.bf16.mxu0 %v1813_v48 }
  0x4c   :  { %1175 = vmatmul.mubr.bf16.gmra.mrb[12].mxu1 %v1789_v25  ;;  %1624 = vmatprep.subr.bf16.mxu0 %v1792_v28 }
  0x4d   :  { %1651 = vmatpush3.bf16.msra.mxu1 %v1791_v27  ;;  %1264 = vmatprep.mubr.bf16.mxu1 %v1818_v52 }
  0x4e   :  { %1652 = vmatprep.subr.bf16.mxu1 %v1794_v30 }
  0x4f   :  { %1625 = vmatpush3.bf16.msra.mxu0 %v1793_v29 }
  0x50   :  { %1626 = vmatprep.subr.bf16.mxu0 %v1796_v32 }
  0x51   :  { %1653 = vmatpush3.bf16.msra.mxu1 %v1795_v31 }
  0x52   :  { %1654 = vmatprep.subr.bf16.mxu1 %v1798_v34 }
  0x53   :  { %1627 = vmatpush3.bf16.msra.mxu0 %v1797_v33 }
  0x54   :  { %1628 = vmatprep.subr.bf16.mxu0 %v1800_v36 }
  0x55   :  { %1655 = vmatpush3.bf16.msra.mxu1 %v1799_v35 }
  0x56   :  { %1656 = vmatprep.subr.bf16.mxu1 %v1802_v38 }
  0x57   :  { %1629 = vmatpush3.bf16.msra.mxu0 %v1801_v37 }
  0x58   :  { %1630 = vmatprep.subr.bf16.mxu0 %v1804_v40 }
  0x59   :  { %1657 = vmatpush3.bf16.msra.mxu1 %v1803_v39 }
  0x5a   :  { %1658 = vmatprep.subr.bf16.mxu1 %v1806_v42 }
  0x5b   :  { %1631 = vmatpush3.bf16.msra.mxu0 %v1805_v41 }
  0x5c   :  { %1632 = vmatprep.subr.bf16.mxu0 %v1808_v44 }
  0x5d   :  { %1659 = vmatpush3.bf16.msra.mxu1 %v1807_v43 }
  0x5e   :  { %1660 = vmatprep.subr.bf16.mxu1 %v1810_v46 }
  0x5f   :  { %1633 = vmatpush3.bf16.msra.mxu0 %v1809_v45 }
  0x60   :  { %1680 = vmatprep.subr.bf16.mxu0 %v1815_v50 }
  0x61   :  { %1661 = vmatpush3.bf16.msra.mxu1 %v1814_v49 }
  0x62   :  { %1216 = vmatmul.mubr.bf16.vlgmr.msra.gmra.mrb[16].mxu0 %v1811_v47 }
  0x63   :  { %1681 = vmatpush3.bf16.msra.mxu0 %v1815_v50  ;;  %1223 = vmatprep.mubr.bf16.mxu0 %v1820_v54 }
  0x64   :  { %1265 = vmatmul.mubr.bf16.vlgmr.msra.gmra.mrb[16].mxu1 %v1816_v51  ;;  %1682 = vmatprep.subr.bf16.mxu0 %v1819_v53 }
  0x65   :  { %1272 = vmatprep.mubr.bf16.mxu1 %v1824_v57 }
  0x67   :  { %1683 = vmatpush3.bf16.msra.mxu0 %v1819_v53 }
  0x68   :  { %1684 = vmatprep.subr.bf16.mxu0 %v1823_v56 }
  0x6a   :  { %1224 = vmatmul.mubr.bf16.gmra.mrb[20].mxu0 %v1822_v55 }
  0x6b   :  { %1688 = vmatprep.mubr.msk.bf16.mxu0 %vm980_vm0, %v1828_v59  ;;  %1685 = vmatpush3.bf16.msra.mxu0 %v1823_v56 }
  0x6c   :  { %1686 = vmatprep.subr.bf16.mxu0 %v1827_v58  ;;  %1273 = vmatmul.mubr.bf16.gmra.mrb[20].mxu1 %v1826_v60 }
  0x6f   :  { %1687 = vmatpush3.bf16.msra.mxu0 %v1827_v58 }
  0x72   :  { %1689 = vmatmul.mubr.msk.bf16.vlgmr.msra.gmra.mrb[24].mxu0 %vm980_vm0, %v1829_v61 }
  0xf5   :  { %v1522_v62 = vpop.f32.mrb[0].mxu0 }
  0xf6   :  { %v1523_v0 = vpop.f32.mrb[1].mxu0 }
  0xf7   :  { %v1524_v1 = vadd.f32 %v1523_v0, %v1522_v62  ;;  %v1525_v2 = vpop.f32.mrb[2].mxu0  ;;  %v1550_v3 = vpop.f32.mrb[0].mxu1 }
  0xf8   :  { %v1526_v4 = vpop.f32.mrb[3].mxu0  ;;  %v1551_v7 = vpop.f32.mrb[1].mxu1 }
  0xf9   :  { %v1022_v5 = vadd.f32 %v1524_v1, %v1358_v63  ;;  %v1527_v6 = vadd.f32 %v1526_v4, %v1525_v2  ;;  %v1552_v8 = vadd.f32 %v1551_v7, %v1550_v3  ;;  %v1553_v9 = vpop.f32.mrb[2].mxu1 }
  0xfa   :  { %v1554_v11 = vpop.f32.mrb[3].mxu1 }
  0xfb   :  { %v1025_v10 = vadd.f32 %v1527_v6, %v1358_v63  ;;  %v1071_v12 = vadd.f32 %v1552_v8, %v1022_v5  ;;  %v1555_v13 = vadd.f32 %v1554_v11, %v1553_v9 }
  0xfd   :  { %v1074_v14 = vadd.f32 %v1555_v13, %v1025_v10  ;;  %v1528_v15 = vpop.f32.mrb[4].mxu0 }
  0xfe   :  { %v1529_v16 = vpop.f32.mrb[5].mxu0 }
  0xff   :  { %v1530_v17 = vadd.f32 %v1529_v16, %v1528_v15  ;;  %v1531_v18 = vpop.f32.mrb[6].mxu0  ;;  %v1556_v19 = vpop.f32.mrb[4].mxu1 }
 0x100   :  { %v1532_v20 = vpop.f32.mrb[7].mxu0  ;;  %v1557_v23 = vpop.f32.mrb[5].mxu1 }
 0x101   :  { %v1030_v21 = vadd.f32 %v1530_v17, %v1358_v63  ;;  %v1533_v22 = vadd.f32 %v1532_v20, %v1531_v18  ;;  %v1558_v24 = vadd.f32 %v1557_v23, %v1556_v19  ;;  %v1559_v25 = vpop.f32.mrb[6].mxu1 }
 0x102   :  { %v1560_v27 = vpop.f32.mrb[7].mxu1 }
 0x103   :  { %v1033_v26 = vadd.f32 %v1533_v22, %v1358_v63  ;;  %v1079_v28 = vadd.f32 %v1558_v24, %v1030_v21  ;;  %v1561_v29 = vadd.f32 %v1560_v27, %v1559_v25 }
 0x105   :  { %v1082_v30 = vadd.f32 %v1561_v29, %v1033_v26 }
 0x115   :  { %v1578_v31 = vpop.f32.mrb[8].mxu0 }
 0x116   :  { %v1579_v32 = vpop.f32.mrb[9].mxu0 }
 0x117   :  { %v1580_v33 = vadd.f32 %v1579_v32, %v1578_v31  ;;  %v1581_v34 = vpop.f32.mrb[10].mxu0  ;;  %v1606_v35 = vpop.f32.mrb[8].mxu1 }
 0x118   :  { %v1582_v36 = vpop.f32.mrb[11].mxu0  ;;  %v1607_v39 = vpop.f32.mrb[9].mxu1 }
 0x119   :  { %v1120_v37 = vadd.f32 %v1580_v33, %v1071_v12  ;;  %v1583_v38 = vadd.f32 %v1582_v36, %v1581_v34  ;;  %v1608_v40 = vadd.f32 %v1607_v39, %v1606_v35  ;;  %v1609_v41 = vpop.f32.mrb[10].mxu1 }
 0x11a   :  { %v1610_v43 = vpop.f32.mrb[11].mxu1 }
 0x11b   :  { %v1123_v42 = vadd.f32 %v1583_v38, %v1074_v14  ;;  %v1169_v44 = vadd.f32 %v1608_v40, %v1120_v37  ;;  %v1611_v45 = vadd.f32 %v1610_v43, %v1609_v41 }
 0x11d   :  { %v1172_v46 = vadd.f32 %v1611_v45, %v1123_v42  ;;  %v1584_v47 = vpop.f32.mrb[12].mxu0 }
 0x11e   :  { %v1585_v48 = vpop.f32.mrb[13].mxu0 }
 0x11f   :  { %v1586_v49 = vadd.f32 %v1585_v48, %v1584_v47  ;;  %v1587_v50 = vpop.f32.mrb[14].mxu0  ;;  %v1612_v51 = vpop.f32.mrb[12].mxu1 }
 0x120   :  { %v1588_v52 = vpop.f32.mrb[15].mxu0  ;;  %v1613_v55 = vpop.f32.mrb[13].mxu1 }
 0x121   :  { %v1128_v53 = vadd.f32 %v1586_v49, %v1079_v28  ;;  %v1589_v54 = vadd.f32 %v1588_v52, %v1587_v50  ;;  %v1614_v56 = vadd.f32 %v1613_v55, %v1612_v51  ;;  %v1615_v57 = vpop.f32.mrb[14].mxu1 }
 0x122   :  { %v1616_v59 = vpop.f32.mrb[15].mxu1 }
 0x123   :  { %v1131_v58 = vadd.f32 %v1589_v54, %v1082_v30  ;;  %v1177_v60 = vadd.f32 %v1614_v56, %v1128_v53  ;;  %v1617_v61 = vadd.f32 %v1616_v59, %v1615_v57 }
 0x125   :  { %v1180_v62 = vadd.f32 %v1617_v61, %v1131_v58 }
 0x135   :  { %v1634_v63 = vpop.f32.mrb[16].mxu0 }
 0x136   :  { %v1635_v0 = vpop.f32.mrb[17].mxu0 }
 0x137   :  { %v1636_v1 = vadd.f32 %v1635_v0, %v1634_v63  ;;  %v1637_v2 = vpop.f32.mrb[18].mxu0  ;;  %v1662_v5 = vpop.f32.mrb[16].mxu1 }
 0x138   :  { %v1638_v3 = vpop.f32.mrb[19].mxu0  ;;  %v1663_v7 = vpop.f32.mrb[17].mxu1 }
 0x139   :  { %v1218_v4 = vadd.f32 %v1636_v1, %v1169_v44  ;;  %v1639_v6 = vadd.f32 %v1638_v3, %v1637_v2  ;;  %v1664_v9 = vadd.f32 %v1663_v7, %v1662_v5  ;;  %v1665_v10 = vpop.f32.mrb[18].mxu1 }
 0x13a   :  { %v1666_v11 = vpop.f32.mrb[19].mxu1 }
 0x13b   :  { %v1221_v8 = vadd.f32 %v1639_v6, %v1172_v46  ;;  %v1667_v12 = vadd.f32 %v1666_v11, %v1665_v10  ;;  %v1267_v14 = vadd.f32 %v1664_v9, %v1218_v4 }
 0x13d   :  { %v1640_v13 = vpop.f32.mrb[20].mxu0  ;;  %v1270_v18 = vadd.f32 %v1667_v12, %v1221_v8 }
 0x13e   :  { %v1641_v15 = vpop.f32.mrb[21].mxu0 }
 0x13f   :  { %v1642_v16 = vadd.f32 %v1641_v15, %v1640_v13  ;;  %v1643_v17 = vpop.f32.mrb[22].mxu0  ;;  %v1668_v21 = vpop.f32.mrb[20].mxu1 }
 0x140   :  { %v1644_v19 = vpop.f32.mrb[23].mxu0  ;;  %v1669_v23 = vpop.f32.mrb[21].mxu1 }
 0x141   :  { %v1226_v20 = vadd.f32 %v1642_v16, %v1177_v60  ;;  %v1645_v22 = vadd.f32 %v1644_v19, %v1643_v17  ;;  %v1670_v25 = vadd.f32 %v1669_v23, %v1668_v21  ;;  %v1671_v26 = vpop.f32.mrb[22].mxu1 }
 0x142   :  { %v1672_v27 = vpop.f32.mrb[23].mxu1 }
 0x143   :  { %v1229_v24 = vadd.f32 %v1645_v22, %v1180_v62  ;;  %v1673_v28 = vadd.f32 %v1672_v27, %v1671_v26  ;;  %v1275_v29 = vadd.f32 %v1670_v25, %v1226_v20 }
 0x145   :  { %v1690_v30 = vpop.f32.mrb[24].mxu0  ;;  %v1278_v33 = vadd.f32 %v1673_v28, %v1229_v24 }
 0x146   :  { %v1324_v31 = vadd.f32 %v1690_v30, %v1275_v29  ;;  %v1315_v32 = vpop.f32.mrb[25].mxu0 }
 0x147   :  { %v1316_v34 = vadd.f32 %v1315_v32, %v1267_v14  ;;  %v1691_v35 = vpop.f32.mrb[26].mxu0 }
 0x148   :  { %v1327_v36 = vadd.f32 %v1691_v35, %v1278_v33  ;;  %v1318_v37 = vpop.f32.mrb[27].mxu0  ;;  %v1332_v39 = vmax.f32 %v1324_v31, 0.0 }
 0x149   :  { %v1319_v38 = vadd.f32 %v1318_v37, %v1270_v18  ;;  %v1330_v41 = vmax.f32 %v1316_v34, 0.0 }
 0x14a   :  { %v1333_v40 = vmax.f32 %v1327_v36, 0.0 }
 0x14b   :  { %v1331_v42 = vmax.f32 %v1319_v38, 0.0 }
 0x14c   :  { %v1503_v43 = vpack.c.bf16 %v1333_v40, %v1332_v39 }
 0x14d   :  { %v1498_v44 = vpack.c.bf16 %v1331_v42, %v1330_v41 }
 0x14e   :  { %1505 = vst [vmem:[%s2240_s3 + $0x8] sm:$0xff] %v1503_v43  }
 0x14f   :  { %1499 = vst [vmem:[%s2240_s3] sm:$0xff] %v1498_v44  }

// kernel: conv_branch_2d_regression_forward.12
= control target key start
LH: loop header
LB: loop body
LE: loop exit
PB: predicated region body
PF: predicated region fallthrough
CT: control target
= control target key end

     0   :  { %vm1545_vm0 = vmmov 0   ;;  %vm874_vm1 = vcmask 523264   ;;  %s1893_s1 = inlined_call_operand.vmem [shape: bf16[1600,128], index: 1, kind: input, shape index: {}]   ;;  %s1894_s0 = inlined_call_operand.vmem [shape: bf16[8,1600], index: 0, kind: input, shape index: {}]   ;;  %s1895_s2 = inlined_call_operand.vmem [shape: f32[1,128], index: 2, kind: input, shape index: {}]   ;;  %s1896_s3 = inlined_call_operand.vmem [shape: bf16[8,128], index: 3, kind: output, shape index: {}]  }
   0x1   :  { %v1431_v0 = vld [vmem:[%s1893_s1 + $0x40] sm:$0xff]   ;;  %v1435_v4 = vld [vmem:[%s1893_s1 + $0x48] sm:$0xff]   ;;  %v1439_v8 = vld [vmem:[%s1893_s1 + $0x50] sm:$0xff]  }
   0x2   :  { %v1432_v1 = vld [vmem:[%s1893_s1] sm:$0xff]   ;;  %1280 = vmatprep.subr.bf16.mxu0 %v1431_v0  ;;  %v1436_v5 = vld [vmem:[%s1893_s1 + $0x8] sm:$0xff]   ;;  %v1440_v9 = vld [vmem:[%s1893_s1 + $0x10] sm:$0xff]  }
   0x3   :  { %v1433_v2 = vld [vmem:[%s1893_s1 + $0xc0] sm:$0xff]   ;;  %1281 = vmatpush3.bf16.msra.mxu0 %v1432_v1  ;;  %v1437_v6 = vld [vmem:[%s1893_s1 + $0xc8] sm:$0xff]   ;;  %v1441_v10 = vld [vmem:[%s1893_s1 + $0xd0] sm:$0xff]  }
   0x4   :  { %v1434_v3 = vld [vmem:[%s1893_s1 + $0x80] sm:$0xff]   ;;  %1302 = vmatprep.subr.bf16.mxu1 %v1433_v2  ;;  %1282 = vmatprep.subr.bf16.mxu0 %v1435_v4  ;;  %v1438_v7 = vld [vmem:[%s1893_s1 + $0x88] sm:$0xff]   ;;  %v1442_v11 = vld [vmem:[%s1893_s1 + $0x90] sm:$0xff]  }
   0x5   :  { %1303 = vmatpush3.bf16.msra.mxu1 %v1434_v3  ;;  %v1443_v12 = vld [vmem:[%s1893_s1 + $0x58] sm:$0xff]   ;;  %v1447_v16 = vld [vmem:[%s1893_s1 + $0x60] sm:$0xff]   ;;  %v1451_v20 = vld [vmem:[%s1893_s1 + $0x68] sm:$0xff]  }
   0x6   :  { %1304 = vmatprep.subr.bf16.mxu1 %v1437_v6  ;;  %v1444_v13 = vld [vmem:[%s1893_s1 + $0x18] sm:$0xff]   ;;  %v1448_v17 = vld [vmem:[%s1893_s1 + $0x20] sm:$0xff]   ;;  %v1452_v21 = vld [vmem:[%s1893_s1 + $0x28] sm:$0xff]  }
   0x7   :  { %1283 = vmatpush3.bf16.msra.mxu0 %v1436_v5  ;;  %v1445_v14 = vld [vmem:[%s1893_s1 + $0xd8] sm:$0xff]   ;;  %v1449_v18 = vld [vmem:[%s1893_s1 + $0xe0] sm:$0xff]   ;;  %v1453_v22 = vld [vmem:[%s1893_s1 + $0xe8] sm:$0xff]  }
   0x8   :  { %1284 = vmatprep.subr.bf16.mxu0 %v1439_v8  ;;  %v1446_v15 = vld [vmem:[%s1893_s1 + $0x98] sm:$0xff]   ;;  %v1450_v19 = vld [vmem:[%s1893_s1 + $0xa0] sm:$0xff]   ;;  %v1454_v23 = vld [vmem:[%s1893_s1 + $0xa8] sm:$0xff]  }
   0x9   :  { %1305 = vmatpush3.bf16.msra.mxu1 %v1438_v7  ;;  %v1455_v24 = vld [vmem:[%s1893_s1 + $0x70] sm:$0xff]   ;;  %v1459_v28 = vld [vmem:[%s1893_s1 + $0x78] sm:$0xff]   ;;  %v15_v31 = vld [vmem:[%s1894_s0] sm:$0xff] }
   0xa   :  { %1306 = vmatprep.subr.bf16.mxu1 %v1441_v10  ;;  %v1456_v25 = vld [vmem:[%s1893_s1 + $0x30] sm:$0xff]   ;;  %v1460_v29 = vld [vmem:[%s1893_s1 + $0x38] sm:$0xff]   ;;  %v1166_v32 = vcombine.low %v15_v31, %v15_v31  ;;  %v1167_v33 = vcombine.high %v15_v31, %v15_v31  ;;  %v1465_v35 = vld [vmem:[%s1893_s1 + $0x140] sm:$0xff]  }
   0xb   :  { %1285 = vmatpush3.bf16.msra.mxu0 %v1440_v9  ;;  %v1457_v26 = vld [vmem:[%s1893_s1 + $0xf0] sm:$0xff]   ;;  %v1461_v30 = vld [vmem:[%s1893_s1 + $0xf8] sm:$0xff]   ;;  %v16_v36 = vld [vmem:[%s1894_s0 + $0x8] sm:$0xff] }
   0xc   :  { %1286 = vmatprep.subr.bf16.mxu0 %v1443_v12  ;;  %v1458_v27 = vld [vmem:[%s1893_s1 + $0xb0] sm:$0xff]   ;;  %v1464_v34 = vld [vmem:[%s1893_s1 + $0xb8] sm:$0xff]   ;;  %910 = vmatprep.mubr.bf16.mxu0 %v1167_v33  ;;  %v1168_v37 = vcombine.low %v16_v36, %v16_v36  ;;  %v1169_v38 = vcombine.high %v16_v36, %v16_v36  ;;  %v1468_v39 = vld [vmem:[%s1893_s1 + $0x100] sm:$0xff]  }
   0xd   :  { %1307 = vmatpush3.bf16.msra.mxu1 %v1442_v11  ;;  %v1469_v40 = vld [vmem:[%s1893_s1 + $0x1c0] sm:$0xff]   ;;  %v1471_v42 = vld [vmem:[%s1893_s1 + $0x148] sm:$0xff]   ;;  %v1475_v46 = vld [vmem:[%s1893_s1 + $0x150] sm:$0xff]  }
   0xe   :  { %1308 = vmatprep.subr.bf16.mxu1 %v1445_v14  ;;  %950 = vmatprep.mubr.bf16.mxu1 %v1169_v38  ;;  %v1470_v41 = vld [vmem:[%s1893_s1 + $0x180] sm:$0xff]   ;;  %v1472_v43 = vld [vmem:[%s1893_s1 + $0x108] sm:$0xff]   ;;  %v1476_v47 = vld [vmem:[%s1893_s1 + $0x110] sm:$0xff]  }
   0xf   :  { %1287 = vmatpush3.bf16.msra.mxu0 %v1444_v13  ;;  %v1473_v44 = vld [vmem:[%s1893_s1 + $0x1c8] sm:$0xff]   ;;  %v1477_v48 = vld [vmem:[%s1893_s1 + $0x1d0] sm:$0xff]   ;;  %v1479_v50 = vld [vmem:[%s1893_s1 + $0x158] sm:$0xff]  }
  0x10   :  { %1288 = vmatprep.subr.bf16.mxu0 %v1447_v16  ;;  %v1474_v45 = vld [vmem:[%s1893_s1 + $0x188] sm:$0xff]   ;;  %v1478_v49 = vld [vmem:[%s1893_s1 + $0x190] sm:$0xff]   ;;  %v1480_v51 = vld [vmem:[%s1893_s1 + $0x118] sm:$0xff]  }
  0x11   :  { %1309 = vmatpush3.bf16.msra.mxu1 %v1446_v15  ;;  %v1481_v52 = vld [vmem:[%s1893_s1 + $0x1d8] sm:$0xff]   ;;  %v1483_v54 = vld [vmem:[%s1893_s1 + $0x160] sm:$0xff]   ;;  %v1487_v58 = vld [vmem:[%s1893_s1 + $0x168] sm:$0xff]  }
  0x12   :  { %1310 = vmatprep.subr.bf16.mxu1 %v1449_v18  ;;  %v1482_v53 = vld [vmem:[%s1893_s1 + $0x198] sm:$0xff]   ;;  %v1484_v55 = vld [vmem:[%s1893_s1 + $0x120] sm:$0xff]   ;;  %v1488_v59 = vld [vmem:[%s1893_s1 + $0x128] sm:$0xff]  }
  0x13   :  { %1289 = vmatpush3.bf16.msra.mxu0 %v1448_v17  ;;  %v1485_v56 = vld [vmem:[%s1893_s1 + $0x1e0] sm:$0xff]   ;;  %v1489_v60 = vld [vmem:[%s1893_s1 + $0x1e8] sm:$0xff]   ;;  %v1491_v62 = vld [vmem:[%s1893_s1 + $0x170] sm:$0xff]  }
  0x14   :  { %1290 = vmatprep.subr.bf16.mxu0 %v1451_v20  ;;  %v1486_v57 = vld [vmem:[%s1893_s1 + $0x1a0] sm:$0xff]   ;;  %v1490_v61 = vld [vmem:[%s1893_s1 + $0x1a8] sm:$0xff]   ;;  %v1492_v63 = vld [vmem:[%s1893_s1 + $0x130] sm:$0xff]  }
  0x15   :  { %1311 = vmatpush3.bf16.msra.mxu1 %v1450_v19  ;;  %v1493_v0 = vld [vmem:[%s1893_s1 + $0x1f0] sm:$0xff]   ;;  %v1495_v2 = vld [vmem:[%s1893_s1 + $0x178] sm:$0xff]   ;;  %v1501_v9 = vld [vmem:[%s1893_s1 + $0x240] sm:$0xff]  }
  0x16   :  { %1312 = vmatprep.subr.bf16.mxu1 %v1453_v22  ;;  %v1494_v1 = vld [vmem:[%s1893_s1 + $0x1b0] sm:$0xff]   ;;  %v1496_v3 = vld [vmem:[%s1893_s1 + $0x138] sm:$0xff]   ;;  %v1504_v13 = vld [vmem:[%s1893_s1 + $0x200] sm:$0xff]  }
  0x17   :  { %1291 = vmatpush3.bf16.msra.mxu0 %v1452_v21  ;;  %v1497_v4 = vld [vmem:[%s1893_s1 + $0x1f8] sm:$0xff]   ;;  %v17_v5 = vld [vmem:[%s1894_s0 + $0x10] sm:$0xff]  ;;  %v1505_v14 = vld [vmem:[%s1893_s1 + $0x2c0] sm:$0xff]  }
  0x18   :  { %1292 = vmatprep.subr.bf16.mxu0 %v1455_v24  ;;  %v1170_v6 = vcombine.low %v17_v5, %v17_v5  ;;  %v1171_v7 = vcombine.high %v17_v5, %v17_v5  ;;  %v1500_v8 = vld [vmem:[%s1893_s1 + $0x1b8] sm:$0xff]   ;;  %v1506_v15 = vld [vmem:[%s1893_s1 + $0x280] sm:$0xff]   ;;  %v1507_v16 = vld [vmem:[%s1893_s1 + $0x248] sm:$0xff]  }
  0x19   :  { %1313 = vmatpush3.bf16.msra.mxu1 %v1454_v23  ;;  %v18_v10 = vld [vmem:[%s1894_s0 + $0x18] sm:$0xff]  ;;  %v1508_v17 = vld [vmem:[%s1893_s1 + $0x208] sm:$0xff]   ;;  %v1511_v20 = vld [vmem:[%s1893_s1 + $0x250] sm:$0xff]  }
  0x1a   :  { %1314 = vmatprep.subr.bf16.mxu1 %v1457_v26  ;;  %v1172_v11 = vcombine.low %v18_v10, %v18_v10  ;;  %v1173_v12 = vcombine.high %v18_v10, %v18_v10  ;;  %v1509_v18 = vld [vmem:[%s1893_s1 + $0x2c8] sm:$0xff]   ;;  %v1512_v21 = vld [vmem:[%s1893_s1 + $0x210] sm:$0xff]   ;;  %v1515_v24 = vld [vmem:[%s1893_s1 + $0x258] sm:$0xff]  }
  0x1b   :  { %1293 = vmatpush3.bf16.msra.mxu0 %v1456_v25  ;;  %v1510_v19 = vld [vmem:[%s1893_s1 + $0x288] sm:$0xff]   ;;  %v1513_v22 = vld [vmem:[%s1893_s1 + $0x2d0] sm:$0xff]   ;;  %v1516_v25 = vld [vmem:[%s1893_s1 + $0x218] sm:$0xff]  }
  0x1c   :  { %1294 = vmatprep.subr.bf16.mxu0 %v1459_v28  ;;  %v1514_v23 = vld [vmem:[%s1893_s1 + $0x290] sm:$0xff]   ;;  %v1517_v26 = vld [vmem:[%s1893_s1 + $0x2d8] sm:$0xff]   ;;  %v1519_v28 = vld [vmem:[%s1893_s1 + $0x260] sm:$0xff]  }
  0x1d   :  { %1315 = vmatpush3.bf16.msra.mxu1 %v1458_v27  ;;  %v1518_v27 = vld [vmem:[%s1893_s1 + $0x298] sm:$0xff]   ;;  %v1522_v31 = vld [vmem:[%s1893_s1 + $0x2a0] sm:$0xff]   ;;  %v1524_v33 = vld [vmem:[%s1893_s1 + $0x228] sm:$0xff]  }
  0x1e   :  { %1316 = vmatprep.subr.bf16.mxu1 %v1461_v30  ;;  %v1521_v30 = vld [vmem:[%s1893_s1 + $0x2e0] sm:$0xff]   ;;  %v1527_v36 = vld [vmem:[%s1893_s1 + $0x270] sm:$0xff]  }
  0x1f   :  { %1295 = vmatpush3.bf16.msra.mxu0 %v1460_v29  ;;  %v1520_v29 = vld [vmem:[%s1893_s1 + $0x220] sm:$0xff]   ;;  %v1529_v38 = vld [vmem:[%s1893_s1 + $0x2f0] sm:$0xff]  }
  0x20   :  { %1324 = vmatprep.subr.bf16.mxu0 %v1465_v35  ;;  %v1526_v35 = vld [vmem:[%s1893_s1 + $0x2a8] sm:$0xff]  }
  0x21   :  { %1317 = vmatpush3.bf16.msra.mxu1 %v1464_v34  ;;  %v1525_v34 = vld [vmem:[%s1893_s1 + $0x2e8] sm:$0xff]  }
  0x22   :  { %911 = vmatmul.mubr.bf16.vlgmr.msra.gmra.mrb[0].mxu0 %v1166_v32  ;;  %1346 = vmatprep.subr.bf16.mxu1 %v1469_v40  ;;  %v1523_v32 = vld [vmem:[%s1893_s1 + $0x268] sm:$0xff]   ;;  %v1531_v40 = vld [vmem:[%s1893_s1 + $0x278] sm:$0xff]  }
  0x23   :  { %1325 = vmatpush3.bf16.msra.mxu0 %v1468_v39  ;;  %990 = vmatprep.mubr.bf16.mxu0 %v1171_v7  ;;  %v1530_v39 = vld [vmem:[%s1893_s1 + $0x2b0] sm:$0xff]  }
  0x24   :  { %951 = vmatmul.mubr.bf16.vlgmr.msra.gmra.mrb[0].mxu1 %v1168_v37  ;;  %1326 = vmatprep.subr.bf16.mxu0 %v1471_v42  ;;  %v1528_v37 = vld [vmem:[%s1893_s1 + $0x230] sm:$0xff]   ;;  %v1533_v42 = vld [vmem:[%s1893_s1 + $0x2f8] sm:$0xff]  }
  0x25   :  { %1347 = vmatpush3.bf16.msra.mxu1 %v1470_v41  ;;  %1030 = vmatprep.mubr.bf16.mxu1 %v1173_v12  ;;  %v1532_v41 = vld [vmem:[%s1893_s1 + $0x238] sm:$0xff]  }
  0x26   :  { %1348 = vmatprep.subr.bf16.mxu1 %v1473_v44 }
  0x27   :  { %1327 = vmatpush3.bf16.msra.mxu0 %v1472_v43  ;;  %v19_v43 = vld [vmem:[%s1894_s0 + $0x20] sm:$0xff] }
  0x28   :  { %1328 = vmatprep.subr.bf16.mxu0 %v1475_v46  ;;  %v1174_v44 = vcombine.low %v19_v43, %v19_v43  ;;  %v1536_v46 = vld [vmem:[%s1893_s1 + $0x2b8] sm:$0xff]  }
  0x29   :  { %1349 = vmatpush3.bf16.msra.mxu1 %v1474_v45  ;;  %v1175_v45 = vcombine.high %v19_v43, %v19_v43 }
  0x2a   :  { %1350 = vmatprep.subr.bf16.mxu1 %v1477_v48  ;;  %v1544_v48 = vmov 0.0  }
  0x2b   :  { %1329 = vmatpush3.bf16.msra.mxu0 %v1476_v47  ;;  %v20_v47 = vld [vmem:[%s1894_s0 + $0x28] sm:$0xff] }
  0x2c   :  { %1330 = vmatprep.subr.bf16.mxu0 %v1479_v50  ;;  %v1177_v50 = vcombine.high %v20_v47, %v20_v47 }
  0x2d   :  { %1351 = vmatpush3.bf16.msra.mxu1 %v1478_v49  ;;  %v1176_v49 = vcombine.low %v20_v47, %v20_v47 }
  0x2e   :  { %1352 = vmatprep.subr.bf16.mxu1 %v1481_v52  ;;  %v1540_v52 = vld [vmem:[%s1893_s1 + $0x308] sm:$0xff]  }
  0x2f   :  { %1331 = vmatpush3.bf16.msra.mxu0 %v1480_v51  ;;  %v1539_v51 = vld [vmem:[%s1893_s1 + $0x300] sm:$0xff]  }
  0x30   :  { %1332 = vmatprep.subr.bf16.mxu0 %v1483_v54  ;;  %v1542_v54 = vld [vmem:[%s1893_s1 + $0x318] sm:$0xff]  }
  0x31   :  { %1353 = vmatpush3.bf16.msra.mxu1 %v1482_v53  ;;  %v1541_v53 = vld [vmem:[%s1893_s1 + $0x310] sm:$0xff]  }
  0x32   :  { %1354 = vmatprep.subr.bf16.mxu1 %v1485_v56 }
  0x33   :  { %1333 = vmatpush3.bf16.msra.mxu0 %v1484_v55  ;;  %v1543_v55 = vld [vmem:[%s1894_s0 + $0x30] ss:$0 sps:$4 sm:$0xff]  }
  0x34   :  { %1334 = vmatprep.subr.bf16.mxu0 %v1487_v58 }
  0x35   :  { %1355 = vmatpush3.bf16.msra.mxu1 %v1486_v57  ;;  %v1165_v57 = vld [vmem:[%s1895_s2] ss:$0 sm:$0xff] }
  0x36   :  { %1356 = vmatprep.subr.bf16.mxu1 %v1489_v60 }
  0x37   :  { %1335 = vmatpush3.bf16.msra.mxu0 %v1488_v59 }
  0x38   :  { %1336 = vmatprep.subr.bf16.mxu0 %v1491_v62 }
  0x39   :  { %1357 = vmatpush3.bf16.msra.mxu1 %v1490_v61 }
  0x3a   :  { %1358 = vmatprep.subr.bf16.mxu1 %v1493_v0 }
  0x3b   :  { %1337 = vmatpush3.bf16.msra.mxu0 %v1492_v63 }
  0x3c   :  { %1338 = vmatprep.subr.bf16.mxu0 %v1495_v2 }
  0x3d   :  { %1359 = vmatpush3.bf16.msra.mxu1 %v1494_v1 }
  0x3e   :  { %1360 = vmatprep.subr.bf16.mxu1 %v1497_v4 }
  0x3f   :  { %1339 = vmatpush3.bf16.msra.mxu0 %v1496_v3 }
  0x40   :  { %1368 = vmatprep.subr.bf16.mxu0 %v1501_v9 }
  0x41   :  { %1361 = vmatpush3.bf16.msra.mxu1 %v1500_v8 }
  0x42   :  { %991 = vmatmul.mubr.bf16.vlgmr.msra.gmra.mrb[4].mxu0 %v1170_v6  ;;  %1390 = vmatprep.subr.bf16.mxu1 %v1505_v14 }
  0x43   :  { %1369 = vmatpush3.bf16.msra.mxu0 %v1504_v13  ;;  %1070 = vmatprep.mubr.bf16.mxu0 %v1175_v45 }
  0x44   :  { %1031 = vmatmul.mubr.bf16.vlgmr.msra.gmra.mrb[4].mxu1 %v1172_v11  ;;  %1370 = vmatprep.subr.bf16.mxu0 %v1507_v16 }
  0x45   :  { %1391 = vmatpush3.bf16.msra.mxu1 %v1506_v15  ;;  %1110 = vmatprep.mubr.bf16.mxu1 %v1177_v50 }
  0x46   :  { %1392 = vmatprep.subr.bf16.mxu1 %v1509_v18 }
  0x47   :  { %1371 = vmatpush3.bf16.msra.mxu0 %v1508_v17 }
  0x48   :  { %1372 = vmatprep.subr.bf16.mxu0 %v1511_v20 }
  0x49   :  { %1393 = vmatpush3.bf16.msra.mxu1 %v1510_v19 }
  0x4a   :  { %1394 = vmatprep.subr.bf16.mxu1 %v1513_v22 }
  0x4b   :  { %1373 = vmatpush3.bf16.msra.mxu0 %v1512_v21 }
  0x4c   :  { %1374 = vmatprep.subr.bf16.mxu0 %v1515_v24 }
  0x4d   :  { %1395 = vmatpush3.bf16.msra.mxu1 %v1514_v23 }
  0x4e   :  { %1396 = vmatprep.subr.bf16.mxu1 %v1517_v26 }
  0x4f   :  { %1375 = vmatpush3.bf16.msra.mxu0 %v1516_v25 }
  0x50   :  { %1376 = vmatprep.subr.bf16.mxu0 %v1519_v28 }
  0x51   :  { %1397 = vmatpush3.bf16.msra.mxu1 %v1518_v27 }
  0x52   :  { %1398 = vmatprep.subr.bf16.mxu1 %v1521_v30 }
  0x53   :  { %1377 = vmatpush3.bf16.msra.mxu0 %v1520_v29 }
  0x54   :  { %1378 = vmatprep.subr.bf16.mxu0 %v1523_v32 }
  0x55   :  { %1399 = vmatpush3.bf16.msra.mxu1 %v1522_v31 }
  0x56   :  { %1400 = vmatprep.subr.bf16.mxu1 %v1525_v34 }
  0x57   :  { %1379 = vmatpush3.bf16.msra.mxu0 %v1524_v33 }
  0x58   :  { %1380 = vmatprep.subr.bf16.mxu0 %v1527_v36 }
  0x59   :  { %1401 = vmatpush3.bf16.msra.mxu1 %v1526_v35 }
  0x5a   :  { %1402 = vmatprep.subr.bf16.mxu1 %v1529_v38 }
  0x5b   :  { %1381 = vmatpush3.bf16.msra.mxu0 %v1528_v37 }
  0x5c   :  { %1382 = vmatprep.subr.bf16.mxu0 %v1531_v40 }
  0x5d   :  { %1403 = vmatpush3.bf16.msra.mxu1 %v1530_v39 }
  0x5e   :  { %1404 = vmatprep.subr.bf16.mxu1 %v1533_v42 }
  0x5f   :  { %1383 = vmatpush3.bf16.msra.mxu0 %v1532_v41 }
  0x60   :  { %1417 = vmatprep.subr.bf16.mxu0 %v1544_v48 }
  0x61   :  { %1405 = vmatpush3.bf16.msra.mxu1 %v1536_v46 }
  0x62   :  { %1071 = vmatmul.mubr.bf16.vlgmr.msra.gmra.mrb[8].mxu0 %v1174_v44 }
  0x63   :  { %1418 = vmatpush3.bf16.msra.mxu0 %v1539_v51  ;;  %1425 = vmatprep.mubr.msk.bf16.mxu0 %vm1545_vm0, %v1544_v48 }
  0x64   :  { %1111 = vmatmul.mubr.bf16.vlgmr.msra.gmra.mrb[8].mxu1 %v1176_v49  ;;  %1419 = vmatprep.subr.bf16.mxu0 %v1544_v48 }
  0x67   :  { %1420 = vmatpush3.bf16.msra.mxu0 %v1540_v52 }
  0x68   :  { %1421 = vmatprep.subr.bf16.mxu0 %v1544_v48 }
  0x6b   :  { %1422 = vmatpush3.bf16.msra.mxu0 %v1541_v53 }
  0x6c   :  { %1423 = vmatprep.subr.bf16.mxu0 %v1544_v48 }
  0x6f   :  { %1424 = vmatpush3.bf16.msra.mxu0 %v1542_v54 }
  0x72   :  { %1426 = vmatmul.mubr.msk.bf16.vlgmr.msra.gmra.mrb[12].mxu0 %vm874_vm1, %v1543_v55 }
  0xf5   :  { %v1296_v56 = vpop.f32.mrb[0].mxu0 }
  0xf6   :  { %v1297_v58 = vpop.f32.mrb[1].mxu0 }
  0xf7   :  { %v1298_v59 = vadd.f32 %v1297_v58, %v1296_v56  ;;  %v1299_v60 = vpop.f32.mrb[2].mxu0  ;;  %v1318_v61 = vpop.f32.mrb[0].mxu1 }
  0xf8   :  { %v1300_v62 = vpop.f32.mrb[3].mxu0  ;;  %v1319_v63 = vpop.f32.mrb[1].mxu1 }
  0xf9   :  { %v913_v0 = vadd.f32 %v1298_v59, %v1165_v57  ;;  %v1320_v1 = vadd.f32 %v1319_v63, %v1318_v61  ;;  %v1321_v2 = vpop.f32.mrb[2].mxu1 }
  0xfa   :  { %v1322_v3 = vpop.f32.mrb[3].mxu1 }
  0xfb   :  { %v953_v4 = vadd.f32 %v1320_v1, %v913_v0 }
 0x115   :  { %v1340_v5 = vpop.f32.mrb[4].mxu0 }
 0x116   :  { %v1341_v6 = vpop.f32.mrb[5].mxu0 }
 0x117   :  { %v1342_v7 = vadd.f32 %v1341_v6, %v1340_v5  ;;  %v1343_v8 = vpop.f32.mrb[6].mxu0  ;;  %v1362_v9 = vpop.f32.mrb[4].mxu1 }
 0x118   :  { %v1344_v10 = vpop.f32.mrb[7].mxu0  ;;  %v1363_v12 = vpop.f32.mrb[5].mxu1 }
 0x119   :  { %v993_v11 = vadd.f32 %v1342_v7, %v953_v4  ;;  %v1364_v13 = vadd.f32 %v1363_v12, %v1362_v9  ;;  %v1365_v14 = vpop.f32.mrb[6].mxu1 }
 0x11a   :  { %v1366_v15 = vpop.f32.mrb[7].mxu1 }
 0x11b   :  { %v1033_v16 = vadd.f32 %v1364_v13, %v993_v11 }
 0x135   :  { %v1384_v17 = vpop.f32.mrb[8].mxu0 }
 0x136   :  { %v1385_v18 = vpop.f32.mrb[9].mxu0 }
 0x137   :  { %v1386_v19 = vadd.f32 %v1385_v18, %v1384_v17  ;;  %v1387_v20 = vpop.f32.mrb[10].mxu0  ;;  %v1406_v21 = vpop.f32.mrb[8].mxu1 }
 0x138   :  { %v1388_v22 = vpop.f32.mrb[11].mxu0  ;;  %v1407_v23 = vpop.f32.mrb[9].mxu1 }
 0x139   :  { %v1073_v24 = vadd.f32 %v1386_v19, %v1033_v16  ;;  %v1408_v25 = vadd.f32 %v1407_v23, %v1406_v21  ;;  %v1409_v26 = vpop.f32.mrb[10].mxu1 }
 0x13a   :  { %v1410_v27 = vpop.f32.mrb[11].mxu1 }
 0x13b   :  { %v1113_v28 = vadd.f32 %v1408_v25, %v1073_v24 }
 0x145   :  { %v1152_v29 = vpop.f32.mrb[12].mxu0 }
 0x146   :  { %v1153_v30 = vadd.f32 %v1152_v29, %v1113_v28  ;;  %v1427_v31 = vpop.f32.mrb[13].mxu0 }
 0x147   :  { %v1155_v32 = vpop.f32.mrb[14].mxu0 }
 0x148   :  { %v1158_v33 = vmax.f32 %v1153_v30, 0.0  ;;  %v1428_v34 = vpop.f32.mrb[15].mxu0 }
 0x14a   :  { %v1159_v35 = vpack.c.bf16 %v1158_v33, %v1158_v33 }
 0x14c   :  { %1160 = vst [vmem:[%s1896_s3] sm:$0xf] %v1159_v35 }

// kernel: conv_branch_2d_regression_forward.13
= control target key start
LH: loop header
LB: loop body
LE: loop exit
PB: predicated region body
PF: predicated region fallthrough
CT: control target
= control target key end

     0   :  { %v90_v38 = vlaneseq  ;;  %v1161_v39 = vmov 1966171168   ;;  %vm884_vm0 = vcmask 1024   ;;  %s1499_s1 = inlined_call_operand.vmem [shape: bf16[256,512], index: 1, kind: input, shape index: {}]   ;;  %s1500_s0 = inlined_call_operand.vmem [shape: bf16[2,256], index: 0, kind: input, shape index: {}]   ;;  %s1501_s3 = inlined_call_operand.vmem [shape: bf16[512,1], index: 3, kind: input, shape index: {}]   ;;  %s1502_s2 = inlined_call_operand.vmem [shape: f32[1,512], index: 2, kind: input, shape index: {}]   ;;  %s1503_s4 = inlined_call_operand.<no memory space> [shape: f32[1,1], index: 4, kind: input, shape index: {}]   ;;  %s1504_s5 = inlined_call_operand.vmem [shape: f32[2,1], index: 5, kind: output, shape index: {}]  }
   0x1   :  { %v1033_v0 = vld [vmem:[%s1499_s1 + $0x4] ss:$16 sps:$4 sm:$0xff]   ;;  %v1035_v1 = vld [vmem:[%s1499_s1 + $0xc] ss:$16 sps:$4 sm:$0xff]   ;;  %v1037_v2 = vld [vmem:[%s1499_s1] ss:$16 sps:$4 sm:$0xff]   ;;  %v120_v40 = vunpack.c.l.s4 %v1161_v39 }
   0x2   :  { %455 = vmatprep.subr.bf16.mxu0 %v1033_v0  ;;  %v1038_v3 = vld [vmem:[%s1499_s1 + $0x8] ss:$16 sps:$4 sm:$0xff]   ;;  %496 = vmatprep.subr.bf16.mxu1 %v1035_v1  ;;  %v1039_v4 = vld [vmem:[%s1499_s1 + $0x24] ss:$16 sps:$4 sm:$0xff]   ;;  %v1041_v5 = vld [vmem:[%s1499_s1 + $0x2c] ss:$16 sps:$4 sm:$0xff]  }
   0x3   :  { %456 = vmatpush1.bf16.msra.mxu0 %v1037_v2  ;;  %497 = vmatpush1.bf16.msra.mxu1 %v1038_v3  ;;  %v1043_v6 = vld [vmem:[%s1499_s1 + $0x20] ss:$16 sps:$4 sm:$0xff]   ;;  %v1044_v7 = vld [vmem:[%s1499_s1 + $0x28] ss:$16 sps:$4 sm:$0xff]   ;;  %v1045_v8 = vld [vmem:[%s1499_s1 + $0x44] ss:$16 sps:$4 sm:$0xff]   ;;  %v121_v46 = vunpack.c.0.s8 %v120_v40 }
   0x4   :  { %457 = vmatprep.subr.bf16.mxu0 %v1039_v4  ;;  %498 = vmatprep.subr.bf16.mxu1 %v1041_v5  ;;  %v1047_v9 = vld [vmem:[%s1499_s1 + $0x4c] ss:$16 sps:$4 sm:$0xff]   ;;  %v1049_v10 = vld [vmem:[%s1499_s1 + $0x40] ss:$16 sps:$4 sm:$0xff]   ;;  %v1050_v11 = vld [vmem:[%s1499_s1 + $0x48] ss:$16 sps:$4 sm:$0xff]  }
   0x5   :  { %v1051_v12 = vld [vmem:[%s1499_s1 + $0x64] ss:$16 sps:$4 sm:$0xff]   ;;  %v1053_v13 = vld [vmem:[%s1499_s1 + $0x6c] ss:$16 sps:$4 sm:$0xff]   ;;  %v1055_v14 = vld [vmem:[%s1499_s1 + $0x60] ss:$16 sps:$4 sm:$0xff]  }
   0x6   :  { %v1056_v15 = vld [vmem:[%s1499_s1 + $0x68] ss:$16 sps:$4 sm:$0xff]   ;;  %v1057_v16 = vld [vmem:[%s1499_s1 + $0x84] ss:$16 sps:$4 sm:$0xff]   ;;  %v1059_v17 = vld [vmem:[%s1499_s1 + $0x8c] ss:$16 sps:$4 sm:$0xff]  }
   0x7   :  { %458 = vmatpush1.bf16.msra.mxu0 %v1043_v6  ;;  %499 = vmatpush1.bf16.msra.mxu1 %v1044_v7  ;;  %v1061_v18 = vld [vmem:[%s1499_s1 + $0x80] ss:$16 sps:$4 sm:$0xff]   ;;  %v1062_v19 = vld [vmem:[%s1499_s1 + $0x88] ss:$16 sps:$4 sm:$0xff]   ;;  %v1063_v20 = vld [vmem:[%s1499_s1 + $0xa4] ss:$16 sps:$4 sm:$0xff]  }
   0x8   :  { %459 = vmatprep.subr.bf16.mxu0 %v1045_v8  ;;  %500 = vmatprep.subr.bf16.mxu1 %v1047_v9  ;;  %v1065_v21 = vld [vmem:[%s1499_s1 + $0xac] ss:$16 sps:$4 sm:$0xff]   ;;  %v1067_v22 = vld [vmem:[%s1499_s1 + $0xa0] ss:$16 sps:$4 sm:$0xff]   ;;  %v1068_v23 = vld [vmem:[%s1499_s1 + $0xa8] ss:$16 sps:$4 sm:$0xff]  }
   0x9   :  { %v1069_v24 = vld [vmem:[%s1499_s1 + $0xc4] ss:$16 sps:$4 sm:$0xff]   ;;  %v1071_v25 = vld [vmem:[%s1499_s1 + $0xcc] ss:$16 sps:$4 sm:$0xff]   ;;  %v1073_v26 = vld [vmem:[%s1499_s1 + $0xc0] ss:$16 sps:$4 sm:$0xff]  }
   0xa   :  { %v1074_v27 = vld [vmem:[%s1499_s1 + $0xc8] ss:$16 sps:$4 sm:$0xff]   ;;  %v1075_v28 = vld [vmem:[%s1499_s1 + $0xe4] ss:$16 sps:$4 sm:$0xff]   ;;  %v1077_v29 = vld [vmem:[%s1499_s1 + $0xec] ss:$16 sps:$4 sm:$0xff]  }
   0xb   :  { %460 = vmatpush1.bf16.msra.mxu0 %v1049_v10  ;;  %501 = vmatpush1.bf16.msra.mxu1 %v1050_v11  ;;  %v1079_v30 = vld [vmem:[%s1499_s1 + $0xe0] ss:$16 sps:$4 sm:$0xff]   ;;  %v1080_v31 = vld [vmem:[%s1499_s1 + $0xe8] ss:$16 sps:$4 sm:$0xff]   ;;  %v1081_v32 = vld [vmem:[%s1499_s1 + $0x104] ss:$16 sps:$4 sm:$0xff]  }
   0xc   :  { %461 = vmatprep.subr.bf16.mxu0 %v1051_v12  ;;  %502 = vmatprep.subr.bf16.mxu1 %v1053_v13  ;;  %v1083_v33 = vld [vmem:[%s1499_s1 + $0x10c] ss:$16 sps:$4 sm:$0xff]   ;;  %v1085_v34 = vld [vmem:[%s1499_s1 + $0x100] ss:$16 sps:$4 sm:$0xff]   ;;  %v1086_v35 = vld [vmem:[%s1499_s1 + $0x108] ss:$16 sps:$4 sm:$0xff]  }
   0xd   :  { %v1087_v36 = vld [vmem:[%s1499_s1 + $0x124] ss:$16 sps:$4 sm:$0xff]   ;;  %v1089_v37 = vld [vmem:[%s1499_s1 + $0x12c] ss:$16 sps:$4 sm:$0xff]   ;;  %v1091_v41 = vld [vmem:[%s1499_s1 + $0x120] ss:$16 sps:$4 sm:$0xff]  }
   0xe   :  { %v1092_v42 = vld [vmem:[%s1499_s1 + $0x128] ss:$16 sps:$4 sm:$0xff]   ;;  %v1093_v43 = vld [vmem:[%s1499_s1 + $0x144] ss:$16 sps:$4 sm:$0xff]   ;;  %v1095_v44 = vld [vmem:[%s1499_s1 + $0x14c] ss:$16 sps:$4 sm:$0xff]  }
   0xf   :  { %462 = vmatpush1.bf16.msra.mxu0 %v1055_v14  ;;  %503 = vmatpush1.bf16.msra.mxu1 %v1056_v15  ;;  %v1318_v45 = vshrl.u32 %v90_v38, 7  ;;  %v1097_v47 = vld [vmem:[%s1499_s1 + $0x140] ss:$16 sps:$4 sm:$0xff]   ;;  %v1098_v48 = vld [vmem:[%s1499_s1 + $0x148] ss:$16 sps:$4 sm:$0xff]  }
  0x10   :  { %463 = vmatprep.subr.bf16.mxu0 %v1057_v16  ;;  %504 = vmatprep.subr.bf16.mxu1 %v1059_v17  ;;  %v1099_v49 = vld [vmem:[%s1499_s1 + $0x164] ss:$16 sps:$4 sm:$0xff]   ;;  %v1101_v50 = vld [vmem:[%s1499_s1 + $0x16c] ss:$16 sps:$4 sm:$0xff]   ;;  %v1103_v51 = vld [vmem:[%s1499_s1 + $0x160] ss:$16 sps:$4 sm:$0xff]  }
  0x11   :  { %v1104_v52 = vld [vmem:[%s1499_s1 + $0x168] ss:$16 sps:$4 sm:$0xff]   ;;  %v124_v53 = vsub.s32 %v121_v46, %v1318_v45  ;;  %v890_v54 = vld.sshfl [vmem:[%s1500_s0] sm:$0x11 pattern:$0x75316420] }
  0x12   :  { %v1105_v55 = vld [vmem:[%s1499_s1 + $0x184] ss:$16 sps:$4 sm:$0xff]   ;;  %v118_v56 = vcombine.high %v890_v54, %v890_v54  ;;  %v1107_v57 = vld [vmem:[%s1499_s1 + $0x18c] ss:$16 sps:$4 sm:$0xff]   ;;  %v1109_v58 = vld [vmem:[%s1499_s1 + $0x180] ss:$16 sps:$4 sm:$0xff]  }
  0x13   :  { %464 = vmatpush1.bf16.msra.mxu0 %v1061_v18  ;;  %505 = vmatpush1.bf16.msra.mxu1 %v1062_v19  ;;  %v1110_v60 = vld [vmem:[%s1499_s1 + $0x188] ss:$16 sps:$4 sm:$0xff]   ;;  %v1111_v61 = vld [vmem:[%s1499_s1 + $0x1a4] ss:$16 sps:$4 sm:$0xff]   ;;  %v1113_v62 = vld [vmem:[%s1499_s1 + $0x1ac] ss:$16 sps:$4 sm:$0xff]   ;;  %v125_v12 = vrot.slane %v890_v54, %v124_v53 }
  0x14   :  { %465 = vmatprep.subr.bf16.mxu0 %v1063_v20  ;;  %506 = vmatprep.subr.bf16.mxu1 %v1065_v21  ;;  %v132_v59 = vrot.slane %v118_v56, %v124_v53  ;;  %v1115_v63 = vld [vmem:[%s1499_s1 + $0x1a0] ss:$16 sps:$4 sm:$0xff]   ;;  %v1116_v0 = vld [vmem:[%s1499_s1 + $0x1a8] ss:$16 sps:$4 sm:$0xff]   ;;  %v1117_v1 = vld [vmem:[%s1499_s1 + $0x1c4] ss:$16 sps:$4 sm:$0xff]  }
  0x15   :  { %v1119_v2 = vld [vmem:[%s1499_s1 + $0x1cc] ss:$16 sps:$4 sm:$0xff]   ;;  %v1121_v3 = vld [vmem:[%s1499_s1 + $0x1c0] ss:$16 sps:$4 sm:$0xff]   ;;  %v1122_v4 = vld [vmem:[%s1499_s1 + $0x1c8] ss:$16 sps:$4 sm:$0xff]  }
  0x16   :  { %487 = vmatprep.mubr.bf16.mxu0 %v132_v59  ;;  %528 = vmatprep.mubr.bf16.mxu1 %v132_v59  ;;  %v1123_v5 = vld [vmem:[%s1499_s1 + $0x1e4] ss:$16 sps:$4 sm:$0xff]   ;;  %v1125_v6 = vld [vmem:[%s1499_s1 + $0x1ec] ss:$16 sps:$4 sm:$0xff]   ;;  %v1127_v7 = vld [vmem:[%s1499_s1 + $0x1e0] ss:$16 sps:$4 sm:$0xff]  }
  0x17   :  { %466 = vmatpush1.bf16.msra.mxu0 %v1067_v22  ;;  %507 = vmatpush1.bf16.msra.mxu1 %v1068_v23  ;;  %v1128_v8 = vld [vmem:[%s1499_s1 + $0x1e8] ss:$16 sps:$4 sm:$0xff]   ;;  %v1129_v9 = vld [vmem:[%s1501_s3 + $0x40] sm:$0xff]   ;;  %v1137_v18 = vld [vmem:[%s1501_s3 + $0x50] sm:$0xff]   ;;  %v96_v46 = vsub.s32 1, %v1318_v45 }
  0x18   :  { %467 = vmatprep.subr.bf16.mxu0 %v1069_v24  ;;  %508 = vmatprep.subr.bf16.mxu1 %v1071_v25  ;;  %v1130_v10 = vld [vmem:[%s1501_s3 + $0xc0] sm:$0xff]   ;;  %v1133_v14 = vld [vmem:[%s1501_s3 + $0x48] sm:$0xff]   ;;  %v1138_v19 = vld [vmem:[%s1501_s3 + $0xd0] sm:$0xff]  }
  0x19   :  { %v1131_v11 = vld [vmem:[%s1501_s3] sm:$0xff]   ;;  %v1134_v15 = vld [vmem:[%s1501_s3 + $0xc8] sm:$0xff]   ;;  %v1139_v20 = vld [vmem:[%s1501_s3 + $0x10] sm:$0xff]  }
  0x1a   :  { %v1132_v13 = vld [vmem:[%s1501_s3 + $0x80] sm:$0xff]   ;;  %v1135_v16 = vld [vmem:[%s1501_s3 + $0x8] sm:$0xff]   ;;  %v1140_v21 = vld [vmem:[%s1501_s3 + $0x90] sm:$0xff]  }
  0x1b   :  { %468 = vmatpush1.bf16.msra.mxu0 %v1073_v26  ;;  %509 = vmatpush1.bf16.msra.mxu1 %v1074_v27  ;;  %v1136_v17 = vld [vmem:[%s1501_s3 + $0x88] sm:$0xff]   ;;  %v1141_v22 = vld [vmem:[%s1501_s3 + $0x58] sm:$0xff]   ;;  %v1145_v26 = vld [vmem:[%s1501_s3 + $0x60] sm:$0xff]  }
  0x1c   :  { %469 = vmatprep.subr.bf16.mxu0 %v1075_v28  ;;  %510 = vmatprep.subr.bf16.mxu1 %v1077_v29  ;;  %v1142_v23 = vld [vmem:[%s1501_s3 + $0xd8] sm:$0xff]   ;;  %v1146_v27 = vld [vmem:[%s1501_s3 + $0xe0] sm:$0xff]  }
  0x1d   :  { %v1143_v24 = vld [vmem:[%s1501_s3 + $0x18] sm:$0xff]   ;;  %v1147_v28 = vld [vmem:[%s1501_s3 + $0x20] sm:$0xff]  }
  0x1e   :  { %v1144_v25 = vld [vmem:[%s1501_s3 + $0x98] sm:$0xff]   ;;  %v1148_v29 = vld [vmem:[%s1501_s3 + $0xa0] sm:$0xff]  }
  0x1f   :  { %470 = vmatpush1.bf16.msra.mxu0 %v1079_v30  ;;  %511 = vmatpush1.bf16.msra.mxu1 %v1080_v31  ;;  %v1149_v30 = vld [vmem:[%s1501_s3 + $0x68] sm:$0xff]   ;;  %v1157_v38 = vld [vmem:[%s1501_s3 + $0x78] sm:$0xff]  }
  0x20   :  { %471 = vmatprep.subr.bf16.mxu0 %v1081_v32  ;;  %512 = vmatprep.subr.bf16.mxu1 %v1083_v33  ;;  %v1150_v31 = vld [vmem:[%s1501_s3 + $0xe8] sm:$0xff]   ;;  %v1158_v39 = vld [vmem:[%s1501_s3 + $0xf8] sm:$0xff]  }
  0x21   :  { %v1151_v32 = vld [vmem:[%s1501_s3 + $0x28] sm:$0xff]   ;;  %v1159_v40 = vld [vmem:[%s1501_s3 + $0x38] sm:$0xff]  }
  0x22   :  { %v1152_v33 = vld [vmem:[%s1501_s3 + $0xa8] sm:$0xff]  }
  0x23   :  { %472 = vmatpush1.bf16.msra.mxu0 %v1085_v34  ;;  %513 = vmatpush1.bf16.msra.mxu1 %v1086_v35  ;;  %v1153_v34 = vld [vmem:[%s1501_s3 + $0x70] sm:$0xff]  }
  0x24   :  { %473 = vmatprep.subr.bf16.mxu0 %v1087_v36  ;;  %514 = vmatprep.subr.bf16.mxu1 %v1089_v37  ;;  %v1154_v35 = vld [vmem:[%s1501_s3 + $0xf0] sm:$0xff]  }
  0x25   :  { %v1155_v36 = vld [vmem:[%s1501_s3 + $0x30] sm:$0xff]  }
  0x26   :  { %v1156_v37 = vld [vmem:[%s1501_s3 + $0xb0] sm:$0xff]  }
  0x27   :  { %474 = vmatpush1.bf16.msra.mxu0 %v1091_v41  ;;  %515 = vmatpush1.bf16.msra.mxu1 %v1092_v42  ;;  %v1160_v41 = vld [vmem:[%s1501_s3 + $0xb8] sm:$0xff]   ;;  %v92_v42 = vsub.s32 0, %v1318_v45 }
  0x28   :  { %475 = vmatprep.subr.bf16.mxu0 %v1093_v43  ;;  %516 = vmatprep.subr.bf16.mxu1 %v1095_v44  ;;  %v100_v43 = vsub.s32 2, %v1318_v45  ;;  %v88_v44 = vld [vmem:[%s1502_s2] sm:$0xf] }
  0x2b   :  { %476 = vmatpush1.bf16.msra.mxu0 %v1097_v47  ;;  %517 = vmatpush1.bf16.msra.mxu1 %v1098_v48  ;;  %v104_v47 = vsub.s32 3, %v1318_v45  ;;  %v93_v48 = vrot.slane %v88_v44, %v92_v42 }
  0x2c   :  { %477 = vmatprep.subr.bf16.mxu0 %v1099_v49  ;;  %518 = vmatprep.subr.bf16.mxu1 %v1101_v50  ;;  %v101_v49 = vrot.slane %v88_v44, %v100_v43  ;;  %v97_v50 = vrot.slane %v88_v44, %v96_v46 }
  0x2f   :  { %478 = vmatpush1.bf16.msra.mxu0 %v1103_v51  ;;  %519 = vmatpush1.bf16.msra.mxu1 %v1104_v52  ;;  %v105_v51 = vrot.slane %v88_v44, %v104_v47 }
  0x30   :  { %479 = vmatprep.subr.bf16.mxu0 %v1105_v55  ;;  %520 = vmatprep.subr.bf16.mxu1 %v1107_v57 }
  0x33   :  { %480 = vmatpush1.bf16.msra.mxu0 %v1109_v58  ;;  %521 = vmatpush1.bf16.msra.mxu1 %v1110_v60 }
  0x34   :  { %481 = vmatprep.subr.bf16.mxu0 %v1111_v61  ;;  %522 = vmatprep.subr.bf16.mxu1 %v1113_v62 }
  0x37   :  { %482 = vmatpush1.bf16.msra.mxu0 %v1115_v63  ;;  %523 = vmatpush1.bf16.msra.mxu1 %v1116_v0 }
  0x38   :  { %483 = vmatprep.subr.bf16.mxu0 %v1117_v1  ;;  %524 = vmatprep.subr.bf16.mxu1 %v1119_v2 }
  0x3b   :  { %484 = vmatpush1.bf16.msra.mxu0 %v1121_v3  ;;  %525 = vmatpush1.bf16.msra.mxu1 %v1122_v4  ;;  %v10_v3 = vstv %s1503_s4 }
  0x3c   :  { %485 = vmatprep.subr.bf16.mxu0 %v1123_v5  ;;  %526 = vmatprep.subr.bf16.mxu1 %v1125_v6  ;;  %11 = vst [vmem:[#allocation2] sm:$0x1] %v10_v3 }
  0x3f   :  { %486 = vmatpush1.bf16.msra.mxu0 %v1127_v7  ;;  %527 = vmatpush1.bf16.msra.mxu1 %v1128_v8 }
  0x40   :  { %988 = vmatprep.subr.bf16.mxu0 %v1129_v9  ;;  %1010 = vmatprep.subr.bf16.mxu1 %v1130_v10 }
  0x42   :  { %488 = vmatmul.mubr.bf16.vlgmr.msra.gmra.mrb[0].mxu0 %v125_v12  ;;  %529 = vmatmul.mubr.bf16.vlgmr.msra.gmra.mrb[0].mxu1 %v125_v12 }
  0x43   :  { %989 = vmatpush3.bf16.msra.mxu0 %v1131_v11  ;;  %1011 = vmatpush3.bf16.msra.mxu1 %v1132_v13  ;;  %v955_v6 = vld [vmem:[#allocation2] ss:$0 sm:$0xff] }
  0x44   :  { %990 = vmatprep.subr.bf16.mxu0 %v1133_v14  ;;  %1012 = vmatprep.subr.bf16.mxu1 %v1134_v15 }
  0x47   :  { %991 = vmatpush3.bf16.msra.mxu0 %v1135_v16  ;;  %1013 = vmatpush3.bf16.msra.mxu1 %v1136_v17 }
  0x48   :  { %992 = vmatprep.subr.bf16.mxu0 %v1137_v18  ;;  %1014 = vmatprep.subr.bf16.mxu1 %v1138_v19 }
  0x4b   :  { %993 = vmatpush3.bf16.msra.mxu0 %v1139_v20  ;;  %1015 = vmatpush3.bf16.msra.mxu1 %v1140_v21 }
  0x4c   :  { %994 = vmatprep.subr.bf16.mxu0 %v1141_v22  ;;  %1016 = vmatprep.subr.bf16.mxu1 %v1142_v23 }
  0x4f   :  { %995 = vmatpush3.bf16.msra.mxu0 %v1143_v24  ;;  %1017 = vmatpush3.bf16.msra.mxu1 %v1144_v25 }
  0x50   :  { %996 = vmatprep.subr.bf16.mxu0 %v1145_v26  ;;  %1018 = vmatprep.subr.bf16.mxu1 %v1146_v27 }
  0x53   :  { %997 = vmatpush3.bf16.msra.mxu0 %v1147_v28  ;;  %1019 = vmatpush3.bf16.msra.mxu1 %v1148_v29 }
  0x54   :  { %998 = vmatprep.subr.bf16.mxu0 %v1149_v30  ;;  %1020 = vmatprep.subr.bf16.mxu1 %v1150_v31 }
  0x57   :  { %999 = vmatpush3.bf16.msra.mxu0 %v1151_v32  ;;  %1021 = vmatpush3.bf16.msra.mxu1 %v1152_v33 }
  0x58   :  { %1000 = vmatprep.subr.bf16.mxu0 %v1153_v34  ;;  %1022 = vmatprep.subr.bf16.mxu1 %v1154_v35 }
  0x5b   :  { %1001 = vmatpush3.bf16.msra.mxu0 %v1155_v36  ;;  %1023 = vmatpush3.bf16.msra.mxu1 %v1156_v37 }
  0x5c   :  { %1002 = vmatprep.subr.bf16.mxu0 %v1157_v38  ;;  %1024 = vmatprep.subr.bf16.mxu1 %v1158_v39 }
  0x5f   :  { %1003 = vmatpush3.bf16.msra.mxu0 %v1159_v40  ;;  %1025 = vmatpush3.bf16.msra.mxu1 %v1160_v41 }
 0x115   :  { %v489_v52 = vpop.f32.mrb[0].mxu0  ;;  %v530_v53 = vpop.f32.mrb[0].mxu1 }
 0x116   :  { %v490_v54 = vadd.f32 %v489_v52, %v93_v48  ;;  %v531_v55 = vadd.f32 %v530_v53, %v101_v49  ;;  %v491_v56 = vpop.f32.mrb[1].mxu0  ;;  %v532_v57 = vpop.f32.mrb[1].mxu1 }
 0x117   :  { %v492_v58 = vadd.f32 %v491_v56, %v97_v50  ;;  %v533_v59 = vadd.f32 %v532_v57, %v105_v51  ;;  %v493_v60 = vpop.f32.mrb[2].mxu0  ;;  %v534_v61 = vpop.f32.mrb[2].mxu1 }
 0x118   :  { %v539_v62 = vpack.c.bf16 %v531_v55, %v531_v55  ;;  %v494_v63 = vpop.f32.mrb[3].mxu0  ;;  %v535_v0 = vpop.f32.mrb[3].mxu1  ;;  %v537_v45 = vpack.c.bf16 %v490_v54, %v490_v54 }
 0x119   :  { %v538_v1 = vpack.c.bf16 %v492_v58, %v492_v58  ;;  %v540_v2 = vpack.c.bf16 %v533_v59, %v533_v59 }
 0x11b   :  { %836 = vmatprep.mubr.bf16.mxu0 %v538_v1  ;;  %876 = vmatprep.mubr.bf16.mxu1 %v540_v2 }
 0x11c   :  { %837 = vmatmul.mubr.bf16.vlgmr.msra.gmra.mrb[4].mxu0 %v537_v45  ;;  %877 = vmatmul.mubr.bf16.vlgmr.msra.gmra.mrb[4].mxu1 %v539_v62 }
 0x1ef   :  { %v1004_v4 = vpop.f32.mrb[4].mxu0  ;;  %v1026_v5 = vpop.f32.mrb[4].mxu1 }
 0x1f0   :  { %v1005_v7 = vpop.f32.mrb[5].mxu0  ;;  %v1027_v8 = vpop.f32.mrb[5].mxu1 }
 0x1f1   :  { %v1006_v9 = vadd.f32 %v1005_v7, %v1004_v4  ;;  %v1028_v10 = vadd.f32 %v1027_v8, %v1026_v5  ;;  %v1007_v11 = vpop.f32.mrb[6].mxu0  ;;  %v1029_v12 = vpop.f32.mrb[6].mxu1 }
 0x1f2   :  { %v1008_v13 = vpop.f32.mrb[7].mxu0  ;;  %v1030_v14 = vpop.f32.mrb[7].mxu1 }
 0x1f3   :  { %v839_v15 = vadd.f32 %v1006_v9, %v955_v6 }
 0x1f5   :  { %v879_v16 = vadd.f32 %v1028_v10, %v839_v15 }
 0x1f7   :  { %885 = vst.msk [vmem:[%s1504_s5] sm:$0x3] %vm884_vm0, %v879_v16 }

</bundles_post_ra>
